<compile_context>
chip_gen: v7x
topology: tpu7x:2x2x1
jax: 0.10.0
libtpu: 0.0.40
codegen_flags: <defaults>
</compile_context>

<pallas_src>
import functools

import jax
import jax.numpy as jnp
from jax import lax
from jax.experimental import pallas as pl
from jax.experimental.pallas import tpu as pltpu

EPS = 1e-5


def rblock_kernel(x_ref, w1_ref, w2_ref, out_ref, xpad_ref, hpad_ref, *,
                  mxu_dtype):
    Hp, W, C = xpad_ref.shape
    H = Hp - 2
    inv_hw = 1.0 / (H * W)

    # --- H halo (top/bottom zero rows only; the W halo is handled by
    # roll + mask, so no full-buffer zeroing and no unaligned W stores).
    zero_row = jnp.zeros((W, C), mxu_dtype)
    xpad_ref[0] = zero_row
    xpad_ref[H + 1] = zero_row
    hpad_ref[0] = zero_row
    hpad_ref[H + 1] = zero_row

    # Stage the input into the interior of the H-haloed scratch (aligned,
    # leading-axis store; cast to the MXU compute dtype).
    xpad_ref[1:H + 1] = x_ref[0].astype(mxu_dtype)

    # Tiny (1, W, 1) edge masks for the kw = 0 / kw = 2 taps; broadcast
    # against the (H, W, C) rolled planes inside jnp.where.
    col = lax.broadcasted_iota(jnp.int32, (1, W, 1), 1)
    not_first = col > 0            # kill wrapped column 0 of the left tap
    not_last = col < (W - 1)       # kill wrapped column W-1 of the right tap

    def conv3x3(src_ref, w_ref):
        """'same' 3x3 conv (no bias) from an (H+2, W, C) haloed VMEM ref.

        Per kh: one cheap leading-axis slice + two pltpu.roll shifts along W
        (XLU slot), then three accumulating (H*W, C) x (C, C) MXU dots using
        w_ref[kh, kw].  Returns an (H, W, C) f32 accumulator.
        """
        acc = None
        for kh in range(3):
            rows = src_ref[kh:kh + H]                       # (H, W, C)
            left = jnp.where(not_first,
                             pltpu.roll(rows, shift=1, axis=1),
                             jnp.zeros_like(rows))
            right = jnp.where(not_last,
                              pltpu.roll(rows, shift=W - 1, axis=1),
                              jnp.zeros_like(rows))
            for kw, tap in ((0, left), (1, rows), (2, right)):
                part = lax.dot_general(
                    tap, w_ref[kh, kw],                     # (C, C) slice
                    dimension_numbers=(((2,), (0,)), ((), ())),
                    preferred_element_type=jnp.float32)
                acc = part if acc is None else acc + part
        return acc

    def inorm(a):
        # InstanceNorm fused on the f32 conv accumulator (E[x^2]-E[x]^2 form;
        # conditioning helped by the dropped bias). rsqrt goes to the EUP slot.
        s = jnp.sum(a, axis=(0, 1), keepdims=True)
        s2 = jnp.sum(a * a, axis=(0, 1), keepdims=True)
        m = s * inv_hw
        v = jnp.maximum(s2 * inv_hw - m * m, 0.0)
        return (a - m) * lax.rsqrt(v + EPS)

    # ---- GBlock 1: Conv3x3 -> InstanceNorm -> ReLU ----
    h = jnp.maximum(inorm(conv3x3(xpad_ref, w1_ref)), 0.0)
    hpad_ref[1:H + 1] = h.astype(mxu_dtype)                 # aligned interior store

    # ---- GBlock 2: Conv3x3 -> InstanceNorm (no activation) ----
    y = inorm(conv3x3(hpad_ref, w2_ref))

    # ---- residual add: re-read the VMEM-resident input block instead of
    #      keeping an f32 plane live across both convs.
    out_ref[0] = (x_ref[0].astype(jnp.float32) + y).astype(out_ref.dtype)


def _vmem_limit_bytes(H, W, C, x_dtype, out_dtype, mxu_dtype):
    """Working-set-derived VMEM request (capped), instead of a flat 48 MiB."""
    mxu_b = jnp.dtype(mxu_dtype).itemsize
    scratch = 2 * (H + 2) * W * C * mxu_b                    # haloed act scratches
    io = 2 * H * W * C * (jnp.dtype(x_dtype).itemsize
                          + jnp.dtype(out_dtype).itemsize)   # double-buffered I/O
    weights = 2 * 9 * C * C * mxu_b                          # single-buffered slabs
    live = 4 * H * W * C * 4                                 # f32 acc / temps headroom
    est = scratch + io + weights + live
    return int(min(48 * 2 ** 20, max(16 * 2 ** 20, 2 * est)))


def rblock_pallas_nhwc(x_nhwc, w1, w2, *, mxu_dtype=jnp.bfloat16,
                       vmem_limit_bytes=None):
    """NHWC entry point: x (N, H, W, C); w* (3, 3, Cin, Cout) HWIO -> NHWC out.

    Prefer this across a residual-block stack so the NCHW<->NHWC transposes
    are paid once per network, not once per block.
    """
    N, H, W, C = x_nhwc.shape
    w1p = w1.astype(mxu_dtype)
    w2p = w2.astype(mxu_dtype)
    if vmem_limit_bytes is None:
        vmem_limit_bytes = _vmem_limit_bytes(H, W, C, x_nhwc.dtype,
                                             x_nhwc.dtype, mxu_dtype)

    kernel = functools.partial(rblock_kernel, mxu_dtype=mxu_dtype)

    return pl.pallas_call(
        kernel,
        out_shape=jax.ShapeDtypeStruct((N, H, W, C), x_nhwc.dtype),
        grid_spec=pltpu.PrefetchScalarGridSpec(
            num_scalar_prefetch=0,
            grid=(N,),
            in_specs=[
                pl.BlockSpec((1, H, W, C), lambda n: (n, 0, 0, 0)),
                pl.BlockSpec((3, 3, C, C), lambda n: (0, 0, 0, 0),
                             pipeline_mode=pl.Buffered(1)),
                pl.BlockSpec((3, 3, C, C), lambda n: (0, 0, 0, 0),
                             pipeline_mode=pl.Buffered(1)),
            ],
            out_specs=pl.BlockSpec((1, H, W, C), lambda n: (n, 0, 0, 0)),
            scratch_shapes=[
                pltpu.VMEM((H + 2, W, C), mxu_dtype),        # staged input, H halo
                pltpu.VMEM((H + 2, W, C), mxu_dtype),        # hidden act, H halo
            ],
        ),
        compiler_params=pltpu.CompilerParams(
            dimension_semantics=("parallel",),               # 2 TCs on v7x
            vmem_limit_bytes=vmem_limit_bytes,
        ),
    )(x_nhwc, w1p, w2p)


def rblock_pallas(x_nchw, w1, b1, w2, b2, *, mxu_dtype=jnp.bfloat16,
                  vmem_limit_bytes=None):
    """PyTorch-layout entry: x (N, C, H, W); w* (3, 3, Cin, Cout); b* (C,).

    b1/b2 are accepted for parity with nn.Conv2d(bias=True) but are unused:
    a per-channel bias feeding a non-affine InstanceNorm is exactly cancelled
    by the mean subtraction, so the kernel skips the dead adds/DMAs.
    """
    del b1, b2
    x = jnp.transpose(x_nchw, (0, 2, 3, 1))                  # NHWC (lanes = C)
    out = rblock_pallas_nhwc(x, w1, w2, mxu_dtype=mxu_dtype,
                             vmem_limit_bytes=vmem_limit_bytes)
    return jnp.transpose(out, (0, 3, 1, 2))                  # back to NCHW


def rblock_ref(x_nchw, w1, b1, w2, b2):
    """Pure-JAX f32 reference (NCHW in/out), biases included, for validation."""
    x = jnp.transpose(x_nchw, (0, 2, 3, 1))

    def conv(a, w, b):
        y = lax.conv_general_dilated(
            a, w, window_strides=(1, 1), padding="SAME",
            dimension_numbers=("NHWC", "HWIO", "NHWC"))
        return y + b.reshape(1, 1, 1, -1)

    def inorm(a):
        m = jnp.mean(a, axis=(1, 2), keepdims=True)
        v = jnp.mean((a - m) ** 2, axis=(1, 2), keepdims=True)
        return (a - m) / jnp.sqrt(v + EPS)

    h = jnp.maximum(inorm(conv(x, w1, b1)), 0.0)
    y = inorm(conv(h, w2, b2))
    return jnp.transpose(x + y, (0, 3, 1, 2))


if __name__ == "__main__":
    N, C, H, W = 2, 4, 16, 16
    key = jax.random.PRNGKey(0)
    kx, kw1, kb1, kw2, kb2 = jax.random.split(key, 5)

    x = jax.random.normal(kx, (N, C, H, W), jnp.float32)
    # deterministic synthetic params (HWIO layout for the conv weights)
    w1 = 0.1 * jax.random.normal(kw1, (3, 3, C, C), jnp.float32)
    b1 = 0.1 * jax.random.normal(kb1, (C,), jnp.float32)
    w2 = 0.1 * jax.random.normal(kw2, (3, 3, C, C), jnp.float32)
    b2 = 0.1 * jax.random.normal(kb2, (C,), jnp.float32)

    # Reference keeps the conv biases; the kernel omits them (exactly
    # cancelled by non-affine InstanceNorm) — the comparison proves it.
    ref = rblock_ref(x, w1, b1, w2, b2)

    # f32 MXU path: validates the roll/mask + per-(kh,kw) accumulating dots.
    out_f32 = jax.block_until_ready(
        rblock_pallas(x, w1, b1, w2, b2, mxu_dtype=jnp.float32))
    assert out_f32.shape == (N, C, H, W)
    assert jnp.allclose(out_f32, ref, atol=1e-3, rtol=1e-3), "f32 path mismatch"

    # bf16 MXU path (default): bf16 matmul operands, f32 accumulate/IN/residual.
    out_bf16 = jax.block_until_ready(rblock_pallas(x, w1, b1, w2, b2))
    assert out_bf16.shape == (N, C, H, W)
    assert jnp.allclose(out_bf16, ref, atol=5e-2, rtol=5e-2), "bf16 path mismatch"

    print("KERNEL_OK")
</pallas_src>

<mosaic_0001>
module attributes {stable_mosaic.version = 11 : i64} {
  func.func @rblock_kernel(%arg0: i32, %arg1: memref<1x16x16x4xf32, #tpu.memory_space<vmem>>, %arg2: memref<3x3x4x4xf32, #tpu.memory_space<vmem>>, %arg3: memref<3x3x4x4xf32, #tpu.memory_space<vmem>>, %arg4: memref<1x16x16x4xf32, #tpu.memory_space<vmem>>, %arg5: memref<18x16x4xf32, #tpu.memory_space<vmem>>, %arg6: memref<18x16x4xf32, #tpu.memory_space<vmem>>) attributes {dimension_semantics = [#tpu.dimension_semantics<parallel>], iteration_bounds = array<i64: 2>, scalar_prefetch = 0 : i64, scratch_operands = 2 : i64, tpu.core_type = #tpu.core_type<tc>, window_params = [{transform_indices = @transform_0, window_bounds = array<i64: 1, 16, 16, 4>}, {pipeline_mode = #tpu.pipeline_mode<synchronous>, transform_indices = @transform_1, window_bounds = array<i64: 3, 3, 4, 4>}, {pipeline_mode = #tpu.pipeline_mode<synchronous>, transform_indices = @transform_2, window_bounds = array<i64: 3, 3, 4, 4>}, {transform_indices = @transform_3, window_bounds = array<i64: 1, 16, 16, 4>}]} {
    %cst = arith.constant 0.000000e+00 : f32
    %0 = vector.broadcast %cst : f32 to vector<16x4xf32>
    %c0 = arith.constant 0 : index
    %c0_0 = arith.constant 0 : index
    %c0_1 = arith.constant 0 : index
    %1 = vector.load %arg5[%c0, %c0_0, %c0_1] : memref<18x16x4xf32, #tpu.memory_space<vmem>>, vector<1x16x4xf32>
    %2 = vector.shape_cast %1 : vector<1x16x4xf32> to vector<16x4xf32>
    %3 = vector.shape_cast %0 : vector<16x4xf32> to vector<1x16x4xf32>
    tpu.vector_store %arg5[%c0, %c0_0, %c0_1], %3 {strides = array<i32>} : memref<18x16x4xf32, #tpu.memory_space<vmem>>, vector<1x16x4xf32>,
    %c17 = arith.constant 17 : index
    %c0_2 = arith.constant 0 : index
    %c0_3 = arith.constant 0 : index
    %4 = vector.load %arg5[%c17, %c0_2, %c0_3] : memref<18x16x4xf32, #tpu.memory_space<vmem>>, vector<1x16x4xf32>
    %5 = vector.shape_cast %4 : vector<1x16x4xf32> to vector<16x4xf32>
    %6 = vector.shape_cast %0 : vector<16x4xf32> to vector<1x16x4xf32>
    tpu.vector_store %arg5[%c17, %c0_2, %c0_3], %6 {strides = array<i32>} : memref<18x16x4xf32, #tpu.memory_space<vmem>>, vector<1x16x4xf32>,
    %c0_4 = arith.constant 0 : index
    %c0_5 = arith.constant 0 : index
    %c0_6 = arith.constant 0 : index
    %7 = vector.load %arg6[%c0_4, %c0_5, %c0_6] : memref<18x16x4xf32, #tpu.memory_space<vmem>>, vector<1x16x4xf32>
    %8 = vector.shape_cast %7 : vector<1x16x4xf32> to vector<16x4xf32>
    %9 = vector.shape_cast %0 : vector<16x4xf32> to vector<1x16x4xf32>
    tpu.vector_store %arg6[%c0_4, %c0_5, %c0_6], %9 {strides = array<i32>} : memref<18x16x4xf32, #tpu.memory_space<vmem>>, vector<1x16x4xf32>,
    %c17_7 = arith.constant 17 : index
    %c0_8 = arith.constant 0 : index
    %c0_9 = arith.constant 0 : index
    %10 = vector.load %arg6[%c17_7, %c0_8, %c0_9] : memref<18x16x4xf32, #tpu.memory_space<vmem>>, vector<1x16x4xf32>
    %11 = vector.shape_cast %10 : vector<1x16x4xf32> to vector<16x4xf32>
    %12 = vector.shape_cast %0 : vector<16x4xf32> to vector<1x16x4xf32>
    tpu.vector_store %arg6[%c17_7, %c0_8, %c0_9], %12 {strides = array<i32>} : memref<18x16x4xf32, #tpu.memory_space<vmem>>, vector<1x16x4xf32>,
    %c0_10 = arith.constant 0 : index
    %c0_11 = arith.constant 0 : index
    %c0_12 = arith.constant 0 : index
    %c0_13 = arith.constant 0 : index
    %13 = vector.load %arg1[%c0_10, %c0_11, %c0_12, %c0_13] : memref<1x16x16x4xf32, #tpu.memory_space<vmem>>, vector<1x16x16x4xf32>
    %14 = vector.shape_cast %13 : vector<1x16x16x4xf32> to vector<16x16x4xf32>
    %c1 = arith.constant 1 : index
    %c0_14 = arith.constant 0 : index
    %c0_15 = arith.constant 0 : index
    %15 = vector.load %arg5[%c1, %c0_14, %c0_15] : memref<18x16x4xf32, #tpu.memory_space<vmem>>, vector<16x16x4xf32>
    tpu.vector_store %arg5[%c1, %c0_14, %c0_15], %14 {strides = array<i32>} : memref<18x16x4xf32, #tpu.memory_space<vmem>>, vector<16x16x4xf32>,
    %16 = tpu.iota {dimensions = array<i32: 1>} : vector<1x16x1xi32>
    %c0_i32 = arith.constant 0 : i32
    %17 = vector.broadcast %c0_i32 : i32 to vector<1x16x1xi32>
    %18 = arith.cmpi sgt, %16, %17 : vector<1x16x1xi32>
    %c15_i32 = arith.constant 15 : i32
    %19 = vector.broadcast %c15_i32 : i32 to vector<1x16x1xi32>
    %20 = arith.cmpi slt, %16, %19 : vector<1x16x1xi32>
    %c0_16 = arith.constant 0 : index
    %c0_17 = arith.constant 0 : index
    %c0_18 = arith.constant 0 : index
    %21 = vector.load %arg5[%c0_16, %c0_17, %c0_18] : memref<18x16x4xf32, #tpu.memory_space<vmem>>, vector<16x16x4xf32>
    %c1_i32 = arith.constant 1 : i32
    %22 = tpu.dynamic_rotate %21 by %c1_i32 dim 1 : vector<16x16x4xf32>, i32 -> vector<16x16x4xf32>
    %cst_19 = arith.constant 0.000000e+00 : f32
    %23 = vector.broadcast %cst_19 : f32 to vector<16x16x4xf32>
    %24 = vector.shape_cast %18 : vector<1x16x1xi1> to vector<1x16x1xi1>
    %25 = vector.broadcast %24 : vector<1x16x1xi1> to vector<16x16x4xi1>
    %26 = arith.select %25, %22, %23 : vector<16x16x4xi1>, vector<16x16x4xf32>
    %c15_i32_20 = arith.constant 15 : i32
    %27 = tpu.dynamic_rotate %21 by %c15_i32_20 dim 1 : vector<16x16x4xf32>, i32 -> vector<16x16x4xf32>
    %cst_21 = arith.constant 0.000000e+00 : f32
    %28 = vector.broadcast %cst_21 : f32 to vector<16x16x4xf32>
    %29 = vector.shape_cast %20 : vector<1x16x1xi1> to vector<1x16x1xi1>
    %30 = vector.broadcast %29 : vector<1x16x1xi1> to vector<16x16x4xi1>
    %31 = arith.select %30, %27, %28 : vector<16x16x4xi1>, vector<16x16x4xf32>
    %c0_22 = arith.constant 0 : index
    %c0_23 = arith.constant 0 : index
    %c0_24 = arith.constant 0 : index
    %c0_25 = arith.constant 0 : index
    %32 = vector.load %arg2[%c0_22, %c0_23, %c0_24, %c0_25] : memref<3x3x4x4xf32, #tpu.memory_space<vmem>>, vector<1x1x4x4xf32>
    %33 = vector.shape_cast %32 : vector<1x1x4x4xf32> to vector<4x4xf32>
    %cst_26 = arith.constant dense<0.000000e+00> : vector<16x16x4xf32>
    %34 = tpu.matmul %26, %33, %cst_26 {dimension_numbers = #tpu.dot_dimension_numbers<[2], [0], [0, 1], [1], [0, 0, 0, 1, 1, 1], [], []>} : vector<16x16x4xf32>, vector<4x4xf32>, vector<16x16x4xf32> -> vector<16x16x4xf32>
    %c0_27 = arith.constant 0 : index
    %c1_28 = arith.constant 1 : index
    %c0_29 = arith.constant 0 : index
    %c0_30 = arith.constant 0 : index
    %35 = vector.load %arg2[%c0_27, %c1_28, %c0_29, %c0_30] : memref<3x3x4x4xf32, #tpu.memory_space<vmem>>, vector<1x1x4x4xf32>
    %36 = vector.shape_cast %35 : vector<1x1x4x4xf32> to vector<4x4xf32>
    %cst_31 = arith.constant dense<0.000000e+00> : vector<16x16x4xf32>
    %37 = tpu.matmul %21, %36, %cst_31 {dimension_numbers = #tpu.dot_dimension_numbers<[2], [0], [0, 1], [1], [0, 0, 0, 1, 1, 1], [], []>} : vector<16x16x4xf32>, vector<4x4xf32>, vector<16x16x4xf32> -> vector<16x16x4xf32>
    %38 = arith.addf %34, %37 : vector<16x16x4xf32>
    %c0_32 = arith.constant 0 : index
    %c2 = arith.constant 2 : index
    %c0_33 = arith.constant 0 : index
    %c0_34 = arith.constant 0 : index
    %39 = vector.load %arg2[%c0_32, %c2, %c0_33, %c0_34] : memref<3x3x4x4xf32, #tpu.memory_space<vmem>>, vector<1x1x4x4xf32>
    %40 = vector.shape_cast %39 : vector<1x1x4x4xf32> to vector<4x4xf32>
    %cst_35 = arith.constant dense<0.000000e+00> : vector<16x16x4xf32>
    %41 = tpu.matmul %31, %40, %cst_35 {dimension_numbers = #tpu.dot_dimension_numbers<[2], [0], [0, 1], [1], [0, 0, 0, 1, 1, 1], [], []>} : vector<16x16x4xf32>, vector<4x4xf32>, vector<16x16x4xf32> -> vector<16x16x4xf32>
    %42 = arith.addf %38, %41 : vector<16x16x4xf32>
    %c1_36 = arith.constant 1 : index
    %c0_37 = arith.constant 0 : index
    %c0_38 = arith.constant 0 : index
    %43 = vector.load %arg5[%c1_36, %c0_37, %c0_38] : memref<18x16x4xf32, #tpu.memory_space<vmem>>, vector<16x16x4xf32>
    %c1_i32_39 = arith.constant 1 : i32
    %44 = tpu.dynamic_rotate %43 by %c1_i32_39 dim 1 : vector<16x16x4xf32>, i32 -> vector<16x16x4xf32>
    %cst_40 = arith.constant 0.000000e+00 : f32
    %45 = vector.broadcast %cst_40 : f32 to vector<16x16x4xf32>
    %46 = vector.shape_cast %18 : vector<1x16x1xi1> to vector<1x16x1xi1>
    %47 = vector.broadcast %46 : vector<1x16x1xi1> to vector<16x16x4xi1>
    %48 = arith.select %47, %44, %45 : vector<16x16x4xi1>, vector<16x16x4xf32>
    %c15_i32_41 = arith.constant 15 : i32
    %49 = tpu.dynamic_rotate %43 by %c15_i32_41 dim 1 : vector<16x16x4xf32>, i32 -> vector<16x16x4xf32>
    %cst_42 = arith.constant 0.000000e+00 : f32
    %50 = vector.broadcast %cst_42 : f32 to vector<16x16x4xf32>
    %51 = vector.shape_cast %20 : vector<1x16x1xi1> to vector<1x16x1xi1>
    %52 = vector.broadcast %51 : vector<1x16x1xi1> to vector<16x16x4xi1>
    %53 = arith.select %52, %49, %50 : vector<16x16x4xi1>, vector<16x16x4xf32>
    %c1_43 = arith.constant 1 : index
    %c0_44 = arith.constant 0 : index
    %c0_45 = arith.constant 0 : index
    %c0_46 = arith.constant 0 : index
    %54 = vector.load %arg2[%c1_43, %c0_44, %c0_45, %c0_46] : memref<3x3x4x4xf32, #tpu.memory_space<vmem>>, vector<1x1x4x4xf32>
    %55 = vector.shape_cast %54 : vector<1x1x4x4xf32> to vector<4x4xf32>
    %cst_47 = arith.constant dense<0.000000e+00> : vector<16x16x4xf32>
    %56 = tpu.matmul %48, %55, %cst_47 {dimension_numbers = #tpu.dot_dimension_numbers<[2], [0], [0, 1], [1], [0, 0, 0, 1, 1, 1], [], []>} : vector<16x16x4xf32>, vector<4x4xf32>, vector<16x16x4xf32> -> vector<16x16x4xf32>
    %57 = arith.addf %42, %56 : vector<16x16x4xf32>
    %c1_48 = arith.constant 1 : index
    %c1_49 = arith.constant 1 : index
    %c0_50 = arith.constant 0 : index
    %c0_51 = arith.constant 0 : index
    %58 = vector.load %arg2[%c1_48, %c1_49, %c0_50, %c0_51] : memref<3x3x4x4xf32, #tpu.memory_space<vmem>>, vector<1x1x4x4xf32>
    %59 = vector.shape_cast %58 : vector<1x1x4x4xf32> to vector<4x4xf32>
    %cst_52 = arith.constant dense<0.000000e+00> : vector<16x16x4xf32>
    %60 = tpu.matmul %43, %59, %cst_52 {dimension_numbers = #tpu.dot_dimension_numbers<[2], [0], [0, 1], [1], [0, 0, 0, 1, 1, 1], [], []>} : vector<16x16x4xf32>, vector<4x4xf32>, vector<16x16x4xf32> -> vector<16x16x4xf32>
    %61 = arith.addf %57, %60 : vector<16x16x4xf32>
    %c1_53 = arith.constant 1 : index
    %c2_54 = arith.constant 2 : index
    %c0_55 = arith.constant 0 : index
    %c0_56 = arith.constant 0 : index
    %62 = vector.load %arg2[%c1_53, %c2_54, %c0_55, %c0_56] : memref<3x3x4x4xf32, #tpu.memory_space<vmem>>, vector<1x1x4x4xf32>
    %63 = vector.shape_cast %62 : vector<1x1x4x4xf32> to vector<4x4xf32>
    %cst_57 = arith.constant dense<0.000000e+00> : vector<16x16x4xf32>
    %64 = tpu.matmul %53, %63, %cst_57 {dimension_numbers = #tpu.dot_dimension_numbers<[2], [0], [0, 1], [1], [0, 0, 0, 1, 1, 1], [], []>} : vector<16x16x4xf32>, vector<4x4xf32>, vector<16x16x4xf32> -> vector<16x16x4xf32>
    %65 = arith.addf %61, %64 : vector<16x16x4xf32>
    %c2_58 = arith.constant 2 : index
    %c0_59 = arith.constant 0 : index
    %c0_60 = arith.constant 0 : index
    %66 = vector.load %arg5[%c2_58, %c0_59, %c0_60] : memref<18x16x4xf32, #tpu.memory_space<vmem>>, vector<16x16x4xf32>
    %c1_i32_61 = arith.constant 1 : i32
    %67 = tpu.dynamic_rotate %66 by %c1_i32_61 dim 1 : vector<16x16x4xf32>, i32 -> vector<16x16x4xf32>
    %cst_62 = arith.constant 0.000000e+00 : f32
    %68 = vector.broadcast %cst_62 : f32 to vector<16x16x4xf32>
    %69 = vector.shape_cast %18 : vector<1x16x1xi1> to vector<1x16x1xi1>
    %70 = vector.broadcast %69 : vector<1x16x1xi1> to vector<16x16x4xi1>
    %71 = arith.select %70, %67, %68 : vector<16x16x4xi1>, vector<16x16x4xf32>
    %c15_i32_63 = arith.constant 15 : i32
    %72 = tpu.dynamic_rotate %66 by %c15_i32_63 dim 1 : vector<16x16x4xf32>, i32 -> vector<16x16x4xf32>
    %cst_64 = arith.constant 0.000000e+00 : f32
    %73 = vector.broadcast %cst_64 : f32 to vector<16x16x4xf32>
    %74 = vector.shape_cast %20 : vector<1x16x1xi1> to vector<1x16x1xi1>
    %75 = vector.broadcast %74 : vector<1x16x1xi1> to vector<16x16x4xi1>
    %76 = arith.select %75, %72, %73 : vector<16x16x4xi1>, vector<16x16x4xf32>
    %c2_65 = arith.constant 2 : index
    %c0_66 = arith.constant 0 : index
    %c0_67 = arith.constant 0 : index
    %c0_68 = arith.constant 0 : index
    %77 = vector.load %arg2[%c2_65, %c0_66, %c0_67, %c0_68] : memref<3x3x4x4xf32, #tpu.memory_space<vmem>>, vector<1x1x4x4xf32>
    %78 = vector.shape_cast %77 : vector<1x1x4x4xf32> to vector<4x4xf32>
    %cst_69 = arith.constant dense<0.000000e+00> : vector<16x16x4xf32>
    %79 = tpu.matmul %71, %78, %cst_69 {dimension_numbers = #tpu.dot_dimension_numbers<[2], [0], [0, 1], [1], [0, 0, 0, 1, 1, 1], [], []>} : vector<16x16x4xf32>, vector<4x4xf32>, vector<16x16x4xf32> -> vector<16x16x4xf32>
    %80 = arith.addf %65, %79 : vector<16x16x4xf32>
    %c2_70 = arith.constant 2 : index
    %c1_71 = arith.constant 1 : index
    %c0_72 = arith.constant 0 : index
    %c0_73 = arith.constant 0 : index
    %81 = vector.load %arg2[%c2_70, %c1_71, %c0_72, %c0_73] : memref<3x3x4x4xf32, #tpu.memory_space<vmem>>, vector<1x1x4x4xf32>
    %82 = vector.shape_cast %81 : vector<1x1x4x4xf32> to vector<4x4xf32>
    %cst_74 = arith.constant dense<0.000000e+00> : vector<16x16x4xf32>
    %83 = tpu.matmul %66, %82, %cst_74 {dimension_numbers = #tpu.dot_dimension_numbers<[2], [0], [0, 1], [1], [0, 0, 0, 1, 1, 1], [], []>} : vector<16x16x4xf32>, vector<4x4xf32>, vector<16x16x4xf32> -> vector<16x16x4xf32>
    %84 = arith.addf %80, %83 : vector<16x16x4xf32>
    %c2_75 = arith.constant 2 : index
    %c2_76 = arith.constant 2 : index
    %c0_77 = arith.constant 0 : index
    %c0_78 = arith.constant 0 : index
    %85 = vector.load %arg2[%c2_75, %c2_76, %c0_77, %c0_78] : memref<3x3x4x4xf32, #tpu.memory_space<vmem>>, vector<1x1x4x4xf32>
    %86 = vector.shape_cast %85 : vector<1x1x4x4xf32> to vector<4x4xf32>
    %cst_79 = arith.constant dense<0.000000e+00> : vector<16x16x4xf32>
    %87 = tpu.matmul %76, %86, %cst_79 {dimension_numbers = #tpu.dot_dimension_numbers<[2], [0], [0, 1], [1], [0, 0, 0, 1, 1, 1], [], []>} : vector<16x16x4xf32>, vector<4x4xf32>, vector<16x16x4xf32> -> vector<16x16x4xf32>
    %88 = arith.addf %84, %87 : vector<16x16x4xf32>
    %cst_80 = arith.constant dense<0.000000e+00> : vector<4xf32>
    %89 = vector.multi_reduction <add>, %88, %cst_80 [0, 1] : vector<16x16x4xf32> to vector<4xf32>
    %90 = vector.shape_cast %89 : vector<4xf32> to vector<1x1x4xf32>
    %91 = arith.mulf %88, %88 : vector<16x16x4xf32>
    %cst_81 = arith.constant dense<0.000000e+00> : vector<4xf32>
    %92 = vector.multi_reduction <add>, %91, %cst_81 [0, 1] : vector<16x16x4xf32> to vector<4xf32>
    %93 = vector.shape_cast %92 : vector<4xf32> to vector<1x1x4xf32>
    %cst_82 = arith.constant 3.906250e-03 : f32
    %94 = vector.broadcast %cst_82 : f32 to vector<1x1x4xf32>
    %95 = arith.mulf %90, %94 : vector<1x1x4xf32>
    %cst_83 = arith.constant 3.906250e-03 : f32
    %96 = vector.broadcast %cst_83 : f32 to vector<1x1x4xf32>
    %97 = arith.mulf %93, %96 : vector<1x1x4xf32>
    %98 = arith.mulf %95, %95 : vector<1x1x4xf32>
    %99 = arith.subf %97, %98 : vector<1x1x4xf32>
    %cst_84 = arith.constant 0.000000e+00 : f32
    %100 = vector.broadcast %cst_84 : f32 to vector<1x1x4xf32>
    %101 = arith.maximumf %99, %100 : vector<1x1x4xf32>
    %102 = vector.broadcast %95 : vector<1x1x4xf32> to vector<16x16x4xf32>
    %103 = arith.subf %88, %102 : vector<16x16x4xf32>
    %cst_85 = arith.constant 9.99999974E-6 : f32
    %104 = vector.broadcast %cst_85 : f32 to vector<1x1x4xf32>
    %105 = arith.addf %101, %104 : vector<1x1x4xf32>
    %106 = math.rsqrt %105 : vector<1x1x4xf32>
    %107 = vector.broadcast %106 : vector<1x1x4xf32> to vector<16x16x4xf32>
    %108 = arith.mulf %103, %107 : vector<16x16x4xf32>
    %cst_86 = arith.constant 0.000000e+00 : f32
    %109 = vector.broadcast %cst_86 : f32 to vector<16x16x4xf32>
    %110 = arith.maximumf %108, %109 : vector<16x16x4xf32>
    %c1_87 = arith.constant 1 : index
    %c0_88 = arith.constant 0 : index
    %c0_89 = arith.constant 0 : index
    %111 = vector.load %arg6[%c1_87, %c0_88, %c0_89] : memref<18x16x4xf32, #tpu.memory_space<vmem>>, vector<16x16x4xf32>
    tpu.vector_store %arg6[%c1_87, %c0_88, %c0_89], %110 {strides = array<i32>} : memref<18x16x4xf32, #tpu.memory_space<vmem>>, vector<16x16x4xf32>,
    %c0_90 = arith.constant 0 : index
    %c0_91 = arith.constant 0 : index
    %c0_92 = arith.constant 0 : index
    %112 = vector.load %arg6[%c0_90, %c0_91, %c0_92] : memref<18x16x4xf32, #tpu.memory_space<vmem>>, vector<16x16x4xf32>
    %c1_i32_93 = arith.constant 1 : i32
    %113 = tpu.dynamic_rotate %112 by %c1_i32_93 dim 1 : vector<16x16x4xf32>, i32 -> vector<16x16x4xf32>
    %cst_94 = arith.constant 0.000000e+00 : f32
    %114 = vector.broadcast %cst_94 : f32 to vector<16x16x4xf32>
    %115 = vector.shape_cast %18 : vector<1x16x1xi1> to vector<1x16x1xi1>
    %116 = vector.broadcast %115 : vector<1x16x1xi1> to vector<16x16x4xi1>
    %117 = arith.select %116, %113, %114 : vector<16x16x4xi1>, vector<16x16x4xf32>
    %c15_i32_95 = arith.constant 15 : i32
    %118 = tpu.dynamic_rotate %112 by %c15_i32_95 dim 1 : vector<16x16x4xf32>, i32 -> vector<16x16x4xf32>
    %cst_96 = arith.constant 0.000000e+00 : f32
    %119 = vector.broadcast %cst_96 : f32 to vector<16x16x4xf32>
    %120 = vector.shape_cast %20 : vector<1x16x1xi1> to vector<1x16x1xi1>
    %121 = vector.broadcast %120 : vector<1x16x1xi1> to vector<16x16x4xi1>
    %122 = arith.select %121, %118, %119 : vector<16x16x4xi1>, vector<16x16x4xf32>
    %c0_97 = arith.constant 0 : index
    %c0_98 = arith.constant 0 : index
    %c0_99 = arith.constant 0 : index
    %c0_100 = arith.constant 0 : index
    %123 = vector.load %arg3[%c0_97, %c0_98, %c0_99, %c0_100] : memref<3x3x4x4xf32, #tpu.memory_space<vmem>>, vector<1x1x4x4xf32>
    %124 = vector.shape_cast %123 : vector<1x1x4x4xf32> to vector<4x4xf32>
    %cst_101 = arith.constant dense<0.000000e+00> : vector<16x16x4xf32>
    %125 = tpu.matmul %117, %124, %cst_101 {dimension_numbers = #tpu.dot_dimension_numbers<[2], [0], [0, 1], [1], [0, 0, 0, 1, 1, 1], [], []>} : vector<16x16x4xf32>, vector<4x4xf32>, vector<16x16x4xf32> -> vector<16x16x4xf32>
    %c0_102 = arith.constant 0 : index
    %c1_103 = arith.constant 1 : index
    %c0_104 = arith.constant 0 : index
    %c0_105 = arith.constant 0 : index
    %126 = vector.load %arg3[%c0_102, %c1_103, %c0_104, %c0_105] : memref<3x3x4x4xf32, #tpu.memory_space<vmem>>, vector<1x1x4x4xf32>
    %127 = vector.shape_cast %126 : vector<1x1x4x4xf32> to vector<4x4xf32>
    %cst_106 = arith.constant dense<0.000000e+00> : vector<16x16x4xf32>
    %128 = tpu.matmul %112, %127, %cst_106 {dimension_numbers = #tpu.dot_dimension_numbers<[2], [0], [0, 1], [1], [0, 0, 0, 1, 1, 1], [], []>} : vector<16x16x4xf32>, vector<4x4xf32>, vector<16x16x4xf32> -> vector<16x16x4xf32>
    %129 = arith.addf %125, %128 : vector<16x16x4xf32>
    %c0_107 = arith.constant 0 : index
    %c2_108 = arith.constant 2 : index
    %c0_109 = arith.constant 0 : index
    %c0_110 = arith.constant 0 : index
    %130 = vector.load %arg3[%c0_107, %c2_108, %c0_109, %c0_110] : memref<3x3x4x4xf32, #tpu.memory_space<vmem>>, vector<1x1x4x4xf32>
    %131 = vector.shape_cast %130 : vector<1x1x4x4xf32> to vector<4x4xf32>
    %cst_111 = arith.constant dense<0.000000e+00> : vector<16x16x4xf32>
    %132 = tpu.matmul %122, %131, %cst_111 {dimension_numbers = #tpu.dot_dimension_numbers<[2], [0], [0, 1], [1], [0, 0, 0, 1, 1, 1], [], []>} : vector<16x16x4xf32>, vector<4x4xf32>, vector<16x16x4xf32> -> vector<16x16x4xf32>
    %133 = arith.addf %129, %132 : vector<16x16x4xf32>
    %c1_112 = arith.constant 1 : index
    %c0_113 = arith.constant 0 : index
    %c0_114 = arith.constant 0 : index
    %134 = vector.load %arg6[%c1_112, %c0_113, %c0_114] : memref<18x16x4xf32, #tpu.memory_space<vmem>>, vector<16x16x4xf32>
    %c1_i32_115 = arith.constant 1 : i32
    %135 = tpu.dynamic_rotate %134 by %c1_i32_115 dim 1 : vector<16x16x4xf32>, i32 -> vector<16x16x4xf32>
    %cst_116 = arith.constant 0.000000e+00 : f32
    %136 = vector.broadcast %cst_116 : f32 to vector<16x16x4xf32>
    %137 = vector.shape_cast %18 : vector<1x16x1xi1> to vector<1x16x1xi1>
    %138 = vector.broadcast %137 : vector<1x16x1xi1> to vector<16x16x4xi1>
    %139 = arith.select %138, %135, %136 : vector<16x16x4xi1>, vector<16x16x4xf32>
    %c15_i32_117 = arith.constant 15 : i32
    %140 = tpu.dynamic_rotate %134 by %c15_i32_117 dim 1 : vector<16x16x4xf32>, i32 -> vector<16x16x4xf32>
    %cst_118 = arith.constant 0.000000e+00 : f32
    %141 = vector.broadcast %cst_118 : f32 to vector<16x16x4xf32>
    %142 = vector.shape_cast %20 : vector<1x16x1xi1> to vector<1x16x1xi1>
    %143 = vector.broadcast %142 : vector<1x16x1xi1> to vector<16x16x4xi1>
    %144 = arith.select %143, %140, %141 : vector<16x16x4xi1>, vector<16x16x4xf32>
    %c1_119 = arith.constant 1 : index
    %c0_120 = arith.constant 0 : index
    %c0_121 = arith.constant 0 : index
    %c0_122 = arith.constant 0 : index
    %145 = vector.load %arg3[%c1_119, %c0_120, %c0_121, %c0_122] : memref<3x3x4x4xf32, #tpu.memory_space<vmem>>, vector<1x1x4x4xf32>
    %146 = vector.shape_cast %145 : vector<1x1x4x4xf32> to vector<4x4xf32>
    %cst_123 = arith.constant dense<0.000000e+00> : vector<16x16x4xf32>
    %147 = tpu.matmul %139, %146, %cst_123 {dimension_numbers = #tpu.dot_dimension_numbers<[2], [0], [0, 1], [1], [0, 0, 0, 1, 1, 1], [], []>} : vector<16x16x4xf32>, vector<4x4xf32>, vector<16x16x4xf32> -> vector<16x16x4xf32>
    %148 = arith.addf %133, %147 : vector<16x16x4xf32>
    %c1_124 = arith.constant 1 : index
    %c1_125 = arith.constant 1 : index
    %c0_126 = arith.constant 0 : index
    %c0_127 = arith.constant 0 : index
    %149 = vector.load %arg3[%c1_124, %c1_125, %c0_126, %c0_127] : memref<3x3x4x4xf32, #tpu.memory_space<vmem>>, vector<1x1x4x4xf32>
    %150 = vector.shape_cast %149 : vector<1x1x4x4xf32> to vector<4x4xf32>
    %cst_128 = arith.constant dense<0.000000e+00> : vector<16x16x4xf32>
    %151 = tpu.matmul %134, %150, %cst_128 {dimension_numbers = #tpu.dot_dimension_numbers<[2], [0], [0, 1], [1], [0, 0, 0, 1, 1, 1], [], []>} : vector<16x16x4xf32>, vector<4x4xf32>, vector<16x16x4xf32> -> vector<16x16x4xf32>
    %152 = arith.addf %148, %151 : vector<16x16x4xf32>
    %c1_129 = arith.constant 1 : index
    %c2_130 = arith.constant 2 : index
    %c0_131 = arith.constant 0 : index
    %c0_132 = arith.constant 0 : index
    %153 = vector.load %arg3[%c1_129, %c2_130, %c0_131, %c0_132] : memref<3x3x4x4xf32, #tpu.memory_space<vmem>>, vector<1x1x4x4xf32>
    %154 = vector.shape_cast %153 : vector<1x1x4x4xf32> to vector<4x4xf32>
    %cst_133 = arith.constant dense<0.000000e+00> : vector<16x16x4xf32>
    %155 = tpu.matmul %144, %154, %cst_133 {dimension_numbers = #tpu.dot_dimension_numbers<[2], [0], [0, 1], [1], [0, 0, 0, 1, 1, 1], [], []>} : vector<16x16x4xf32>, vector<4x4xf32>, vector<16x16x4xf32> -> vector<16x16x4xf32>
    %156 = arith.addf %152, %155 : vector<16x16x4xf32>
    %c2_134 = arith.constant 2 : index
    %c0_135 = arith.constant 0 : index
    %c0_136 = arith.constant 0 : index
    %157 = vector.load %arg6[%c2_134, %c0_135, %c0_136] : memref<18x16x4xf32, #tpu.memory_space<vmem>>, vector<16x16x4xf32>
    %c1_i32_137 = arith.constant 1 : i32
    %158 = tpu.dynamic_rotate %157 by %c1_i32_137 dim 1 : vector<16x16x4xf32>, i32 -> vector<16x16x4xf32>
    %cst_138 = arith.constant 0.000000e+00 : f32
    %159 = vector.broadcast %cst_138 : f32 to vector<16x16x4xf32>
    %160 = vector.shape_cast %18 : vector<1x16x1xi1> to vector<1x16x1xi1>
    %161 = vector.broadcast %160 : vector<1x16x1xi1> to vector<16x16x4xi1>
    %162 = arith.select %161, %158, %159 : vector<16x16x4xi1>, vector<16x16x4xf32>
    %c15_i32_139 = arith.constant 15 : i32
    %163 = tpu.dynamic_rotate %157 by %c15_i32_139 dim 1 : vector<16x16x4xf32>, i32 -> vector<16x16x4xf32>
    %cst_140 = arith.constant 0.000000e+00 : f32
    %164 = vector.broadcast %cst_140 : f32 to vector<16x16x4xf32>
    %165 = vector.shape_cast %20 : vector<1x16x1xi1> to vector<1x16x1xi1>
    %166 = vector.broadcast %165 : vector<1x16x1xi1> to vector<16x16x4xi1>
    %167 = arith.select %166, %163, %164 : vector<16x16x4xi1>, vector<16x16x4xf32>
    %c2_141 = arith.constant 2 : index
    %c0_142 = arith.constant 0 : index
    %c0_143 = arith.constant 0 : index
    %c0_144 = arith.constant 0 : index
    %168 = vector.load %arg3[%c2_141, %c0_142, %c0_143, %c0_144] : memref<3x3x4x4xf32, #tpu.memory_space<vmem>>, vector<1x1x4x4xf32>
    %169 = vector.shape_cast %168 : vector<1x1x4x4xf32> to vector<4x4xf32>
    %cst_145 = arith.constant dense<0.000000e+00> : vector<16x16x4xf32>
    %170 = tpu.matmul %162, %169, %cst_145 {dimension_numbers = #tpu.dot_dimension_numbers<[2], [0], [0, 1], [1], [0, 0, 0, 1, 1, 1], [], []>} : vector<16x16x4xf32>, vector<4x4xf32>, vector<16x16x4xf32> -> vector<16x16x4xf32>
    %171 = arith.addf %156, %170 : vector<16x16x4xf32>
    %c2_146 = arith.constant 2 : index
    %c1_147 = arith.constant 1 : index
    %c0_148 = arith.constant 0 : index
    %c0_149 = arith.constant 0 : index
    %172 = vector.load %arg3[%c2_146, %c1_147, %c0_148, %c0_149] : memref<3x3x4x4xf32, #tpu.memory_space<vmem>>, vector<1x1x4x4xf32>
    %173 = vector.shape_cast %172 : vector<1x1x4x4xf32> to vector<4x4xf32>
    %cst_150 = arith.constant dense<0.000000e+00> : vector<16x16x4xf32>
    %174 = tpu.matmul %157, %173, %cst_150 {dimension_numbers = #tpu.dot_dimension_numbers<[2], [0], [0, 1], [1], [0, 0, 0, 1, 1, 1], [], []>} : vector<16x16x4xf32>, vector<4x4xf32>, vector<16x16x4xf32> -> vector<16x16x4xf32>
    %175 = arith.addf %171, %174 : vector<16x16x4xf32>
    %c2_151 = arith.constant 2 : index
    %c2_152 = arith.constant 2 : index
    %c0_153 = arith.constant 0 : index
    %c0_154 = arith.constant 0 : index
    %176 = vector.load %arg3[%c2_151, %c2_152, %c0_153, %c0_154] : memref<3x3x4x4xf32, #tpu.memory_space<vmem>>, vector<1x1x4x4xf32>
    %177 = vector.shape_cast %176 : vector<1x1x4x4xf32> to vector<4x4xf32>
    %cst_155 = arith.constant dense<0.000000e+00> : vector<16x16x4xf32>
    %178 = tpu.matmul %167, %177, %cst_155 {dimension_numbers = #tpu.dot_dimension_numbers<[2], [0], [0, 1], [1], [0, 0, 0, 1, 1, 1], [], []>} : vector<16x16x4xf32>, vector<4x4xf32>, vector<16x16x4xf32> -> vector<16x16x4xf32>
    %179 = arith.addf %175, %178 : vector<16x16x4xf32>
    %cst_156 = arith.constant dense<0.000000e+00> : vector<4xf32>
    %180 = vector.multi_reduction <add>, %179, %cst_156 [0, 1] : vector<16x16x4xf32> to vector<4xf32>
    %181 = vector.shape_cast %180 : vector<4xf32> to vector<1x1x4xf32>
    %182 = arith.mulf %179, %179 : vector<16x16x4xf32>
    %cst_157 = arith.constant dense<0.000000e+00> : vector<4xf32>
    %183 = vector.multi_reduction <add>, %182, %cst_157 [0, 1] : vector<16x16x4xf32> to vector<4xf32>
    %184 = vector.shape_cast %183 : vector<4xf32> to vector<1x1x4xf32>
    %cst_158 = arith.constant 3.906250e-03 : f32
    %185 = vector.broadcast %cst_158 : f32 to vector<1x1x4xf32>
    %186 = arith.mulf %181, %185 : vector<1x1x4xf32>
    %cst_159 = arith.constant 3.906250e-03 : f32
    %187 = vector.broadcast %cst_159 : f32 to vector<1x1x4xf32>
    %188 = arith.mulf %184, %187 : vector<1x1x4xf32>
    %189 = arith.mulf %186, %186 : vector<1x1x4xf32>
    %190 = arith.subf %188, %189 : vector<1x1x4xf32>
    %cst_160 = arith.constant 0.000000e+00 : f32
    %191 = vector.broadcast %cst_160 : f32 to vector<1x1x4xf32>
    %192 = arith.maximumf %190, %191 : vector<1x1x4xf32>
    %193 = vector.broadcast %186 : vector<1x1x4xf32> to vector<16x16x4xf32>
    %194 = arith.subf %179, %193 : vector<16x16x4xf32>
    %cst_161 = arith.constant 9.99999974E-6 : f32
    %195 = vector.broadcast %cst_161 : f32 to vector<1x1x4xf32>
    %196 = arith.addf %192, %195 : vector<1x1x4xf32>
    %197 = math.rsqrt %196 : vector<1x1x4xf32>
    %198 = vector.broadcast %197 : vector<1x1x4xf32> to vector<16x16x4xf32>
    %199 = arith.mulf %194, %198 : vector<16x16x4xf32>
    %c0_162 = arith.constant 0 : index
    %c0_163 = arith.constant 0 : index
    %c0_164 = arith.constant 0 : index
    %c0_165 = arith.constant 0 : index
    %200 = vector.load %arg1[%c0_162, %c0_163, %c0_164, %c0_165] : memref<1x16x16x4xf32, #tpu.memory_space<vmem>>, vector<1x16x16x4xf32>
    %201 = vector.shape_cast %200 : vector<1x16x16x4xf32> to vector<16x16x4xf32>
    %202 = arith.addf %201, %199 : vector<16x16x4xf32>
    %c0_166 = arith.constant 0 : index
    %c0_167 = arith.constant 0 : index
    %c0_168 = arith.constant 0 : index
    %c0_169 = arith.constant 0 : index
    %203 = vector.load %arg4[%c0_166, %c0_167, %c0_168, %c0_169] : memref<1x16x16x4xf32, #tpu.memory_space<vmem>>, vector<1x16x16x4xf32>
    %204 = vector.shape_cast %203 : vector<1x16x16x4xf32> to vector<16x16x4xf32>
    %205 = vector.shape_cast %202 : vector<16x16x4xf32> to vector<1x16x16x4xf32>
    tpu.vector_store %arg4[%c0_166, %c0_167, %c0_168, %c0_169], %205 {strides = array<i32>} : memref<1x16x16x4xf32, #tpu.memory_space<vmem>>, vector<1x16x16x4xf32>,
    return
  }
  func.func @transform_0(%arg0: i32) -> (i32, i32, i32, i32) {
    %c0_i32 = arith.constant 0 : i32
    %c0_i32_0 = arith.constant 0 : i32
    %c0_i32_1 = arith.constant 0 : i32
    %c0_i32_2 = arith.constant 0 : i32
    return %arg0, %c0_i32, %c0_i32_0, %c0_i32_1 : i32, i32, i32, i32
  }
  func.func @transform_1(%arg0: i32) -> (i32, i32, i32, i32) {
    %c0_i32 = arith.constant 0 : i32
    %c0_i32_0 = arith.constant 0 : i32
    %c0_i32_1 = arith.constant 0 : i32
    %c0_i32_2 = arith.constant 0 : i32
    %c0_i32_3 = arith.constant 0 : i32
    return %c0_i32, %c0_i32_0, %c0_i32_1, %c0_i32_2 : i32, i32, i32, i32
  }
  func.func @transform_2(%arg0: i32) -> (i32, i32, i32, i32) {
    %c0_i32 = arith.constant 0 : i32
    %c0_i32_0 = arith.constant 0 : i32
    %c0_i32_1 = arith.constant 0 : i32
    %c0_i32_2 = arith.constant 0 : i32
    %c0_i32_3 = arith.constant 0 : i32
    return %c0_i32, %c0_i32_0, %c0_i32_1, %c0_i32_2 : i32, i32, i32, i32
  }
  func.func @transform_3(%arg0: i32) -> (i32, i32, i32, i32) {
    %c0_i32 = arith.constant 0 : i32
    %c0_i32_0 = arith.constant 0 : i32
    %c0_i32_1 = arith.constant 0 : i32
    %c0_i32_2 = arith.constant 0 : i32
    return %arg0, %c0_i32, %c0_i32_0, %c0_i32_1 : i32, i32, i32, i32
  }
}

</mosaic_0001>

<bundles_post_ra>
// kernel: tpu_custom_call.1
= control target key start
LH: loop header
LB: loop body
LE: loop exit
PB: predicated region body
PF: predicated region fallthrough
CT: control target
= control target key end

     0   :  { %s11294_s12 = smov 0   ;;  %s14923_s0 = inlined_call_operand.vmem [shape: f32[2,16,16,4], index: 0, kind: input, shape index: {}]   ;;  %s14924_s1 = inlined_call_operand.vmem [shape: f32[3,3,4,4], index: 1, kind: input, shape index: {}]   ;;  %s14925_s2 = inlined_call_operand.vmem [shape: f32[3,3,4,4], index: 2, kind: input, shape index: {}]   ;;  %s14926_s3 = inlined_call_operand.vmem [shape: f32[2,16,16,4], index: 3, kind: output, shape index: {}]  }
   0x1 LB: > { %s8623_s13 = sadd.s32 4294967295, %s11271_s12   ;;  %p8627_p0 = scmp.ge.s32.totalorder %s11271_s12, 1  ;;  %s11271_s12 = sphi %s11294_s12, %s13_s12  }
   0x2   : > { %p137_p1 = scmp.lt.s32.totalorder %s11271_s12, 3 }
   0x4   : > { %p138_p2 = pnand %p8627_p0, %p137_p1 }
   0x6   : > { %141 = sbr.rel (%p138_p2) target bundleno = 1717 (0x6b5), region = 32 }
   0xd   : > { %v8632_v0 = vld [vmem:[%s14924_s1 + $0x4] sm:$0xf]  ;;  %vm587_vm0 = vcmask 1043456   ;;  %vm171_vm1 = vcmask 31744   ;;  %p161_p3 = scmp.lt.s32.totalorder %s8623_s13, 1  ;;  %v11273_v1 = vmov 0.0   ;;  %v247_v3 = vlaneseq }
   0xe   : > { %9840 = vmatprep.subr.msk.mxu0 %vm587_vm0, %v8632_v0  ;;  %172 = vst.msk [vmem:[#allocation2] sm:$0xff] %vm171_vm1, %v11273_v1  ;;  %173 = vst.msk [vmem:[#allocation2 + $0x8] sm:$0xff] %vm171_vm1, %v11273_v1  ;;  %v488_v2 = vld [vmem:[%s14924_s1] sm:$0xf]  ;;  %v11359_v18 = vld [vmem:[%s14924_s1 + $0x8] sm:$0xf] }
   0xf   : > { %175 = vst.msk [vmem:[#allocation2 + $0x110] sm:$0xff] %vm171_vm1, %v11273_v1  ;;  %176 = vst.msk [vmem:[#allocation2 + $0x118] sm:$0xff] %vm171_vm1, %v11273_v1  ;;  %9841 = vmatpush3.msk.msra.mxu0 %vm587_vm0, %v8632_v0  ;;  %s15134_s13 = smov (!%p161_p3, %s8623_s13), 1  ;;  %v11332_v7 = vshrl.u32 %v247_v3, 7 }
  0x10   : > { %177 = vst.msk [vmem:[#allocation3] sm:$0xff] %vm171_vm1, %v11273_v1  ;;  %178 = vst.msk [vmem:[#allocation3 + $0x8] sm:$0xff] %vm171_vm1, %v11273_v1  ;;  %9890 = vmatprep.subr.msk.mxu0 %vm587_vm0, %v488_v2  ;;  %s9244_s18 = sshll.u32 %s15134_s13, 8 }
  0x11   : > { %180 = vst.msk [vmem:[#allocation3 + $0x110] sm:$0xff] %vm171_vm1, %v11273_v1  ;;  %181 = vst.msk [vmem:[#allocation3 + $0x118] sm:$0xff] %vm171_vm1, %v11273_v1  ;;  %s11327_s21 = scalar_lea.vmem %s14923_s0, %s9244_s18  ;;  %vm419_vm2 = vcmp.lt.s32.totalorder %v11332_v7, 7  ;;  %vm318_vm3 = vcmp.lt.s32.totalorder %v11332_v7, 1  ;;  %vm250_vm4 = vcmp.gt.s32.totalorder %v11332_v7, 0  ;;  %s14808_s6 = scalar_lea.vmem %s14926_s3, %s9244_s18 }
  0x12   : > { %v182_v4 = vld [vmem:[%s11327_s21] sm:$0xff]  ;;  %v183_v5 = vld [vmem:[%s11327_s21 + $0x8] sm:$0xff]  ;;  %v184_v6 = vld [vmem:[%s11327_s21 + $0x10] sm:$0xff] }
  0x13   : > { %215 = vst.msk [vmem:[#allocation2 + $0x10] sm:$0xff] %vm171_vm1, %v182_v4  ;;  %216 = vst.msk [vmem:[#allocation2 + $0x18] sm:$0xff] %vm171_vm1, %v183_v5  ;;  %v185_v8 = vld [vmem:[%s11327_s21 + $0x18] sm:$0xff]  ;;  %v186_v9 = vld [vmem:[%s11327_s21 + $0x20] sm:$0xff] }
  0x14   : > { %217 = vst.msk [vmem:[#allocation2 + $0x20] sm:$0xff] %vm171_vm1, %v184_v6  ;;  %v187_v10 = vld [vmem:[%s11327_s21 + $0x28] sm:$0xff]  ;;  %218 = vst.msk [vmem:[#allocation2 + $0x28] sm:$0xff] %vm171_vm1, %v185_v8  ;;  %v188_v13 = vld [vmem:[%s11327_s21 + $0x30] sm:$0xff] }
  0x15   : > { %v11340_v11 = vld [vmem:[#allocation2] sm:$0xff]  ;;  %v11342_v12 = vld [vmem:[#allocation2 + $0x8] sm:$0xff]  ;;  %219 = vst.msk [vmem:[#allocation2 + $0x30] sm:$0xff] %vm171_vm1, %v186_v9  ;;  %220 = vst.msk [vmem:[#allocation2 + $0x38] sm:$0xff] %vm171_vm1, %v187_v10 }
  0x16   : > { %v387_v14 = vrot.slane %v11340_v11, 1  ;;  %9842 = vmatprep.mubr.msk.f32.mxu0 %vm171_vm1, %v11340_v11  ;;  %v403_v15 = vrot.slane %v11342_v12, 1  ;;  %221 = vst.msk [vmem:[#allocation2 + $0x40] sm:$0xff] %vm171_vm1, %v188_v13  ;;  %v189_v16 = vld [vmem:[%s11327_s21 + $0x38] sm:$0xff]  ;;  %v190_v17 = vld [vmem:[%s11327_s21 + $0x40] sm:$0xff]  ;;  %v191_v19 = vld [vmem:[%s11327_s21 + $0x48] sm:$0xff] }
  0x17   : > { %9843 = vmatmul.mubr.msk.f32.vlgmr.msra.gmra.mrb[0].mxu0 %vm171_vm1, %v11342_v12  ;;  %222 = vst.msk [vmem:[#allocation2 + $0x48] sm:$0xff] %vm171_vm1, %v189_v16  ;;  %223 = vst.msk [vmem:[#allocation2 + $0x50] sm:$0xff] %vm171_vm1, %v190_v17  ;;  %v192_v20 = vld [vmem:[%s11327_s21 + $0x50] sm:$0xff]  ;;  %v193_v21 = vld [vmem:[%s11327_s21 + $0x58] sm:$0xff]  ;;  %v286_v5 = vrot.slane %v11340_v11, 7  ;;  %v302_v6 = vrot.slane %v11342_v12, 7 }
  0x18   : > { %9891 = vmatpush3.msk.msra.mxu0 %vm587_vm0, %v488_v2  ;;  %224 = vst.msk [vmem:[#allocation2 + $0x58] sm:$0xff] %vm171_vm1, %v191_v19  ;;  %225 = vst.msk [vmem:[#allocation2 + $0x60] sm:$0xff] %vm171_vm1, %v192_v20  ;;  %v194_v22 = vld [vmem:[%s11327_s21 + $0x60] sm:$0xff]  ;;  %v195_v23 = vld [vmem:[%s11327_s21 + $0x68] sm:$0xff]  ;;  %v11377_v25 = vsel %vm419_vm2, %v387_v14, %v403_v15  ;;  %v11381_v26 = vsel %vm419_vm2, %v403_v15, %v387_v14 }
  0x19   : > { %226 = vst.msk [vmem:[#allocation2 + $0x68] sm:$0xff] %vm171_vm1, %v193_v21  ;;  %v196_v24 = vld [vmem:[%s11327_s21 + $0x70] sm:$0xff]  ;;  %227 = vst.msk [vmem:[#allocation2 + $0x70] sm:$0xff] %vm171_vm1, %v194_v22  ;;  %v197_v27 = vld [vmem:[%s11327_s21 + $0x78] sm:$0xff]  ;;  %9940 = vmatprep.subr.msk.mxu0 %vm587_vm0, %v11359_v18  ;;  %v335_v11 = vsel %vm318_vm3, %v302_v6, %v286_v5  ;;  %v319_v19 = vsel %vm318_vm3, %v286_v5, %v302_v6 }
  0x1a   : > { %228 = vst.msk [vmem:[#allocation2 + $0x78] sm:$0xff] %vm171_vm1, %v195_v23  ;;  %229 = vst.msk [vmem:[#allocation2 + $0x80] sm:$0xff] %vm171_vm1, %v196_v24  ;;  %v198_v28 = vld [vmem:[%s11327_s21 + $0x80] sm:$0xff]  ;;  %v199_v29 = vld [vmem:[%s11327_s21 + $0x88] sm:$0xff]  ;;  %v355_v14 = vsel %vm250_vm4, %v335_v11, 0.0 }
  0x1b   : > { %230 = vst.msk [vmem:[#allocation2 + $0x88] sm:$0xff] %vm171_vm1, %v197_v27  ;;  %231 = vst.msk [vmem:[#allocation2 + $0x90] sm:$0xff] %vm171_vm1, %v198_v28  ;;  %v200_v30 = vld [vmem:[%s11327_s21 + $0x90] sm:$0xff]  ;;  %v201_v31 = vld [vmem:[%s11327_s21 + $0x98] sm:$0xff] }
  0x1c   : > { %232 = vst.msk [vmem:[#allocation2 + $0x98] sm:$0xff] %vm171_vm1, %v199_v29  ;;  %v202_v32 = vld [vmem:[%s11327_s21 + $0xa0] sm:$0xff]  ;;  %v11397_v33 = vld [vmem:[#allocation2 + $0x10] sm:$0xff]  ;;  %v11399_v34 = vld [vmem:[#allocation2 + $0x18] sm:$0xff] }
  0x1d   : > { %14995 = vst [vmem:[#allocation4_spill] sm:$0xff] %v11397_v33  ;;  %14996 = vst [vmem:[#allocation5_spill] sm:$0xff] %v11399_v34  ;;  %v11401_v35 = vld [vmem:[#allocation2 + $0x20] sm:$0xff]  ;;  %9845 = vmatprep.mubr.msk.f32.mxu0 %vm171_vm1, %v11397_v33  ;;  %v11412_v36 = vld [vmem:[#allocation2 + $0x28] sm:$0xff]  ;;  %v287_v10 = vrot.slane %v11397_v33, 7  ;;  %v303_v13 = vrot.slane %v11399_v34, 7 }
  0x1e   : > { %233 = vst.msk [vmem:[#allocation2 + $0xa0] sm:$0xff] %vm171_vm1, %v200_v30  ;;  %234 = vst.msk [vmem:[#allocation2 + $0xa8] sm:$0xff] %vm171_vm1, %v201_v31  ;;  %9846 = vmatmul.mubr.msk.f32.gmra.mrb[2].mxu0 %vm171_vm1, %v11399_v34  ;;  %v11414_v37 = vld [vmem:[#allocation2 + $0x30] sm:$0xff]  ;;  %v11420_v38 = vld [vmem:[#allocation2 + $0x38] sm:$0xff]  ;;  %v288_v15 = vrot.slane %v11401_v35, 7  ;;  %v304_v16 = vrot.slane %v11412_v36, 7 }
  0x1f   : > { %235 = vst.msk [vmem:[#allocation2 + $0xb0] sm:$0xff] %vm171_vm1, %v202_v32  ;;  %9848 = vmatprep.mubr.msk.f32.mxu0 %vm171_vm1, %v11401_v35  ;;  %v11422_v39 = vld [vmem:[#allocation2 + $0x40] sm:$0xff]  ;;  %v11424_v40 = vld [vmem:[#allocation2 + $0x48] sm:$0xff]  ;;  %v11428_v41 = vld [vmem:[#allocation2 + $0x50] sm:$0xff]  ;;  %v336_v17 = vsel %vm318_vm3, %v303_v13, %v287_v10  ;;  %v289_v21 = vrot.slane %v11414_v37, 7  ;;  %v305_v22 = vrot.slane %v11420_v38, 7  ;;  %v11575_v27 = vsel %vm318_vm3, %v287_v10, %v303_v13 }
  0x20   : > { %14997 = vst [vmem:[#allocation6_spill] sm:$0xff] %v11424_v40  ;;  %v203_v42 = vld [vmem:[%s11327_s21 + $0xa8] sm:$0xff]  ;;  %v204_v43 = vld [vmem:[%s11327_s21 + $0xb0] sm:$0xff]  ;;  %v205_v44 = vld [vmem:[%s11327_s21 + $0xb8] sm:$0xff]  ;;  %v11557_v20 = vsel %vm250_vm4, %v336_v17, 0.0  ;;  %v337_v23 = vsel %vm318_vm3, %v304_v16, %v288_v15  ;;  %v290_v29 = vrot.slane %v11422_v39, 7  ;;  %v11593_v31 = vsel %vm318_vm3, %v288_v15, %v304_v16 }
  0x21   : > { %236 = vst.msk [vmem:[#allocation2 + $0xb8] sm:$0xff] %vm171_vm1, %v203_v42  ;;  %237 = vst.msk [vmem:[#allocation2 + $0xc0] sm:$0xff] %vm171_vm1, %v204_v43  ;;  %v206_v45 = vld [vmem:[%s11327_s21 + $0xc0] sm:$0xff]  ;;  %v207_v46 = vld [vmem:[%s11327_s21 + $0xc8] sm:$0xff]  ;;  %v11579_v28 = vsel %vm250_vm4, %v337_v23, 0.0  ;;  %v306_v30 = vrot.slane %v11424_v40, 7 }
  0x22   : > { %9849 = vmatmul.mubr.msk.f32.gmra.mrb[4].mxu0 %vm171_vm1, %v11412_v36  ;;  %238 = vst.msk [vmem:[#allocation2 + $0xc8] sm:$0xff] %vm171_vm1, %v205_v44  ;;  %239 = vst.msk [vmem:[#allocation2 + $0xd0] sm:$0xff] %vm171_vm1, %v206_v45  ;;  %v208_v47 = vld [vmem:[%s11327_s21 + $0xd0] sm:$0xff]  ;;  %v209_v48 = vld [vmem:[%s11327_s21 + $0xd8] sm:$0xff]  ;;  %v291_v42 = vrot.slane %v11428_v41, 7  ;;  %v11609_v45 = vsel %vm318_vm3, %v289_v21, %v305_v22 }
  0x23   : > { %9851 = vmatprep.mubr.msk.f32.mxu0 %vm171_vm1, %v11414_v37  ;;  %240 = vst.msk [vmem:[#allocation2 + $0xd8] sm:$0xff] %vm171_vm1, %v207_v46  ;;  %v210_v49 = vld [vmem:[%s11327_s21 + $0xe0] sm:$0xff]  ;;  %241 = vst.msk [vmem:[#allocation2 + $0xe0] sm:$0xff] %vm171_vm1, %v208_v47  ;;  %v211_v50 = vld [vmem:[%s11327_s21 + $0xe8] sm:$0xff]  ;;  %v339_v44 = vsel %vm318_vm3, %v306_v30, %v290_v29 }
  0x24   : > { %242 = vst.msk [vmem:[#allocation2 + $0xe8] sm:$0xff] %vm171_vm1, %v209_v48  ;;  %243 = vst.msk [vmem:[#allocation2 + $0xf0] sm:$0xff] %vm171_vm1, %v210_v49  ;;  %v11454_v51 = vld [vmem:[#allocation2 + $0x58] sm:$0xff]  ;;  %v11456_v52 = vld [vmem:[#allocation2 + $0x60] sm:$0xff]  ;;  %v11613_v46 = vsel %vm250_vm4, %v339_v44, 0.0 }
  0x25   : > { %244 = vst.msk [vmem:[#allocation2 + $0xf8] sm:$0xff] %vm171_vm1, %v211_v50  ;;  %v11462_v53 = vld [vmem:[#allocation2 + $0x68] sm:$0xff]  ;;  %v11464_v54 = vld [vmem:[#allocation2 + $0x70] sm:$0xff]  ;;  %v11470_v55 = vld [vmem:[#allocation2 + $0x78] sm:$0xff]  ;;  %v307_v43 = vrot.slane %v11454_v51, 7  ;;  %v292_v47 = vrot.slane %v11456_v52, 7  ;;  %v11625_v50 = vsel %vm318_vm3, %v290_v29, %v306_v30 }
  0x26   : > { %9852 = vmatmul.mubr.msk.f32.gmra.mrb[6].mxu0 %vm171_vm1, %v11420_v38  ;;  %v11472_v56 = vld [vmem:[#allocation2 + $0x80] sm:$0xff]  ;;  %v11478_v57 = vld [vmem:[#allocation2 + $0x88] sm:$0xff]  ;;  %v11480_v58 = vld [vmem:[#allocation2 + $0x90] sm:$0xff]  ;;  %v308_v48 = vrot.slane %v11462_v53, 7  ;;  %v293_v6 = vrot.slane %v11464_v54, 7  ;;  %v309_v10 = vrot.slane %v11470_v55, 7 }
  0x27   : > { %9854 = vmatprep.mubr.msk.f32.mxu0 %vm171_vm1, %v11422_v39  ;;  %v11486_v59 = vld [vmem:[#allocation2 + $0x98] sm:$0xff]  ;;  %v11488_v60 = vld [vmem:[#allocation2 + $0xa0] sm:$0xff]  ;;  %v11494_v61 = vld [vmem:[#allocation2 + $0xa8] sm:$0xff]  ;;  %v340_v49 = vsel %vm318_vm3, %v307_v43, %v291_v42  ;;  %v11641_v11 = vsel %vm318_vm3, %v291_v42, %v307_v43  ;;  %v294_v15 = vrot.slane %v11472_v56, 7  ;;  %v310_v16 = vrot.slane %v11478_v57, 7 }
  0x28   : > { %v11496_v62 = vld [vmem:[#allocation2 + $0xb0] sm:$0xff]  ;;  %v11502_v63 = vld [vmem:[#allocation2 + $0xb8] sm:$0xff]  ;;  %v11504_v0 = vld [vmem:[#allocation2 + $0xc0] sm:$0xff]  ;;  %v11629_v5 = vsel %vm250_vm4, %v340_v49, 0.0  ;;  %v341_v13 = vsel %vm318_vm3, %v308_v48, %v292_v47  ;;  %v342_v17 = vsel %vm318_vm3, %v309_v10, %v293_v6  ;;  %v311_v23 = vrot.slane %v11486_v59, 7 }
  0x29   : > { %v11510_v1 = vld [vmem:[#allocation2 + $0xc8] sm:$0xff]  ;;  %v11512_v2 = vld [vmem:[#allocation2 + $0xd0] sm:$0xff]  ;;  %v343_v29 = vsel %vm318_vm3, %v310_v16, %v294_v15  ;;  %v11673_v30 = vsel %vm318_vm3, %v293_v6, %v309_v10  ;;  %v296_v42 = vrot.slane %v11488_v60, 7  ;;  %v312_v43 = vrot.slane %v11494_v61, 7 }
  0x2a   : > { %9855 = vmatmul.mubr.msk.f32.gmra.mrb[8].mxu0 %vm171_vm1, %v11424_v40  ;;  %v11518_v3 = vld [vmem:[#allocation2 + $0xd8] sm:$0xff]  ;;  %v11520_v4 = vld [vmem:[#allocation2 + $0xe0] sm:$0xff]  ;;  %v11566_v24 = vld [vmem:[%s14924_s1 + $0xc] sm:$0xf]  ;;  %v297_v49 = vrot.slane %v11496_v62, 7  ;;  %v313_v6 = vrot.slane %v11502_v63, 7 }
  0x2b   : > { %9857 = vmatprep.mubr.msk.f32.mxu0 %vm171_vm1, %v11428_v41  ;;  %v11529_v8 = vld [vmem:[#allocation2 + $0xe8] sm:$0xff]  ;;  %v11531_v9 = vld [vmem:[#allocation2 + $0xf0] sm:$0xff]  ;;  %v345_v10 = vsel %vm318_vm3, %v312_v43, %v296_v42 }
  0x2c   : > { %v11542_v12 = vld [vmem:[#allocation2 + $0xf8] sm:$0xff] }
  0x2e   : > { %9858 = vmatmul.mubr.msk.f32.gmra.mrb[10].mxu0 %vm171_vm1, %v11454_v51 }
  0x2f   : > { %9860 = vmatprep.mubr.msk.f32.mxu0 %vm171_vm1, %v11456_v52 }
  0x32   : > { %9861 = vmatmul.mubr.msk.f32.gmra.mrb[12].mxu0 %vm171_vm1, %v11462_v53 }
  0x33   : > { %9863 = vmatprep.mubr.msk.f32.mxu0 %vm171_vm1, %v11464_v54 }
  0x36   : > { %9864 = vmatmul.mubr.msk.f32.gmra.mrb[14].mxu0 %vm171_vm1, %v11470_v55 }
  0x37   : > { %9866 = vmatprep.mubr.msk.f32.mxu0 %vm171_vm1, %v11472_v56 }
  0x3a   : > { %9867 = vmatmul.mubr.msk.f32.gmra.mrb[16].mxu0 %vm171_vm1, %v11478_v57 }
  0x3b   : > { %9869 = vmatprep.mubr.msk.f32.mxu0 %vm171_vm1, %v11480_v58 }
  0x3e   : > { %9870 = vmatmul.mubr.msk.f32.gmra.mrb[18].mxu0 %vm171_vm1, %v11486_v59 }
  0x3f   : > { %9872 = vmatprep.mubr.msk.f32.mxu0 %vm171_vm1, %v11488_v60 }
  0x42   : > { %9873 = vmatmul.mubr.msk.f32.gmra.mrb[20].mxu0 %vm171_vm1, %v11494_v61 }
  0x43   : > { %9875 = vmatprep.mubr.msk.f32.mxu0 %vm171_vm1, %v11496_v62 }
  0x46   : > { %9876 = vmatmul.mubr.msk.f32.gmra.mrb[22].mxu0 %vm171_vm1, %v11502_v63 }
  0x47   : > { %9878 = vmatprep.mubr.msk.f32.mxu0 %vm171_vm1, %v11504_v0 }
  0x4a   : > { %9879 = vmatmul.mubr.msk.f32.gmra.mrb[24].mxu0 %vm171_vm1, %v11510_v1 }
  0x4b   : > { %9881 = vmatprep.mubr.msk.f32.mxu0 %vm171_vm1, %v11512_v2 }
  0x4e   : > { %9882 = vmatmul.mubr.msk.f32.gmra.mrb[26].mxu0 %vm171_vm1, %v11518_v3 }
  0x4f   : > { %9884 = vmatprep.mubr.msk.f32.mxu0 %vm171_vm1, %v11520_v4 }
  0x52   : > { %9885 = vmatmul.mubr.msk.f32.gmra.mrb[28].mxu0 %vm171_vm1, %v11529_v8 }
  0x53   : > { %9887 = vmatprep.mubr.msk.f32.mxu0 %vm171_vm1, %v11531_v9 }
  0x56   : > { %9888 = vmatmul.mubr.msk.f32.gmra.mrb[30].mxu0 %vm171_vm1, %v11542_v12 }
  0x57   : > { %9892 = vmatprep.mubr.msk.f32.mxu0 %vm171_vm1, %v355_v14  ;;  %v11645_v14 = vsel %vm250_vm4, %v341_v13, 0.0 }
  0x5a   : > { %9893 = vmatmul.mubr.msk.f32.vlgmr.msra.gmra.mrb[0].mxu0 %vm171_vm1, %v319_v19  ;;  %v11657_v19 = vsel %vm318_vm3, %v292_v47, %v308_v48  ;;  %v11689_v47 = vsel %vm318_vm3, %v294_v15, %v310_v16  ;;  %v11709_v15 = vsel %vm250_vm4, %v345_v10, 0.0  ;;  %v298_v16 = vrot.slane %v11504_v0, 7 }
  0x5b   : > { %9941 = vmatpush3.msk.msra.mxu0 %vm587_vm0, %v11359_v18  ;;  %9895 = vmatprep.mubr.msk.f32.mxu0 %vm171_vm1, %v11557_v20  ;;  %v338_v18 = vsel %vm318_vm3, %v305_v22, %v289_v21  ;;  %v11661_v21 = vsel %vm250_vm4, %v342_v17, 0.0  ;;  %v295_v22 = vrot.slane %v11480_v58, 7  ;;  %14998 = vst [vmem:[#allocation7_spill] sm:$0xff] %v11689_v47  ;;  %15001 = vst [vmem:[#allocation10_spill] sm:$0xff] %v11709_v15  ;;  %v314_v17 = vrot.slane %v11510_v1, 7 }
  0x5c   : > { %9990 = vmatprep.subr.msk.mxu0 %vm587_vm0, %v11566_v24  ;;  %v11597_v32 = vsel %vm250_vm4, %v338_v18, 0.0  ;;  %v11677_v18 = vsel %vm250_vm4, %v343_v29, 0.0  ;;  %v346_v29 = vsel %vm318_vm3, %v313_v6, %v297_v49  ;;  %v315_v10 = vrot.slane %v11518_v3, 7 }
  0x5d   : > { %v344_v44 = vsel %vm318_vm3, %v311_v23, %v295_v22  ;;  %v11705_v13 = vsel %vm318_vm3, %v295_v22, %v311_v23  ;;  %v11721_v22 = vsel %vm318_vm3, %v296_v42, %v312_v43  ;;  %v11725_v23 = vsel %vm250_vm4, %v346_v29, 0.0 }
  0x5e   : > { %9896 = vmatmul.mubr.msk.f32.gmra.mrb[2].mxu0 %vm171_vm1, %v11575_v27  ;;  %v11693_v48 = vsel %vm250_vm4, %v344_v44, 0.0  ;;  %15000 = vst [vmem:[#allocation9_spill] sm:$0xff] %v11705_v13  ;;  %15002 = vst [vmem:[#allocation11_spill] sm:$0xff] %v11721_v22  ;;  %v299_v44 = vrot.slane %v11512_v2, 7  ;;  %v11737_v42 = vsel %vm318_vm3, %v297_v49, %v313_v6  ;;  %v300_v29 = vrot.slane %v11520_v4, 7 }
  0x5f   : > { %9898 = vmatprep.mubr.msk.f32.mxu0 %vm171_vm1, %v11579_v28  ;;  %14999 = vst [vmem:[#allocation8_spill] sm:$0xff] %v11693_v48  ;;  %15003 = vst [vmem:[#allocation12_spill] sm:$0xff] %v11725_v23  ;;  %v11753_v49 = vsel %vm318_vm3, %v298_v16, %v314_v17 }
  0x60   : > { %15004 = vst [vmem:[#allocation13_spill] sm:$0xff] %v11737_v42 }
  0x62   : > { %9899 = vmatmul.mubr.msk.f32.gmra.mrb[4].mxu0 %vm171_vm1, %v11593_v31 }
  0x63   : > { %9901 = vmatprep.mubr.msk.f32.mxu0 %vm171_vm1, %v11597_v32 }
  0x66   : > { %9902 = vmatmul.mubr.msk.f32.gmra.mrb[6].mxu0 %vm171_vm1, %v11609_v45 }
  0x67   : > { %9904 = vmatprep.mubr.msk.f32.mxu0 %vm171_vm1, %v11613_v46 }
  0x6a   : > { %9905 = vmatmul.mubr.msk.f32.gmra.mrb[8].mxu0 %vm171_vm1, %v11625_v50 }
  0x6b   : > { %9907 = vmatprep.mubr.msk.f32.mxu0 %vm171_vm1, %v11629_v5 }
  0x6e   : > { %9908 = vmatmul.mubr.msk.f32.gmra.mrb[10].mxu0 %vm171_vm1, %v11641_v11 }
  0x6f   : > { %9910 = vmatprep.mubr.msk.f32.mxu0 %vm171_vm1, %v11645_v14 }
  0x72   : > { %9911 = vmatmul.mubr.msk.f32.gmra.mrb[12].mxu0 %vm171_vm1, %v11657_v19 }
  0x73   : > { %9913 = vmatprep.mubr.msk.f32.mxu0 %vm171_vm1, %v11661_v21 }
  0x76   : > { %9914 = vmatmul.mubr.msk.f32.gmra.mrb[14].mxu0 %vm171_vm1, %v11673_v30 }
  0x77   : > { %9916 = vmatprep.mubr.msk.f32.mxu0 %vm171_vm1, %v11677_v18 }
  0x7a   : > { %9917 = vmatmul.mubr.msk.f32.gmra.mrb[16].mxu0 %vm171_vm1, %v11689_v47  ;;  %v317_v47 = vrot.slane %v11542_v12, 7 }
  0x7b   : > { %9919 = vmatprep.mubr.msk.f32.mxu0 %vm171_vm1, %v11693_v48  ;;  %v348_v48 = vsel %vm318_vm3, %v315_v10, %v299_v44 }
  0x7c   : > { %v11757_v6 = vsel %vm250_vm4, %v348_v48, 0.0  ;;  %v11773_v48 = vsel %vm318_vm3, %v299_v44, %v315_v10  ;;  %v11794_v10 = vadd.s32 8, %v11332_v7 }
  0x7e   : > { %9920 = vmatmul.mubr.msk.f32.gmra.mrb[18].mxu0 %vm171_vm1, %v11705_v13  ;;  %v347_v13 = vsel %vm318_vm3, %v314_v17, %v298_v16  ;;  %vm253_vm5 = vcmp.lt.s32.totalorder %v11794_v10, 15 }
  0x7f   : > { %9922 = vmatprep.mubr.msk.f32.mxu0 %vm171_vm1, %v11709_v15  ;;  %v11741_v43 = vsel %vm250_vm4, %v347_v13, 0.0  ;;  %v316_v15 = vrot.slane %v11529_v8, 7  ;;  %v212_v13 = vld [vmem:[%s11327_s21 + $0xf0] sm:$0xff] }
  0x80   : > { %245 = vst.msk [vmem:[#allocation2 + $0x100] sm:$0xff] %vm171_vm1, %v212_v13  ;;  %v457_v13 = vsel %vm253_vm5, %v11381_v26, 0.0  ;;  %v390_v26 = vrot.slane %v11414_v37, 1 }
  0x82   : > { %9923 = vmatmul.mubr.msk.f32.gmra.mrb[20].mxu0 %vm171_vm1, %v11721_v22  ;;  %v301_v22 = vrot.slane %v11531_v9, 7 }
  0x83   : > { %9925 = vmatprep.mubr.msk.f32.mxu0 %vm171_vm1, %v11725_v23  ;;  %v213_v23 = vld [vmem:[%s11327_s21 + $0xf8] sm:$0xff] }
  0x84   : > { %246 = vst.msk [vmem:[#allocation2 + $0x108] sm:$0xff] %vm171_vm1, %v213_v23  ;;  %v350_v17 = vsel %vm318_vm3, %v317_v47, %v301_v22  ;;  %v11787_v23 = vsel %vm318_vm3, %v300_v29, %v316_v15 }
  0x85   : > { %v11791_v44 = vsel %vm250_vm4, %v350_v17, 0.0  ;;  %v389_v17 = vrot.slane %v11401_v35, 1 }
  0x86   : > { %9926 = vmatmul.mubr.msk.f32.gmra.mrb[22].mxu0 %vm171_vm1, %v11737_v42  ;;  %v349_v42 = vsel %vm318_vm3, %v316_v15, %v300_v29  ;;  %v388_v15 = vrot.slane %v11397_v33, 1  ;;  %v404_v29 = vrot.slane %v11399_v34, 1  ;;  %v11825_v33 = vld [vmem:[%s14924_s1 + $0x10] sm:$0xf] }
  0x87   : > { %9928 = vmatprep.mubr.msk.f32.mxu0 %vm171_vm1, %v11741_v43  ;;  %v11777_v16 = vsel %vm250_vm4, %v349_v42, 0.0  ;;  %v11802_v42 = vsel %vm318_vm3, %v301_v22, %v317_v47  ;;  %v405_v47 = vrot.slane %v11412_v36, 1 }
  0x88   : > { %v11818_v22 = vsel %vm419_vm2, %v388_v15, %v404_v29  ;;  %v437_v34 = vsel %vm419_vm2, %v404_v29, %v388_v15  ;;  %v406_v15 = vrot.slane %v11420_v38, 1 }
  0x89   : > { %15005 = vst [vmem:[#allocation14_spill] sm:$0xff] %v11818_v22  ;;  %v11840_v29 = vsel %vm419_vm2, %v389_v17, %v405_v47 }
  0x8a   : > { %9929 = vmatmul.mubr.msk.f32.gmra.mrb[24].mxu0 %vm171_vm1, %v11753_v49  ;;  %15007 = vst [vmem:[#allocation16_spill] sm:$0xff] %v11840_v29 }
  0x8b   : > { %9931 = vmatprep.mubr.msk.f32.mxu0 %vm171_vm1, %v11757_v6 }
  0x8e   : > { %9932 = vmatmul.mubr.msk.f32.gmra.mrb[26].mxu0 %vm171_vm1, %v11773_v48 }
  0x8f   : > { %9934 = vmatprep.mubr.msk.f32.mxu0 %vm171_vm1, %v11777_v16 }
  0x92   : > { %9935 = vmatmul.mubr.msk.f32.gmra.mrb[28].mxu0 %vm171_vm1, %v11787_v23 }
  0x93   : > { %9937 = vmatprep.mubr.msk.f32.mxu0 %vm171_vm1, %v11791_v44 }
  0x96   : > { %9938 = vmatmul.mubr.msk.f32.gmra.mrb[30].mxu0 %vm171_vm1, %v11802_v42 }
  0x97   : > { %9942 = vmatprep.mubr.msk.f32.mxu0 %vm171_vm1, %v11377_v25  ;;  %v11834_v25 = vsel %vm253_vm5, %v437_v34, 0.0 }
  0x98   : > { %15006 = vst [vmem:[#allocation15_spill] sm:$0xff] %v11834_v25 }
  0x9a   : > { %9943 = vmatmul.mubr.msk.f32.vlgmr.msra.gmra.mrb[0].mxu0 %vm171_vm1, %v457_v13  ;;  %v438_v13 = vsel %vm419_vm2, %v405_v47, %v389_v17  ;;  %v11858_v17 = vsel %vm419_vm2, %v390_v26, %v406_v15  ;;  %v439_v47 = vsel %vm419_vm2, %v406_v15, %v390_v26 }
  0x9b   : > { %9991 = vmatpush3.msk.msra.mxu0 %vm587_vm0, %v11566_v24  ;;  %9945 = vmatprep.mubr.msk.f32.mxu0 %vm171_vm1, %v11818_v22  ;;  %v11852_v34 = vsel %vm253_vm5, %v438_v13, 0.0  ;;  %v391_v24 = vrot.slane %v11422_v39, 1  ;;  %v407_v22 = vrot.slane %v11424_v40, 1  ;;  %15009 = vst [vmem:[#allocation18_spill] sm:$0xff] %v11858_v17  ;;  %v11868_v13 = vsel %vm253_vm5, %v439_v47, 0.0 }
  0x9c   : > { %10040 = vmatprep.subr.msk.mxu0 %vm587_vm0, %v11825_v33  ;;  %15008 = vst [vmem:[#allocation17_spill] sm:$0xff] %v11852_v34  ;;  %15010 = vst [vmem:[#allocation19_spill] sm:$0xff] %v11868_v13  ;;  %v393_v47 = vrot.slane %v11456_v52, 1 }
  0x9d   : > { %v11874_v40 = vsel %vm419_vm2, %v391_v24, %v407_v22  ;;  %v440_v26 = vsel %vm419_vm2, %v407_v22, %v391_v24 }
  0x9e   : > { %9946 = vmatmul.mubr.msk.f32.gmra.mrb[2].mxu0 %vm171_vm1, %v11834_v25  ;;  %v408_v25 = vrot.slane %v11454_v51, 1  ;;  %15011 = vst [vmem:[#allocation20_spill] sm:$0xff] %v11874_v40  ;;  %v11884_v15 = vsel %vm253_vm5, %v440_v26, 0.0  ;;  %v394_v26 = vrot.slane %v11464_v54, 1 }
  0x9f   : > { %9948 = vmatprep.mubr.msk.f32.mxu0 %vm171_vm1, %v11840_v29  ;;  %v392_v29 = vrot.slane %v11428_v41, 1  ;;  %15012 = vst [vmem:[#allocation21_spill] sm:$0xff] %v11884_v15 }
  0xa1   : > { %v441_v22 = vsel %vm419_vm2, %v408_v25, %v392_v29 }
  0xa2   : > { %9949 = vmatmul.mubr.msk.f32.gmra.mrb[4].mxu0 %vm171_vm1, %v11852_v34  ;;  %v11890_v34 = vsel %vm419_vm2, %v392_v29, %v408_v25  ;;  %v11900_v24 = vsel %vm253_vm5, %v441_v22, 0.0  ;;  %v395_v22 = vrot.slane %v11472_v56, 1 }
  0xa3   : > { %9951 = vmatprep.mubr.msk.f32.mxu0 %vm171_vm1, %v11858_v17  ;;  %v409_v17 = vrot.slane %v11462_v53, 1  ;;  %15013 = vst [vmem:[#allocation22_spill] sm:$0xff] %v11890_v34  ;;  %15014 = vst [vmem:[#allocation23_spill] sm:$0xff] %v11900_v24 }
  0xa5   : > { %v442_v25 = vsel %vm419_vm2, %v409_v17, %v393_v47 }
  0xa6   : > { %9952 = vmatmul.mubr.msk.f32.gmra.mrb[6].mxu0 %vm171_vm1, %v11868_v13  ;;  %v11906_v13 = vsel %vm419_vm2, %v393_v47, %v409_v17  ;;  %v11916_v29 = vsel %vm253_vm5, %v442_v25, 0.0  ;;  %v396_v25 = vrot.slane %v11480_v58, 1 }
  0xa7   : > { %9954 = vmatprep.mubr.msk.f32.mxu0 %vm171_vm1, %v11874_v40  ;;  %v410_v40 = vrot.slane %v11470_v55, 1  ;;  %15015 = vst [vmem:[#allocation24_spill] sm:$0xff] %v11906_v13  ;;  %15016 = vst [vmem:[#allocation25_spill] sm:$0xff] %v11916_v29 }
  0xa9   : > { %v443_v17 = vsel %vm419_vm2, %v410_v40, %v394_v26 }
  0xaa   : > { %9955 = vmatmul.mubr.msk.f32.gmra.mrb[8].mxu0 %vm171_vm1, %v11884_v15  ;;  %v11922_v15 = vsel %vm419_vm2, %v394_v26, %v410_v40  ;;  %v11932_v47 = vsel %vm253_vm5, %v443_v17, 0.0  ;;  %v397_v17 = vrot.slane %v11488_v60, 1 }
  0xab   : > { %9957 = vmatprep.mubr.msk.f32.mxu0 %vm171_vm1, %v11890_v34  ;;  %v411_v34 = vrot.slane %v11478_v57, 1  ;;  %15017 = vst [vmem:[#allocation26_spill] sm:$0xff] %v11922_v15  ;;  %15018 = vst [vmem:[#allocation27_spill] sm:$0xff] %v11932_v47 }
  0xad   : > { %v444_v40 = vsel %vm419_vm2, %v411_v34, %v395_v22 }
  0xae   : > { %9958 = vmatmul.mubr.msk.f32.gmra.mrb[10].mxu0 %vm171_vm1, %v11900_v24  ;;  %v11938_v24 = vsel %vm419_vm2, %v395_v22, %v411_v34  ;;  %v11948_v26 = vsel %vm253_vm5, %v444_v40, 0.0  ;;  %v398_v40 = vrot.slane %v11496_v62, 1 }
  0xaf   : > { %9960 = vmatprep.mubr.msk.f32.mxu0 %vm171_vm1, %v11906_v13  ;;  %v412_v13 = vrot.slane %v11486_v59, 1  ;;  %15019 = vst [vmem:[#allocation28_spill] sm:$0xff] %v11938_v24  ;;  %15020 = vst [vmem:[#allocation29_spill] sm:$0xff] %v11948_v26 }
  0xb1   : > { %v445_v34 = vsel %vm419_vm2, %v412_v13, %v396_v25 }
  0xb2   : > { %9961 = vmatmul.mubr.msk.f32.gmra.mrb[12].mxu0 %vm171_vm1, %v11916_v29  ;;  %v11954_v29 = vsel %vm419_vm2, %v396_v25, %v412_v13  ;;  %v11964_v22 = vsel %vm253_vm5, %v445_v34, 0.0  ;;  %v399_v34 = vrot.slane %v11504_v0, 1 }
  0xb3   : > { %9963 = vmatprep.mubr.msk.f32.mxu0 %vm171_vm1, %v11922_v15  ;;  %v413_v15 = vrot.slane %v11494_v61, 1  ;;  %15021 = vst [vmem:[#allocation30_spill] sm:$0xff] %v11954_v29  ;;  %15022 = vst [vmem:[#allocation31_spill] sm:$0xff] %v11964_v22 }
  0xb5   : > { %v446_v13 = vsel %vm419_vm2, %v413_v15, %v397_v17 }
  0xb6   : > { %9964 = vmatmul.mubr.msk.f32.gmra.mrb[14].mxu0 %vm171_vm1, %v11932_v47  ;;  %v11970_v47 = vsel %vm419_vm2, %v397_v17, %v413_v15  ;;  %v11980_v25 = vsel %vm253_vm5, %v446_v13, 0.0  ;;  %v400_v13 = vrot.slane %v11512_v2, 1 }
  0xb7   : > { %9966 = vmatprep.mubr.msk.f32.mxu0 %vm171_vm1, %v11938_v24  ;;  %v414_v24 = vrot.slane %v11502_v63, 1  ;;  %15023 = vst [vmem:[#allocation32_spill] sm:$0xff] %v11970_v47  ;;  %15024 = vst [vmem:[#allocation33_spill] sm:$0xff] %v11980_v25 }
  0xb9   : > { %v447_v15 = vsel %vm419_vm2, %v414_v24, %v398_v40 }
  0xba   : > { %9967 = vmatmul.mubr.msk.f32.gmra.mrb[16].mxu0 %vm171_vm1, %v11948_v26  ;;  %v11986_v26 = vsel %vm419_vm2, %v398_v40, %v414_v24  ;;  %v11996_v17 = vsel %vm253_vm5, %v447_v15, 0.0  ;;  %v401_v15 = vrot.slane %v11520_v4, 1 }
  0xbb   : > { %9969 = vmatprep.mubr.msk.f32.mxu0 %vm171_vm1, %v11954_v29  ;;  %v415_v29 = vrot.slane %v11510_v1, 1  ;;  %15025 = vst [vmem:[#allocation34_spill] sm:$0xff] %v11986_v26  ;;  %15026 = vst [vmem:[#allocation35_spill] sm:$0xff] %v11996_v17 }
  0xbd   : > { %v448_v24 = vsel %vm419_vm2, %v415_v29, %v399_v34 }
  0xbe   : > { %9970 = vmatmul.mubr.msk.f32.gmra.mrb[18].mxu0 %vm171_vm1, %v11964_v22  ;;  %v12002_v22 = vsel %vm419_vm2, %v399_v34, %v415_v29  ;;  %v12012_v40 = vsel %vm253_vm5, %v448_v24, 0.0  ;;  %v402_v24 = vrot.slane %v11531_v9, 1 }
  0xbf   : > { %9972 = vmatprep.mubr.msk.f32.mxu0 %vm171_vm1, %v11970_v47  ;;  %v416_v47 = vrot.slane %v11518_v3, 1  ;;  %15027 = vst [vmem:[#allocation36_spill] sm:$0xff] %v12002_v22 }
  0xc1   : > { %v449_v29 = vsel %vm419_vm2, %v416_v47, %v400_v13 }
  0xc2   : > { %9973 = vmatmul.mubr.msk.f32.gmra.mrb[20].mxu0 %vm171_vm1, %v11980_v25  ;;  %v12018_v25 = vsel %vm419_vm2, %v400_v13, %v416_v47  ;;  %v12028_v34 = vsel %vm253_vm5, %v449_v29, 0.0 }
  0xc3   : > { %9975 = vmatprep.mubr.msk.f32.mxu0 %vm171_vm1, %v11986_v26  ;;  %v417_v26 = vrot.slane %v11529_v8, 1  ;;  %15028 = vst [vmem:[#allocation37_spill] sm:$0xff] %v12018_v25 }
  0xc5   : > { %v450_v47 = vsel %vm419_vm2, %v417_v26, %v401_v15 }
  0xc6   : > { %9976 = vmatmul.mubr.msk.f32.gmra.mrb[22].mxu0 %vm171_vm1, %v11996_v17  ;;  %v12034_v17 = vsel %vm419_vm2, %v401_v15, %v417_v26  ;;  %v12044_v13 = vsel %vm253_vm5, %v450_v47, 0.0  ;;  %v12309_v47 = vld [vmem:[#allocation2 + $0x48] sm:$0xff] }
  0xc7   : > { %9978 = vmatprep.mubr.msk.f32.mxu0 %vm171_vm1, %v12002_v22  ;;  %v418_v22 = vrot.slane %v11542_v12, 1 }
  0xc9   : > { %v12048_v29 = vsel %vm419_vm2, %v402_v24, %v418_v22 }
  0xca   : > { %9979 = vmatmul.mubr.msk.f32.gmra.mrb[24].mxu0 %vm171_vm1, %v12012_v40 }
  0xcb   : > { %9981 = vmatprep.mubr.msk.f32.mxu0 %vm171_vm1, %v12018_v25  ;;  %v451_v25 = vsel %vm419_vm2, %v418_v22, %v402_v24  ;;  %v8801_v22 = vld [vmem:[%s14924_s1 + $0x14] sm:$0xf]  ;;  %v12307_v24 = vld [vmem:[#allocation2 + $0x40] sm:$0xff] }
  0xcc   : > { %v12058_v26 = vsel %vm253_vm5, %v451_v25, 0.0 }
  0xce   : > { %9982 = vmatmul.mubr.msk.f32.gmra.mrb[26].mxu0 %vm171_vm1, %v12028_v34 }
  0xcf   : > { %9984 = vmatprep.mubr.msk.f32.mxu0 %vm171_vm1, %v12034_v17 }
  0xd2   : > { %9985 = vmatmul.mubr.msk.f32.gmra.mrb[28].mxu0 %vm171_vm1, %v12044_v13 }
  0xd3   : > { %9987 = vmatprep.mubr.msk.f32.mxu0 %vm171_vm1, %v12048_v29 }
  0xd6   : > { %9988 = vmatmul.mubr.msk.f32.gmra.mrb[30].mxu0 %vm171_vm1, %v12058_v26 }
  0xd7   : > { %9992 = vmatprep.mubr.msk.f32.mxu0 %vm171_vm1, %v11557_v20  ;;  %v15030_v20 = vld [vmem:[#allocation8_spill] sm:$0xff] }
  0xda   : > { %9993 = vmatmul.mubr.msk.f32.vlgmr.msra.gmra.mrb[0].mxu0 %vm171_vm1, %v11575_v27  ;;  %v15031_v27 = vld [vmem:[#allocation9_spill] sm:$0xff] }
  0xdb   : > { %10041 = vmatpush3.msk.msra.mxu0 %vm587_vm0, %v11825_v33  ;;  %9995 = vmatprep.mubr.msk.f32.mxu0 %vm171_vm1, %v11579_v28  ;;  %v15029_v33 = vld [vmem:[#allocation7_spill] sm:$0xff]  ;;  %v15032_v28 = vld [vmem:[#allocation10_spill] sm:$0xff] }
  0xdc   : > { %10090 = vmatprep.subr.msk.mxu0 %vm587_vm0, %v8801_v22 }
  0xde   : > { %9996 = vmatmul.mubr.msk.f32.gmra.mrb[2].mxu0 %vm171_vm1, %v11593_v31  ;;  %v15033_v31 = vld [vmem:[#allocation11_spill] sm:$0xff] }
  0xdf   : > { %9998 = vmatprep.mubr.msk.f32.mxu0 %vm171_vm1, %v11597_v32  ;;  %v15034_v32 = vld [vmem:[#allocation12_spill] sm:$0xff] }
  0xe2   : > { %9999 = vmatmul.mubr.msk.f32.gmra.mrb[4].mxu0 %vm171_vm1, %v11609_v45  ;;  %v15035_v45 = vld [vmem:[#allocation13_spill] sm:$0xff] }
  0xe3   : > { %10001 = vmatprep.mubr.msk.f32.mxu0 %vm171_vm1, %v11613_v46  ;;  %v12116_v46 = vld [vmem:[#allocation2 + $0x100] sm:$0xff] }
  0xe6   : > { %10002 = vmatmul.mubr.msk.f32.gmra.mrb[6].mxu0 %vm171_vm1, %v11625_v50  ;;  %v12118_v50 = vld [vmem:[#allocation2 + $0x108] sm:$0xff] }
  0xe7   : > { %10004 = vmatprep.mubr.msk.f32.mxu0 %vm171_vm1, %v11629_v5  ;;  %v1545_v5 = vrot.slane %v12116_v46, 7 }
  0xea   : > { %10005 = vmatmul.mubr.msk.f32.gmra.mrb[8].mxu0 %vm171_vm1, %v11641_v11  ;;  %v1561_v11 = vrot.slane %v12118_v50, 7 }
  0xeb   : > { %10007 = vmatprep.mubr.msk.f32.mxu0 %vm171_vm1, %v11645_v14 }
  0xec   : > { %v1593_v14 = vsel %vm318_vm3, %v1561_v11, %v1545_v5 }
  0xee   : > { %10008 = vmatmul.mubr.msk.f32.gmra.mrb[10].mxu0 %vm171_vm1, %v11657_v19  ;;  %v12136_v19 = vsel %vm250_vm4, %v1593_v14, 0.0  ;;  %v12344_v14 = vld [vmem:[#allocation2 + $0x60] sm:$0xff] }
  0xef   : > { %10010 = vmatprep.mubr.msk.f32.mxu0 %vm171_vm1, %v11661_v21  ;;  %v12144_v21 = vsel %vm318_vm3, %v1545_v5, %v1561_v11  ;;  %v12341_v11 = vld [vmem:[%s14924_s1 + $0x20] sm:$0xf] }
  0xf2   : > { %10011 = vmatmul.mubr.msk.f32.gmra.mrb[12].mxu0 %vm171_vm1, %v11673_v30  ;;  %v15036_v30 = vld [vmem:[#allocation4_spill] sm:$0xff] }
  0xf3   : > { %10013 = vmatprep.mubr.msk.f32.mxu0 %vm171_vm1, %v11677_v18  ;;  %v8835_v18 = vld [vmem:[%s14924_s1 + $0x18] sm:$0xf] }
  0xf6   : > { %10014 = vmatmul.mubr.msk.f32.gmra.mrb[14].mxu0 %vm171_vm1, %v15029_v33  ;;  %v2831_v33 = vrot.slane %v12307_v24, 7 }
  0xf7   : > { %10016 = vmatprep.mubr.msk.f32.mxu0 %vm171_vm1, %v15030_v20  ;;  %v12325_v20 = vld [vmem:[#allocation2 + $0x50] sm:$0xff] }
  0xfa   : > { %10017 = vmatmul.mubr.msk.f32.gmra.mrb[16].mxu0 %vm171_vm1, %v15031_v27  ;;  %v12327_v27 = vld [vmem:[#allocation2 + $0x58] sm:$0xff] }
  0xfb   : > { %10019 = vmatprep.mubr.msk.f32.mxu0 %vm171_vm1, %v15032_v28  ;;  %v2848_v5 = vrot.slane %v12327_v27, 7 }
  0xfe   : > { %10020 = vmatmul.mubr.msk.f32.gmra.mrb[18].mxu0 %vm171_vm1, %v15033_v31 }
  0xff   : > { %10022 = vmatprep.mubr.msk.f32.mxu0 %vm171_vm1, %v15034_v32 }
 0x102   : > { %10023 = vmatmul.mubr.msk.f32.gmra.mrb[20].mxu0 %vm171_vm1, %v15035_v45  ;;  %v2832_v45 = vrot.slane %v12325_v20, 7 }
 0x103   : > { %10025 = vmatprep.mubr.msk.f32.mxu0 %vm171_vm1, %v11741_v43  ;;  %v15037_v43 = vld [vmem:[#allocation5_spill] sm:$0xff] }
 0x106   : > { %10026 = vmatmul.mubr.msk.f32.gmra.mrb[22].mxu0 %vm171_vm1, %v11753_v49  ;;  %v15038_v49 = vld [vmem:[#allocation6_spill] sm:$0xff] }
 0x107   : > { %10028 = vmatprep.mubr.msk.f32.mxu0 %vm171_vm1, %v11757_v6  ;;  %v1641_v6 = vrot.slane %v12116_v46, 1 }
 0x10a   : > { %10029 = vmatmul.mubr.msk.f32.gmra.mrb[24].mxu0 %vm171_vm1, %v11773_v48  ;;  %v1657_v48 = vrot.slane %v12118_v50, 1 }
 0x10b   : > { %10031 = vmatprep.mubr.msk.f32.mxu0 %vm171_vm1, %v11777_v16 }
 0x10c   : > { %v12297_v25 = vsel %vm419_vm2, %v1641_v6, %v1657_v48 }
 0x10e   : > { %10032 = vmatmul.mubr.msk.f32.gmra.mrb[26].mxu0 %vm171_vm1, %v11787_v23 }
 0x10f   : > { %10034 = vmatprep.mubr.msk.f32.mxu0 %vm171_vm1, %v11791_v44  ;;  %v12289_v44 = vld [vmem:[#allocation2 + $0x30] sm:$0xff] }
 0x110   : > { %v2830_v15 = vrot.slane %v12289_v44, 7 }
 0x112   : > { %10035 = vmatmul.mubr.msk.f32.gmra.mrb[28].mxu0 %vm171_vm1, %v11802_v42  ;;  %v12291_v42 = vld [vmem:[#allocation2 + $0x38] sm:$0xff] }
 0x113   : > { %10037 = vmatprep.mubr.msk.f32.mxu0 %vm171_vm1, %v12136_v19 }
 0x116   : > { %10038 = vmatmul.mubr.msk.f32.gmra.mrb[30].mxu0 %vm171_vm1, %v12144_v21 }
 0x117   : > { %10042 = vmatprep.mubr.msk.f32.mxu0 %vm171_vm1, %v15036_v30  ;;  %v12346_v30 = vld [vmem:[#allocation2 + $0x68] sm:$0xff] }
 0x11a   : > { %10043 = vmatmul.mubr.msk.f32.vlgmr.msra.gmra.mrb[0].mxu0 %vm171_vm1, %v15037_v43 }
 0x11b   : > { %10091 = vmatpush3.msk.msra.mxu0 %vm587_vm0, %v8801_v22  ;;  %10045 = vmatprep.mubr.msk.f32.mxu0 %vm171_vm1, %v11401_v35  ;;  %v15039_v35 = vld [vmem:[#allocation14_spill] sm:$0xff] }
 0x11c   : > { %10140 = vmatprep.subr.msk.mxu0 %vm587_vm0, %v8835_v18 }
 0x11e   : > { %10046 = vmatmul.mubr.msk.f32.gmra.mrb[2].mxu0 %vm171_vm1, %v11412_v36  ;;  %v12222_v36 = vld [vmem:[%s14924_s1 + $0x1c] sm:$0xf] }
 0x11f   : > { %10048 = vmatprep.mubr.msk.f32.mxu0 %vm171_vm1, %v11414_v37  ;;  %v15040_v37 = vld [vmem:[#allocation15_spill] sm:$0xff] }
 0x122   : > { %10049 = vmatmul.mubr.msk.f32.gmra.mrb[4].mxu0 %vm171_vm1, %v11420_v38  ;;  %v15041_v38 = vld [vmem:[#allocation16_spill] sm:$0xff] }
 0x123   : > { %10051 = vmatprep.mubr.msk.f32.mxu0 %vm171_vm1, %v11422_v39  ;;  %v15042_v39 = vld [vmem:[#allocation17_spill] sm:$0xff] }
 0x126   : > { %10052 = vmatmul.mubr.msk.f32.gmra.mrb[6].mxu0 %vm171_vm1, %v15038_v49  ;;  %v2880_v49 = vsel %vm318_vm3, %v2848_v5, %v2832_v45 }
 0x127   : > { %10054 = vmatprep.mubr.msk.f32.mxu0 %vm171_vm1, %v11428_v41  ;;  %v15043_v41 = vld [vmem:[#allocation18_spill] sm:$0xff] }
 0x12a   : > { %10055 = vmatmul.mubr.msk.f32.gmra.mrb[8].mxu0 %vm171_vm1, %v11454_v51  ;;  %v15044_v51 = vld [vmem:[#allocation19_spill] sm:$0xff] }
 0x12b   : > { %10057 = vmatprep.mubr.msk.f32.mxu0 %vm171_vm1, %v11456_v52  ;;  %v15045_v52 = vld [vmem:[#allocation20_spill] sm:$0xff] }
 0x12e   : > { %10058 = vmatmul.mubr.msk.f32.gmra.mrb[10].mxu0 %vm171_vm1, %v11462_v53  ;;  %v15046_v53 = vld [vmem:[#allocation21_spill] sm:$0xff] }
 0x12f   : > { %10060 = vmatprep.mubr.msk.f32.mxu0 %vm171_vm1, %v11464_v54  ;;  %v15047_v54 = vld [vmem:[#allocation22_spill] sm:$0xff] }
 0x132   : > { %10061 = vmatmul.mubr.msk.f32.gmra.mrb[12].mxu0 %vm171_vm1, %v11470_v55  ;;  %v15048_v55 = vld [vmem:[#allocation23_spill] sm:$0xff] }
 0x133   : > { %10063 = vmatprep.mubr.msk.f32.mxu0 %vm171_vm1, %v11472_v56  ;;  %v15049_v56 = vld [vmem:[#allocation24_spill] sm:$0xff] }
 0x136   : > { %10064 = vmatmul.mubr.msk.f32.gmra.mrb[14].mxu0 %vm171_vm1, %v11478_v57  ;;  %v15050_v57 = vld [vmem:[#allocation25_spill] sm:$0xff] }
 0x137   : > { %10066 = vmatprep.mubr.msk.f32.mxu0 %vm171_vm1, %v11480_v58  ;;  %v15051_v58 = vld [vmem:[#allocation26_spill] sm:$0xff] }
 0x13a   : > { %10067 = vmatmul.mubr.msk.f32.gmra.mrb[16].mxu0 %vm171_vm1, %v11486_v59  ;;  %v15052_v59 = vld [vmem:[#allocation27_spill] sm:$0xff] }
 0x13b   : > { %10069 = vmatprep.mubr.msk.f32.mxu0 %vm171_vm1, %v11488_v60  ;;  %v15053_v60 = vld [vmem:[#allocation28_spill] sm:$0xff] }
 0x13e   : > { %10070 = vmatmul.mubr.msk.f32.gmra.mrb[18].mxu0 %vm171_vm1, %v11494_v61  ;;  %v15054_v61 = vld [vmem:[#allocation29_spill] sm:$0xff] }
 0x13f   : > { %10072 = vmatprep.mubr.msk.f32.mxu0 %vm171_vm1, %v11496_v62  ;;  %v15055_v62 = vld [vmem:[#allocation30_spill] sm:$0xff] }
 0x142   : > { %10073 = vmatmul.mubr.msk.f32.gmra.mrb[20].mxu0 %vm171_vm1, %v11502_v63  ;;  %v15056_v63 = vld [vmem:[#allocation31_spill] sm:$0xff] }
 0x143   : > { %10075 = vmatprep.mubr.msk.f32.mxu0 %vm171_vm1, %v11504_v0  ;;  %v15057_v0 = vld [vmem:[#allocation32_spill] sm:$0xff] }
 0x146   : > { %10076 = vmatmul.mubr.msk.f32.gmra.mrb[22].mxu0 %vm171_vm1, %v11510_v1  ;;  %v15058_v1 = vld [vmem:[#allocation33_spill] sm:$0xff] }
 0x147   : > { %10078 = vmatprep.mubr.msk.f32.mxu0 %vm171_vm1, %v11512_v2  ;;  %v15059_v2 = vld [vmem:[#allocation34_spill] sm:$0xff] }
 0x14a   : > { %10079 = vmatmul.mubr.msk.f32.gmra.mrb[24].mxu0 %vm171_vm1, %v11518_v3  ;;  %v15060_v3 = vld [vmem:[#allocation35_spill] sm:$0xff] }
 0x14b   : > { %10081 = vmatprep.mubr.msk.f32.mxu0 %vm171_vm1, %v11520_v4  ;;  %v15061_v4 = vld [vmem:[#allocation36_spill] sm:$0xff] }
 0x14e   : > { %10082 = vmatmul.mubr.msk.f32.gmra.mrb[26].mxu0 %vm171_vm1, %v11529_v8  ;;  %v15062_v8 = vld [vmem:[#allocation37_spill] sm:$0xff] }
 0x14f   : > { %10084 = vmatprep.mubr.msk.f32.mxu0 %vm171_vm1, %v11531_v9  ;;  %v12277_v9 = vld [vmem:[#allocation2 + $0x20] sm:$0xff] }
 0x150   : > { %v2829_v16 = vrot.slane %v12277_v9, 7 }
 0x152   : > { %10085 = vmatmul.mubr.msk.f32.gmra.mrb[28].mxu0 %vm171_vm1, %v11542_v12  ;;  %v12279_v12 = vld [vmem:[#allocation2 + $0x28] sm:$0xff] }
 0x153   : > { %10087 = vmatprep.mubr.msk.f32.mxu0 %vm171_vm1, %v12116_v46  ;;  %v2845_v23 = vrot.slane %v12279_v12, 7 }
 0x155   : > { %v2861_v28 = vsel %vm318_vm3, %v2829_v16, %v2845_v23 }
 0x156   : > { %10088 = vmatmul.mubr.msk.f32.gmra.mrb[30].mxu0 %vm171_vm1, %v12118_v50 }
 0x157   : > { %10092 = vmatprep.mubr.msk.f32.mxu0 %vm171_vm1, %v15039_v35  ;;  %v2833_v35 = vrot.slane %v12344_v14, 7 }
 0x15a   : > { %10093 = vmatmul.mubr.msk.f32.vlgmr.msra.gmra.mrb[0].mxu0 %vm171_vm1, %v15040_v37  ;;  %v2849_v37 = vrot.slane %v12346_v30, 7 }
 0x15b   : > { %10141 = vmatpush3.msk.msra.mxu0 %vm587_vm0, %v8835_v18  ;;  %10095 = vmatprep.mubr.msk.f32.mxu0 %vm171_vm1, %v15041_v38  ;;  %v12364_v38 = vld [vmem:[#allocation2 + $0x78] sm:$0xff] }
 0x15c   : > { %10190 = vmatprep.subr.msk.mxu0 %vm587_vm0, %v12222_v36 }
 0x15e   : > { %10096 = vmatmul.mubr.msk.f32.gmra.mrb[2].mxu0 %vm171_vm1, %v15042_v39 }
 0x15f   : > { %10098 = vmatprep.mubr.msk.f32.mxu0 %vm171_vm1, %v15043_v41  ;;  %v2899_v41 = vsel %vm250_vm4, %v2880_v49, 0.0  ;;  %v12446_v49 = vld [vmem:[#allocation2 + $0xd0] sm:$0xff] }
 0x162   : > { %10099 = vmatmul.mubr.msk.f32.gmra.mrb[4].mxu0 %vm171_vm1, %v15044_v51  ;;  %v2881_v51 = vsel %vm318_vm3, %v2849_v37, %v2833_v35 }
 0x163   : > { %10101 = vmatprep.mubr.msk.f32.mxu0 %vm171_vm1, %v15045_v52 }
 0x166   : > { %10102 = vmatmul.mubr.msk.f32.gmra.mrb[6].mxu0 %vm171_vm1, %v15046_v53  ;;  %v2850_v53 = vrot.slane %v12364_v38, 7 }
 0x167   : > { %10104 = vmatprep.mubr.msk.f32.mxu0 %vm171_vm1, %v15047_v54  ;;  %v12376_v54 = vld [vmem:[#allocation2 + $0x80] sm:$0xff] }
 0x16a   : > { %10105 = vmatmul.mubr.msk.f32.gmra.mrb[8].mxu0 %vm171_vm1, %v15048_v55  ;;  %v12378_v55 = vld [vmem:[#allocation2 + $0x88] sm:$0xff] }
 0x16b   : > { %10107 = vmatprep.mubr.msk.f32.mxu0 %vm171_vm1, %v15049_v56  ;;  %v2864_v56 = vsel %vm318_vm3, %v2832_v45, %v2848_v5 }
 0x16e   : > { %10108 = vmatmul.mubr.msk.f32.gmra.mrb[10].mxu0 %vm171_vm1, %v15050_v57  ;;  %v2901_v57 = vsel %vm250_vm4, %v2881_v51, 0.0  ;;  %v2840_v51 = vrot.slane %v12446_v49, 7 }
 0x16f   : > { %10110 = vmatprep.mubr.msk.f32.mxu0 %vm171_vm1, %v15051_v58 }
 0x172   : > { %10111 = vmatmul.mubr.msk.f32.gmra.mrb[12].mxu0 %vm171_vm1, %v15052_v59  ;;  %v2835_v59 = vrot.slane %v12376_v54, 7 }
 0x173   : > { %10113 = vmatprep.mubr.msk.f32.mxu0 %vm171_vm1, %v15053_v60  ;;  %v2851_v60 = vrot.slane %v12378_v55, 7 }
 0x176   : > { %10114 = vmatmul.mubr.msk.f32.gmra.mrb[14].mxu0 %vm171_vm1, %v15054_v61  ;;  %v12390_v61 = vld [vmem:[#allocation2 + $0x90] sm:$0xff] }
 0x177   : > { %10116 = vmatprep.mubr.msk.f32.mxu0 %vm171_vm1, %v15055_v62  ;;  %v12392_v62 = vld [vmem:[#allocation2 + $0x98] sm:$0xff] }
 0x17a   : > { %10117 = vmatmul.mubr.msk.f32.gmra.mrb[16].mxu0 %vm171_vm1, %v15056_v63  ;;  %v2865_v63 = vsel %vm318_vm3, %v2833_v35, %v2849_v37  ;;  %v12448_v35 = vld [vmem:[#allocation2 + $0xd8] sm:$0xff] }
 0x17b   : > { %10119 = vmatprep.mubr.msk.f32.mxu0 %vm171_vm1, %v15057_v0 }
 0x17e   : > { %10120 = vmatmul.mubr.msk.f32.gmra.mrb[18].mxu0 %vm171_vm1, %v15058_v1  ;;  %v2883_v1 = vsel %vm318_vm3, %v2851_v60, %v2835_v59 }
 0x17f   : > { %10122 = vmatprep.mubr.msk.f32.mxu0 %vm171_vm1, %v15059_v2  ;;  %v2836_v2 = vrot.slane %v12390_v61, 7 }
 0x182   : > { %10123 = vmatmul.mubr.msk.f32.gmra.mrb[20].mxu0 %vm171_vm1, %v15060_v3  ;;  %v2852_v3 = vrot.slane %v12392_v62, 7 }
 0x183   : > { %10125 = vmatprep.mubr.msk.f32.mxu0 %vm171_vm1, %v15061_v4  ;;  %v12404_v4 = vld [vmem:[#allocation2 + $0xa0] sm:$0xff] }
 0x186   : > { %10126 = vmatmul.mubr.msk.f32.gmra.mrb[22].mxu0 %vm171_vm1, %v12012_v40  ;;  %v2877_v40 = vsel %vm318_vm3, %v2845_v23, %v2829_v16  ;;  %v2884_v16 = vsel %vm318_vm3, %v2852_v3, %v2836_v2  ;;  %v2837_v23 = vrot.slane %v12404_v4, 7 }
 0x187   : > { %10128 = vmatprep.mubr.msk.f32.mxu0 %vm171_vm1, %v15062_v8  ;;  %v12406_v8 = vld [vmem:[#allocation2 + $0xa8] sm:$0xff] }
 0x18a   : > { %10129 = vmatmul.mubr.msk.f32.gmra.mrb[24].mxu0 %vm171_vm1, %v12028_v34  ;;  %v2846_v34 = vrot.slane %v12291_v42, 7 }
 0x18b   : > { %10131 = vmatprep.mubr.msk.f32.mxu0 %vm171_vm1, %v12034_v17  ;;  %v1689_v17 = vsel %vm419_vm2, %v1657_v48, %v1641_v6  ;;  %v2905_v48 = vsel %vm250_vm4, %v2883_v1, 0.0  ;;  %v12476_v1 = vld [vmem:[#allocation2 + $0xf8] sm:$0xff] }
 0x18c   : > { %v2878_v22 = vsel %vm318_vm3, %v2846_v34, %v2830_v15  ;;  %v2862_v18 = vsel %vm318_vm3, %v2830_v15, %v2846_v34  ;;  %v12420_v15 = vld [vmem:[#allocation2 + $0xb8] sm:$0xff]  ;;  %v2867_v34 = vsel %vm318_vm3, %v2835_v59, %v2851_v60 }
 0x18d   : > { %v2895_v31 = vsel %vm250_vm4, %v2878_v22, 0.0 }
 0x18e   : > { %10132 = vmatmul.mubr.msk.f32.gmra.mrb[26].mxu0 %vm171_vm1, %v12044_v13  ;;  %v12315_v13 = vsel %vm253_vm5, %v1689_v17, 0.0  ;;  %v2853_v17 = vrot.slane %v12406_v8, 7 }
 0x18f   : > { %10134 = vmatprep.mubr.msk.f32.mxu0 %vm171_vm1, %v12048_v29  ;;  %v2893_v29 = vsel %vm250_vm4, %v2877_v40, 0.0  ;;  %v12418_v40 = vld [vmem:[#allocation2 + $0xb0] sm:$0xff] }
 0x190   : > { %v2885_v22 = vsel %vm318_vm3, %v2853_v17, %v2837_v23  ;;  %v2869_v37 = vsel %vm318_vm3, %v2837_v23, %v2853_v17 }
 0x191   : > { %v2909_v45 = vsel %vm250_vm4, %v2885_v22, 0.0  ;;  %v12498_v22 = vld [vmem:[#allocation2 + $0x118] sm:$0xff] }
 0x192   : > { %10135 = vmatmul.mubr.msk.f32.gmra.mrb[28].mxu0 %vm171_vm1, %v12058_v26  ;;  %v2847_v26 = vrot.slane %v12309_v47, 7 }
 0x193   : > { %10137 = vmatprep.mubr.msk.f32.mxu0 %vm171_vm1, %v12297_v25 }
 0x194   : > { %v2879_v32 = vsel %vm318_vm3, %v2847_v26, %v2831_v33  ;;  %v2863_v39 = vsel %vm318_vm3, %v2831_v33, %v2847_v26  ;;  %v2838_v33 = vrot.slane %v12418_v40, 7  ;;  %v2854_v26 = vrot.slane %v12420_v15, 7 }
 0x195   : > { %v2897_v43 = vsel %vm250_vm4, %v2879_v32, 0.0  ;;  %v2868_v32 = vsel %vm318_vm3, %v2836_v2, %v2852_v3 }
 0x196   : > { %10138 = vmatmul.mubr.msk.f32.gmra.mrb[30].mxu0 %vm171_vm1, %v12315_v13  ;;  %v2886_v5 = vsel %vm318_vm3, %v2854_v26, %v2838_v33 }
 0x197   : > { %10142 = vmatprep.mubr.msk.f32.mxu0 %vm171_vm1, %v2893_v29  ;;  %v2907_v29 = vsel %vm250_vm4, %v2884_v16, 0.0  ;;  %v2858_v16 = vrot.slane %v12476_v1, 7 }
 0x19a   : > { %10143 = vmatmul.mubr.msk.f32.vlgmr.msra.gmra.mrb[0].mxu0 %vm171_vm1, %v2861_v28  ;;  %v12432_v28 = vld [vmem:[#allocation2 + $0xc0] sm:$0xff] }
 0x19b   : > { %10191 = vmatpush3.msk.msra.mxu0 %vm587_vm0, %v12222_v36  ;;  %10145 = vmatprep.mubr.msk.f32.mxu0 %vm171_vm1, %v2895_v31  ;;  %v12362_v36 = vld [vmem:[#allocation2 + $0x70] sm:$0xff]  ;;  %v12434_v31 = vld [vmem:[#allocation2 + $0xc8] sm:$0xff] }
 0x19c   : > { %10240 = vmatprep.subr.msk.mxu0 %vm587_vm0, %v12341_v11  ;;  %v2834_v52 = vrot.slane %v12362_v36, 7 }
 0x19e   : > { %10146 = vmatmul.mubr.msk.f32.gmra.mrb[2].mxu0 %vm171_vm1, %v2862_v18  ;;  %v2882_v58 = vsel %vm318_vm3, %v2850_v53, %v2834_v52  ;;  %v2866_v6 = vsel %vm318_vm3, %v2834_v52, %v2850_v53  ;;  %v2839_v18 = vrot.slane %v12432_v28, 7  ;;  %v2856_v52 = vrot.slane %v12448_v35, 7  ;;  %v12460_v53 = vld [vmem:[#allocation2 + $0xe0] sm:$0xff] }
 0x19f   : > { %10148 = vmatprep.mubr.msk.f32.mxu0 %vm171_vm1, %v2897_v43  ;;  %v2903_v0 = vsel %vm250_vm4, %v2882_v58, 0.0  ;;  %v2855_v43 = vrot.slane %v12434_v31, 7  ;;  %v2841_v60 = vrot.slane %v12460_v53, 7 }
 0x1a0   : > { %v2888_v59 = vsel %vm318_vm3, %v2856_v52, %v2840_v51  ;;  %v2872_v23 = vsel %vm318_vm3, %v2840_v51, %v2856_v52  ;;  %v2927_v51 = vrot.slane %v12307_v24, 1 }
 0x1a1   : > { %v2871_v2 = vsel %vm318_vm3, %v2839_v18, %v2855_v43  ;;  %v2915_v3 = vsel %vm250_vm4, %v2888_v59, 0.0  ;;  %v2944_v59 = vrot.slane %v12327_v27, 1 }
 0x1a2   : > { %10149 = vmatmul.mubr.msk.f32.gmra.mrb[4].mxu0 %vm171_vm1, %v2863_v39  ;;  %v2911_v39 = vsel %vm250_vm4, %v2886_v5, 0.0 }
 0x1a3   : > { %10151 = vmatprep.mubr.msk.f32.mxu0 %vm171_vm1, %v2899_v41  ;;  %v2887_v41 = vsel %vm318_vm3, %v2855_v43, %v2839_v18 }
 0x1a4   : > { %v2913_v58 = vsel %vm250_vm4, %v2887_v41, 0.0  ;;  %v2926_v41 = vrot.slane %v12289_v44, 1 }
 0x1a6   : > { %10152 = vmatmul.mubr.msk.f32.gmra.mrb[6].mxu0 %vm171_vm1, %v2864_v56  ;;  %v12462_v56 = vld [vmem:[#allocation2 + $0xe8] sm:$0xff] }
 0x1a7   : > { %10154 = vmatprep.mubr.msk.f32.mxu0 %vm171_vm1, %v2901_v57  ;;  %v2870_v57 = vsel %vm318_vm3, %v2838_v33, %v2854_v26 }
 0x1aa   : > { %10155 = vmatmul.mubr.msk.f32.gmra.mrb[8].mxu0 %vm171_vm1, %v2865_v63  ;;  %v2857_v63 = vrot.slane %v12462_v56, 7 }
 0x1ab   : > { %10157 = vmatprep.mubr.msk.f32.mxu0 %vm171_vm1, %v2903_v0  ;;  %v12474_v0 = vld [vmem:[#allocation2 + $0xf0] sm:$0xff] }
 0x1ac   : > { %v2873_v33 = vsel %vm318_vm3, %v2841_v60, %v2857_v63 }
 0x1ae   : > { %10158 = vmatmul.mubr.msk.f32.gmra.mrb[10].mxu0 %vm171_vm1, %v2866_v6  ;;  %v2889_v6 = vsel %vm318_vm3, %v2857_v63, %v2841_v60  ;;  %v2929_v63 = vrot.slane %v12344_v14, 1 }
 0x1af   : > { %10160 = vmatprep.mubr.msk.f32.mxu0 %vm171_vm1, %v2905_v48  ;;  %v2842_v48 = vrot.slane %v12474_v0, 7  ;;  %v2917_v17 = vsel %vm250_vm4, %v2889_v6, 0.0  ;;  %v2930_v6 = vrot.slane %v12362_v36, 1 }
 0x1b1   : > { %v2874_v5 = vsel %vm318_vm3, %v2842_v48, %v2858_v16 }
 0x1b2   : > { %10161 = vmatmul.mubr.msk.f32.gmra.mrb[12].mxu0 %vm171_vm1, %v2867_v34  ;;  %v2890_v34 = vsel %vm318_vm3, %v2858_v16, %v2842_v48  ;;  %v2946_v48 = vrot.slane %v12364_v38, 1 }
 0x1b3   : > { %10163 = vmatprep.mubr.msk.f32.mxu0 %vm171_vm1, %v2907_v29  ;;  %v12496_v29 = vld [vmem:[#allocation2 + $0x110] sm:$0xff]  ;;  %v2919_v26 = vsel %vm250_vm4, %v2890_v34, 0.0 }
 0x1b4   : > { %v2978_v16 = vsel %vm419_vm2, %v2946_v48, %v2930_v6 }
 0x1b6   : > { %10164 = vmatmul.mubr.msk.f32.gmra.mrb[14].mxu0 %vm171_vm1, %v2868_v32  ;;  %v2844_v32 = vrot.slane %v12496_v29, 7 }
 0x1b7   : > { %10166 = vmatprep.mubr.msk.f32.mxu0 %vm171_vm1, %v2909_v45  ;;  %v2860_v45 = vrot.slane %v12498_v22, 7 }
 0x1b9   : > { %v2892_v18 = vsel %vm318_vm3, %v2860_v45, %v2844_v32 }
 0x1ba   : > { %10167 = vmatmul.mubr.msk.f32.gmra.mrb[16].mxu0 %vm171_vm1, %v2869_v37  ;;  %v2923_v43 = vsel %vm250_vm4, %v2892_v18, 0.0  ;;  %v2876_v37 = vsel %vm318_vm3, %v2844_v32, %v2860_v45  ;;  %v2933_v45 = vrot.slane %v12404_v4, 1 }
 0x1bb   : > { %10169 = vmatprep.mubr.msk.f32.mxu0 %vm171_vm1, %v2911_v39 }
 0x1be   : > { %10170 = vmatmul.mubr.msk.f32.gmra.mrb[18].mxu0 %vm171_vm1, %v2870_v57 }
 0x1bf   : > { %10172 = vmatprep.mubr.msk.f32.mxu0 %vm171_vm1, %v2913_v58  ;;  %v2928_v58 = vrot.slane %v12325_v20, 1 }
 0x1c1   : > { %v2976_v60 = vsel %vm419_vm2, %v2944_v59, %v2928_v58 }
 0x1c2   : > { %10173 = vmatmul.mubr.msk.f32.gmra.mrb[20].mxu0 %vm171_vm1, %v2871_v2  ;;  %v2945_v2 = vrot.slane %v12346_v30, 1 }
 0x1c3   : > { %10175 = vmatprep.mubr.msk.f32.mxu0 %vm171_vm1, %v2915_v3 }
 0x1c4   : > { %v2977_v3 = vsel %vm419_vm2, %v2945_v2, %v2929_v63 }
 0x1c6   : > { %10176 = vmatmul.mubr.msk.f32.gmra.mrb[22].mxu0 %vm171_vm1, %v2872_v23  ;;  %v2931_v23 = vrot.slane %v12376_v54, 1 }
 0x1c7   : > { %10178 = vmatprep.mubr.msk.f32.mxu0 %vm171_vm1, %v2917_v17  ;;  %v2947_v17 = vrot.slane %v12378_v55, 1 }
 0x1c9   : > { %v2979_v34 = vsel %vm419_vm2, %v2947_v17, %v2931_v23 }
 0x1ca   : > { %10179 = vmatmul.mubr.msk.f32.gmra.mrb[24].mxu0 %vm171_vm1, %v2873_v33  ;;  %v2932_v33 = vrot.slane %v12390_v61, 1 }
 0x1cb   : > { %10181 = vmatprep.mubr.msk.f32.mxu0 %vm171_vm1, %v2919_v26  ;;  %v2948_v26 = vrot.slane %v12392_v62, 1 }
 0x1cd   : > { %v2980_v32 = vsel %vm419_vm2, %v2948_v26, %v2932_v33 }
 0x1ce   : > { %10182 = vmatmul.mubr.msk.f32.gmra.mrb[26].mxu0 %vm171_vm1, %v2874_v5  ;;  %v2949_v5 = vrot.slane %v12406_v8, 1 }
 0x1cf   : > { %10184 = vmatprep.mubr.msk.f32.mxu0 %vm171_vm1, %v12136_v19  ;;  %v2925_v19 = vrot.slane %v12277_v9, 1 }
 0x1d0   : > { %v2981_v18 = vsel %vm419_vm2, %v2949_v5, %v2933_v45 }
 0x1d2   : > { %10185 = vmatmul.mubr.msk.f32.gmra.mrb[28].mxu0 %vm171_vm1, %v12144_v21  ;;  %v2941_v21 = vrot.slane %v12279_v12, 1 }
 0x1d3   : > { %10187 = vmatprep.mubr.msk.f32.mxu0 %vm171_vm1, %v2923_v43  ;;  %v2934_v43 = vrot.slane %v12418_v40, 1 }
 0x1d4   : > { %v2973_v39 = vsel %vm419_vm2, %v2941_v21, %v2925_v19 }
 0x1d6   : > { %10188 = vmatmul.mubr.msk.f32.gmra.mrb[30].mxu0 %vm171_vm1, %v2876_v37  ;;  %v2950_v37 = vrot.slane %v12420_v15, 1 }
 0x1d7   : > { %10192 = vmatprep.mubr.msk.f32.mxu0 %vm171_vm1, %v12277_v9 }
 0x1da   : > { %10193 = vmatmul.mubr.msk.f32.vlgmr.msra.gmra.mrb[0].mxu0 %vm171_vm1, %v12279_v12 }
 0x1db   : > { %10241 = vmatpush3.msk.msra.mxu0 %vm587_vm0, %v12341_v11  ;;  %10195 = vmatprep.mubr.msk.f32.mxu0 %vm171_vm1, %v12289_v44  ;;  %v2957_v11 = vsel %vm419_vm2, %v2925_v19, %v2941_v21  ;;  %v2943_v44 = vrot.slane %v12309_v47, 1  ;;  %v2982_v19 = vsel %vm419_vm2, %v2950_v37, %v2934_v43  ;;  %v2935_v21 = vrot.slane %v12432_v28, 1 }
 0x1dd   : > { %v2959_v52 = vsel %vm419_vm2, %v2927_v51, %v2943_v44  ;;  %v2975_v57 = vsel %vm419_vm2, %v2943_v44, %v2927_v51  ;;  %v2938_v44 = vrot.slane %v12474_v0, 1 }
 0x1de   : > { %10196 = vmatmul.mubr.msk.f32.gmra.mrb[2].mxu0 %vm171_vm1, %v12291_v42 }
 0x1df   : > { %10198 = vmatprep.mubr.msk.f32.mxu0 %vm171_vm1, %v12307_v24  ;;  %v2994_v24 = vsel %vm253_vm5, %v2975_v57, 0.0  ;;  %v2956_v57 = vrot.slane %v12498_v22, 1 }
 0x1e2   : > { %10199 = vmatmul.mubr.msk.f32.gmra.mrb[4].mxu0 %vm171_vm1, %v12309_v47  ;;  %v2960_v47 = vsel %vm419_vm2, %v2928_v58, %v2944_v59 }
 0x1e3   : > { %10201 = vmatprep.mubr.msk.f32.mxu0 %vm171_vm1, %v12325_v20  ;;  %v2996_v20 = vsel %vm253_vm5, %v2976_v60, 0.0 }
 0x1e6   : > { %10202 = vmatmul.mubr.msk.f32.gmra.mrb[6].mxu0 %vm171_vm1, %v12327_v27  ;;  %v2961_v27 = vsel %vm419_vm2, %v2929_v63, %v2945_v2 }
 0x1e7   : > { %10204 = vmatprep.mubr.msk.f32.mxu0 %vm171_vm1, %v12344_v14  ;;  %v2998_v14 = vsel %vm253_vm5, %v2977_v3, 0.0 }
 0x1ea   : > { %10205 = vmatmul.mubr.msk.f32.gmra.mrb[8].mxu0 %vm171_vm1, %v12346_v30  ;;  %v2962_v30 = vsel %vm419_vm2, %v2930_v6, %v2946_v48 }
 0x1eb   : > { %10207 = vmatprep.mubr.msk.f32.mxu0 %vm171_vm1, %v12362_v36  ;;  %v3000_v36 = vsel %vm253_vm5, %v2978_v16, 0.0 }
 0x1ee   : > { %10208 = vmatmul.mubr.msk.f32.gmra.mrb[10].mxu0 %vm171_vm1, %v12364_v38  ;;  %v2963_v38 = vsel %vm419_vm2, %v2931_v23, %v2947_v17 }
 0x1ef   : > { %10210 = vmatprep.mubr.msk.f32.mxu0 %vm171_vm1, %v12376_v54  ;;  %v3002_v54 = vsel %vm253_vm5, %v2979_v34, 0.0 }
 0x1f2   : > { %10211 = vmatmul.mubr.msk.f32.gmra.mrb[12].mxu0 %vm171_vm1, %v12378_v55  ;;  %v2964_v55 = vsel %vm419_vm2, %v2932_v33, %v2948_v26 }
 0x1f3   : > { %10213 = vmatprep.mubr.msk.f32.mxu0 %vm171_vm1, %v12390_v61  ;;  %v3004_v61 = vsel %vm253_vm5, %v2980_v32, 0.0 }
 0x1f6   : > { %10214 = vmatmul.mubr.msk.f32.gmra.mrb[14].mxu0 %vm171_vm1, %v12392_v62  ;;  %v2965_v62 = vsel %vm419_vm2, %v2933_v45, %v2949_v5 }
 0x1f7   : > { %10216 = vmatprep.mubr.msk.f32.mxu0 %vm171_vm1, %v12404_v4  ;;  %v3006_v4 = vsel %vm253_vm5, %v2981_v18, 0.0 }
 0x1fa   : > { %10217 = vmatmul.mubr.msk.f32.gmra.mrb[16].mxu0 %vm171_vm1, %v12406_v8  ;;  %v2966_v8 = vsel %vm419_vm2, %v2934_v43, %v2950_v37 }
 0x1fb   : > { %10219 = vmatprep.mubr.msk.f32.mxu0 %vm171_vm1, %v12418_v40  ;;  %v3008_v40 = vsel %vm253_vm5, %v2982_v19, 0.0 }
 0x1fe   : > { %10220 = vmatmul.mubr.msk.f32.gmra.mrb[18].mxu0 %vm171_vm1, %v12420_v15 }
 0x1ff   : > { %10222 = vmatprep.mubr.msk.f32.mxu0 %vm171_vm1, %v12432_v28 }
 0x202   : > { %10223 = vmatmul.mubr.msk.f32.gmra.mrb[20].mxu0 %vm171_vm1, %v12434_v31 }
 0x203   : > { %10225 = vmatprep.mubr.msk.f32.mxu0 %vm171_vm1, %v12446_v49 }
 0x206   : > { %10226 = vmatmul.mubr.msk.f32.gmra.mrb[22].mxu0 %vm171_vm1, %v12448_v35 }
 0x207   : > { %10228 = vmatprep.mubr.msk.f32.mxu0 %vm171_vm1, %v12460_v53 }
 0x20a   : > { %10229 = vmatmul.mubr.msk.f32.gmra.mrb[24].mxu0 %vm171_vm1, %v12462_v56 }
 0x20b   : > { %10231 = vmatprep.mubr.msk.f32.mxu0 %vm171_vm1, %v12474_v0 }
 0x20e   : > { %10232 = vmatmul.mubr.msk.f32.gmra.mrb[26].mxu0 %vm171_vm1, %v12476_v1 }
 0x20f   : > { %10234 = vmatprep.mubr.msk.f32.mxu0 %vm171_vm1, %v12116_v46  ;;  %v2942_v46 = vrot.slane %v12291_v42, 1 }
 0x211   : > { %v2958_v9 = vsel %vm419_vm2, %v2926_v41, %v2942_v46  ;;  %v2974_v12 = vsel %vm419_vm2, %v2942_v46, %v2926_v41  ;;  %v2936_v41 = vrot.slane %v12446_v49, 1  ;;  %v2952_v46 = vrot.slane %v12448_v35, 1 }
 0x212   : > { %10235 = vmatmul.mubr.msk.f32.gmra.mrb[28].mxu0 %vm171_vm1, %v12118_v50  ;;  %v2990_v50 = vsel %vm253_vm5, %v2973_v39, 0.0  ;;  %v2992_v42 = vsel %vm253_vm5, %v2974_v12, 0.0  ;;  %v2953_v12 = vrot.slane %v12462_v56, 1 }
 0x213   : > { %10237 = vmatprep.mubr.msk.f32.mxu0 %vm171_vm1, %v12496_v29 }
 0x216   : > { %10238 = vmatmul.mubr.msk.f32.gmra.mrb[30].mxu0 %vm171_vm1, %v12498_v22  ;;  %v12747_v22 = vld [vmem:[#allocation3] sm:$0xff] }
 0x217   : > { %10242 = vmatprep.mubr.msk.f32.mxu0 %vm171_vm1, %v2957_v11  ;;  %v2951_v11 = vrot.slane %v12434_v31, 1  ;;  %v2968_v31 = vsel %vm419_vm2, %v2936_v41, %v2952_v46  ;;  %10292 = vmatprep.mubr.msk.f32.mxu1 %vm171_vm1, %v12747_v22 }
 0x219   : > { %v2967_v15 = vsel %vm419_vm2, %v2935_v21, %v2951_v11  ;;  %v2983_v39 = vsel %vm419_vm2, %v2951_v11, %v2935_v21 }
 0x21a   : > { %10243 = vmatmul.mubr.msk.f32.vlgmr.msra.gmra.mrb[0].mxu0 %vm171_vm1, %v2990_v50  ;;  %v3010_v28 = vsel %vm253_vm5, %v2983_v39, 0.0  ;;  %v2984_v50 = vsel %vm419_vm2, %v2952_v46, %v2936_v41 }
 0x21b   : > { %10245 = vmatprep.mubr.msk.f32.mxu0 %vm171_vm1, %v2958_v9  ;;  %v2937_v9 = vrot.slane %v12460_v53, 1  ;;  %v3012_v49 = vsel %vm253_vm5, %v2984_v50, 0.0 }
 0x21d   : > { %v2969_v35 = vsel %vm419_vm2, %v2937_v9, %v2953_v12  ;;  %v2985_v51 = vsel %vm419_vm2, %v2953_v12, %v2937_v9 }
 0x21e   : > { %10246 = vmatmul.mubr.msk.f32.gmra.mrb[2].mxu0 %vm171_vm1, %v2992_v42  ;;  %v2954_v42 = vrot.slane %v12476_v1, 1  ;;  %v3014_v53 = vsel %vm253_vm5, %v2985_v51, 0.0  ;;  %v2940_v1 = vrot.slane %v12496_v29, 1 }
 0x21f   : > { %10248 = vmatprep.mubr.msk.f32.mxu0 %vm171_vm1, %v2959_v52 }
 0x220   : > { %v2970_v56 = vsel %vm419_vm2, %v2938_v44, %v2954_v42  ;;  %v2986_v52 = vsel %vm419_vm2, %v2954_v42, %v2938_v44  ;;  %v2972_v58 = vsel %vm419_vm2, %v2940_v1, %v2956_v57  ;;  %v2988_v59 = vsel %vm419_vm2, %v2956_v57, %v2940_v1 }
 0x221   : > { %v3016_v0 = vsel %vm253_vm5, %v2986_v52, 0.0  ;;  %v3020_v29 = vsel %vm253_vm5, %v2988_v59, 0.0 }
 0x222   : > { %10249 = vmatmul.mubr.msk.f32.gmra.mrb[4].mxu0 %vm171_vm1, %v2994_v24  ;;  %v4625_v24 = vld [vmem:[%s14925_s2] sm:$0xf] }
 0x223   : > { %10251 = vmatprep.mubr.msk.f32.mxu0 %vm171_vm1, %v2960_v47 }
 0x226   : > { %10252 = vmatmul.mubr.msk.f32.gmra.mrb[6].mxu0 %vm171_vm1, %v2996_v20 }
 0x227   : > { %10254 = vmatprep.mubr.msk.f32.mxu0 %vm171_vm1, %v2961_v27 }
 0x22a   : > { %10255 = vmatmul.mubr.msk.f32.gmra.mrb[8].mxu0 %vm171_vm1, %v2998_v14 }
 0x22b   : > { %10257 = vmatprep.mubr.msk.f32.mxu0 %vm171_vm1, %v2962_v30 }
 0x22e   : > { %10258 = vmatmul.mubr.msk.f32.gmra.mrb[10].mxu0 %vm171_vm1, %v3000_v36 }
 0x22f   : > { %10260 = vmatprep.mubr.msk.f32.mxu0 %vm171_vm1, %v2963_v38 }
 0x232   : > { %10261 = vmatmul.mubr.msk.f32.gmra.mrb[12].mxu0 %vm171_vm1, %v3002_v54 }
 0x233   : > { %10263 = vmatprep.mubr.msk.f32.mxu0 %vm171_vm1, %v2964_v55 }
 0x236   : > { %10264 = vmatmul.mubr.msk.f32.gmra.mrb[14].mxu0 %vm171_vm1, %v3004_v61 }
 0x237   : > { %10266 = vmatprep.mubr.msk.f32.mxu0 %vm171_vm1, %v2965_v62 }
 0x23a   : > { %10267 = vmatmul.mubr.msk.f32.gmra.mrb[16].mxu0 %vm171_vm1, %v3006_v4 }
 0x23b   : > { %10269 = vmatprep.mubr.msk.f32.mxu0 %vm171_vm1, %v2966_v8 }
 0x23e   : > { %10270 = vmatmul.mubr.msk.f32.gmra.mrb[18].mxu0 %vm171_vm1, %v3008_v40 }
 0x23f   : > { %10272 = vmatprep.mubr.msk.f32.mxu0 %vm171_vm1, %v2967_v15 }
 0x242   : > { %10273 = vmatmul.mubr.msk.f32.gmra.mrb[20].mxu0 %vm171_vm1, %v3010_v28 }
 0x243   : > { %10275 = vmatprep.mubr.msk.f32.mxu0 %vm171_vm1, %v2968_v31 }
 0x246   : > { %10276 = vmatmul.mubr.msk.f32.gmra.mrb[22].mxu0 %vm171_vm1, %v3012_v49 }
 0x247   : > { %10278 = vmatprep.mubr.msk.f32.mxu0 %vm171_vm1, %v2969_v35 }
 0x24a   : > { %10279 = vmatmul.mubr.msk.f32.gmra.mrb[24].mxu0 %vm171_vm1, %v3014_v53 }
 0x24b   : > { %10281 = vmatprep.mubr.msk.f32.mxu0 %vm171_vm1, %v2970_v56 }
 0x24e   : > { %10282 = vmatmul.mubr.msk.f32.gmra.mrb[26].mxu0 %vm171_vm1, %v3016_v0 }
 0x24f   : > { %10284 = vmatprep.mubr.msk.f32.mxu0 %vm171_vm1, %v12297_v25  ;;  %v8937_v25 = vld [vmem:[%s14925_s2 + $0x4] sm:$0xf] }
 0x250   : > { %10290 = vmatprep.subr.msk.mxu1 %vm587_vm0, %v8937_v25 }
 0x251   : > { %10291 = vmatpush3.msk.msra.mxu1 %vm587_vm0, %v8937_v25 }
 0x252   : > { %10285 = vmatmul.mubr.msk.f32.gmra.mrb[28].mxu0 %vm171_vm1, %v12315_v13  ;;  %v12755_v13 = vld [vmem:[#allocation3 + $0x8] sm:$0xff]  ;;  %10340 = vmatprep.subr.msk.mxu1 %vm587_vm0, %v4625_v24 }
 0x253   : > { %10287 = vmatprep.mubr.msk.f32.mxu0 %vm171_vm1, %v2972_v58  ;;  %10293 = vmatmul.mubr.msk.f32.vlgmr.msra.gmra.mrb[0].mxu1 %vm171_vm1, %v12755_v13 }
 0x254   : > { %10341 = vmatpush3.msk.msra.mxu1 %vm587_vm0, %v4625_v24 }
 0x256   : > { %10288 = vmatmul.mubr.msk.f32.gmra.mrb[30].mxu0 %vm171_vm1, %v3020_v29 }
 0x2ed   : > { %v12762_v47 = vpop.f32.mrb[0].mxu0 }
 0x2ee   : > { %v4096_v60 = vsel %vm171_vm1, %v12762_v47, 0.0  ;;  %v4165_v63 = vmul.f32 %v12762_v47, %v12762_v47  ;;  %v12768_v2 = vpop.f32.mrb[1].mxu0 }
 0x2ef   : > { %v4095_v20 = vsel %vm171_vm1, %v12768_v2, 0.0  ;;  %v4164_v27 = vmul.f32 %v12768_v2, %v12768_v2 }
 0x2f0   : > { %v4197_v3 = vsel %vm171_vm1, %v4165_v63, 0.0  ;;  %v4097_v6 = vadd.f32 %v4096_v60, %v4095_v20 }
 0x2f1   : > { %v4196_v48 = vsel %vm171_vm1, %v4164_v27, 0.0  ;;  %v12776_v14 = vpop.f32.mrb[2].mxu0 }
 0x2f2   : > { %v4198_v30 = vadd.f32 %v4197_v3, %v4196_v48  ;;  %v12778_v16 = vpop.f32.mrb[3].mxu0  ;;  %v4167_v23 = vmul.f32 %v12776_v14, %v12776_v14  ;;  %v4100_v34 = vsel %vm171_vm1, %v12776_v14, 0.0 }
 0x2f3   : > { %v4098_v17 = vsel %vm171_vm1, %v12778_v16, 0.0  ;;  %v4166_v36 = vmul.f32 %v12778_v16, %v12778_v16 }
 0x2f4   : > { %v4099_v38 = vadd.f32 %v4098_v17, %v4097_v6  ;;  %v4201_v45 = vsel %vm171_vm1, %v4167_v23, 0.0 }
 0x2f5   : > { %v4199_v33 = vsel %vm171_vm1, %v4166_v36, 0.0  ;;  %v12789_v26 = vpop.f32.mrb[4].mxu0 }
 0x2f6   : > { %v4200_v54 = vadd.f32 %v4199_v33, %v4198_v30  ;;  %v12791_v55 = vpop.f32.mrb[5].mxu0  ;;  %v4101_v32 = vadd.f32 %v4100_v34, %v4099_v38  ;;  %v4169_v5 = vmul.f32 %v12789_v26, %v12789_v26  ;;  %v4104_v37 = vsel %vm171_vm1, %v12789_v26, 0.0 }
 0x2f7   : > { %v4102_v61 = vsel %vm171_vm1, %v12791_v55, 0.0  ;;  %v4168_v62 = vmul.f32 %v12791_v55, %v12791_v55 }
 0x2f8   : > { %v4103_v18 = vadd.f32 %v4102_v61, %v4101_v32  ;;  %v4202_v43 = vadd.f32 %v4201_v45, %v4200_v54  ;;  %v4205_v40 = vsel %vm171_vm1, %v4169_v5, 0.0 }
 0x2f9   : > { %v4203_v4 = vsel %vm171_vm1, %v4168_v62, 0.0  ;;  %v12803_v8 = vpop.f32.mrb[6].mxu0 }
 0x2fa   : > { %v4204_v19 = vadd.f32 %v4203_v4, %v4202_v43  ;;  %v12805_v21 = vpop.f32.mrb[7].mxu0  ;;  %v4105_v11 = vadd.f32 %v4104_v37, %v4103_v18  ;;  %v4171_v15 = vmul.f32 %v12803_v8, %v12803_v8  ;;  %v4108_v31 = vsel %vm171_vm1, %v12803_v8, 0.0 }
 0x2fb   : > { %v4106_v39 = vsel %vm171_vm1, %v12805_v21, 0.0  ;;  %v4170_v41 = vmul.f32 %v12805_v21, %v12805_v21 }
 0x2fc   : > { %v4107_v46 = vadd.f32 %v4106_v39, %v4105_v11  ;;  %v4206_v28 = vadd.f32 %v4205_v40, %v4204_v19  ;;  %v4209_v51 = vsel %vm171_vm1, %v4171_v15, 0.0 }
 0x2fd   : > { %v4207_v50 = vsel %vm171_vm1, %v4170_v41, 0.0  ;;  %v12817_v9 = vpop.f32.mrb[8].mxu0 }
 0x2fe   : > { %v4208_v12 = vadd.f32 %v4207_v50, %v4206_v28  ;;  %v12819_v49 = vpop.f32.mrb[9].mxu0  ;;  %v4109_v35 = vadd.f32 %v4108_v31, %v4107_v46  ;;  %v4173_v44 = vmul.f32 %v12817_v9, %v12817_v9  ;;  %v4112_v0 = vsel %vm171_vm1, %v12817_v9, 0.0 }
 0x2ff   : > { %v4110_v42 = vsel %vm171_vm1, %v12819_v49, 0.0  ;;  %v4172_v53 = vmul.f32 %v12819_v49, %v12819_v49 }
 0x300   : > { %v4111_v56 = vadd.f32 %v4110_v42, %v4109_v35  ;;  %v4210_v52 = vadd.f32 %v4209_v51, %v4208_v12  ;;  %v4213_v25 = vsel %vm171_vm1, %v4173_v44, 0.0 }
 0x301   : > { %v4211_v1 = vsel %vm171_vm1, %v4172_v53, 0.0  ;;  %v12831_v57 = vpop.f32.mrb[10].mxu0 }
 0x302   : > { %v4212_v58 = vadd.f32 %v4211_v1, %v4210_v52  ;;  %v12833_v59 = vpop.f32.mrb[11].mxu0  ;;  %v4113_v29 = vadd.f32 %v4112_v0, %v4111_v56  ;;  %v4175_v24 = vmul.f32 %v12831_v57, %v12831_v57  ;;  %v4116_v3 = vsel %vm171_vm1, %v12831_v57, 0.0 }
 0x303   : > { %v4114_v60 = vsel %vm171_vm1, %v12833_v59, 0.0  ;;  %v4174_v63 = vmul.f32 %v12833_v59, %v12833_v59 }
 0x304   : > { %v4115_v20 = vadd.f32 %v4114_v60, %v4113_v29  ;;  %v4214_v27 = vadd.f32 %v4213_v25, %v4212_v58  ;;  %v4217_v36 = vsel %vm171_vm1, %v4175_v24, 0.0 }
 0x305   : > { %v4215_v6 = vsel %vm171_vm1, %v4174_v63, 0.0  ;;  %v12845_v48 = vpop.f32.mrb[12].mxu0 }
 0x306   : > { %v4216_v30 = vadd.f32 %v4215_v6, %v4214_v27  ;;  %v12847_v23 = vpop.f32.mrb[13].mxu0  ;;  %v4117_v17 = vadd.f32 %v4116_v3, %v4115_v20  ;;  %v4177_v38 = vmul.f32 %v12845_v48, %v12845_v48  ;;  %v4120_v45 = vsel %vm171_vm1, %v12845_v48, 0.0 }
 0x307   : > { %v4118_v34 = vsel %vm171_vm1, %v12847_v23, 0.0  ;;  %v4176_v33 = vmul.f32 %v12847_v23, %v12847_v23 }
 0x308   : > { %v4119_v54 = vadd.f32 %v4118_v34, %v4117_v17  ;;  %v4218_v32 = vadd.f32 %v4217_v36, %v4216_v30  ;;  %v4221_v37 = vsel %vm171_vm1, %v4177_v38, 0.0 }
 0x309   : > { %v4219_v5 = vsel %vm171_vm1, %v4176_v33, 0.0  ;;  %v12859_v61 = vpop.f32.mrb[14].mxu0 }
 0x30a   : > { %v4220_v62 = vadd.f32 %v4219_v5, %v4218_v32  ;;  %v12861_v18 = vpop.f32.mrb[15].mxu0  ;;  %v4121_v43 = vadd.f32 %v4120_v45, %v4119_v54  ;;  %v4179_v4 = vmul.f32 %v12859_v61, %v12859_v61  ;;  %v4124_v39 = vsel %vm171_vm1, %v12859_v61, 0.0 }
 0x30b   : > { %v4122_v19 = vsel %vm171_vm1, %v12861_v18, 0.0  ;;  %v4178_v11 = vmul.f32 %v12861_v18, %v12861_v18 }
 0x30c   : > { %v4123_v40 = vadd.f32 %v4122_v19, %v4121_v43  ;;  %v4222_v15 = vadd.f32 %v4221_v37, %v4220_v62  ;;  %v4225_v12 = vsel %vm171_vm1, %v4179_v4, 0.0  ;;  %v4433_v62 = vrot.slane %v12747_v22, 7 }
 0x30d   : > { %v4223_v41 = vsel %vm171_vm1, %v4178_v11, 0.0  ;;  %v12873_v46 = vpop.f32.mrb[16].mxu0  ;;  %v4449_v43 = vrot.slane %v12755_v13, 7 }
 0x30e   : > { %v4224_v28 = vadd.f32 %v4223_v41, %v4222_v15  ;;  %v12875_v31 = vpop.f32.mrb[17].mxu0  ;;  %v4125_v50 = vadd.f32 %v4124_v39, %v4123_v40  ;;  %v4181_v35 = vmul.f32 %v12873_v46, %v12873_v46  ;;  %v4128_v56 = vsel %vm171_vm1, %v12873_v46, 0.0 }
 0x30f   : > { %v4126_v51 = vsel %vm171_vm1, %v12875_v31, 0.0  ;;  %v4180_v44 = vmul.f32 %v12875_v31, %v12875_v31 }
 0x310   : > { %v4127_v42 = vadd.f32 %v4126_v51, %v4125_v50  ;;  %v4226_v53 = vadd.f32 %v4225_v12, %v4224_v28  ;;  %v4229_v25 = vsel %vm171_vm1, %v4181_v35, 0.0  ;;  %v12930_v51 = vsel %vm318_vm3, %v4449_v43, %v4433_v62 }
 0x311   : > { %v4227_v52 = vsel %vm171_vm1, %v4180_v44, 0.0  ;;  %v12887_v0 = vpop.f32.mrb[18].mxu0 }
 0x312   : > { %v4228_v1 = vadd.f32 %v4227_v52, %v4226_v53  ;;  %v12889_v58 = vpop.f32.mrb[19].mxu0  ;;  %v4129_v29 = vadd.f32 %v4128_v56, %v4127_v42  ;;  %v4183_v24 = vmul.f32 %v12887_v0, %v12887_v0  ;;  %v4132_v3 = vsel %vm171_vm1, %v12887_v0, 0.0  ;;  %v12940_v56 = vld [vmem:[%s14925_s2 + $0x8] sm:$0xf] }
 0x313   : > { %v4130_v60 = vsel %vm171_vm1, %v12889_v58, 0.0  ;;  %v4182_v63 = vmul.f32 %v12889_v58, %v12889_v58  ;;  %v12944_v52 = vsel %vm318_vm3, %v4433_v62, %v4449_v43  ;;  %10390 = vmatprep.subr.msk.mxu1 %vm587_vm0, %v12940_v56 }
 0x314   : > { %v4131_v20 = vadd.f32 %v4130_v60, %v4129_v29  ;;  %v4230_v27 = vadd.f32 %v4229_v25, %v4228_v1  ;;  %v4233_v34 = vsel %vm171_vm1, %v4183_v24, 0.0 }
 0x315   : > { %v4231_v6 = vsel %vm171_vm1, %v4182_v63, 0.0  ;;  %v12901_v30 = vpop.f32.mrb[20].mxu0 }
 0x316   : > { %v4232_v17 = vadd.f32 %v4231_v6, %v4230_v27  ;;  %v12903_v36 = vpop.f32.mrb[21].mxu0  ;;  %v4133_v38 = vadd.f32 %v4132_v3, %v4131_v20  ;;  %v4185_v33 = vmul.f32 %v12901_v30, %v12901_v30  ;;  %v4136_v37 = vsel %vm171_vm1, %v12901_v30, 0.0 }
 0x317   : > { %v4134_v54 = vsel %vm171_vm1, %v12903_v36, 0.0  ;;  %v4184_v32 = vmul.f32 %v12903_v36, %v12903_v36 }
 0x318   : > { %v4135_v45 = vadd.f32 %v4134_v54, %v4133_v38  ;;  %v4234_v5 = vadd.f32 %v4233_v34, %v4232_v17  ;;  %v4237_v39 = vsel %vm171_vm1, %v4185_v33, 0.0 }
 0x319   : > { %v4235_v4 = vsel %vm171_vm1, %v4184_v32, 0.0  ;;  %v12917_v19 = vpop.f32.mrb[22].mxu0 }
 0x31a   : > { %v4236_v11 = vadd.f32 %v4235_v4, %v4234_v5  ;;  %v12919_v40 = vpop.f32.mrb[23].mxu0  ;;  %v4137_v15 = vadd.f32 %v4136_v37, %v4135_v45  ;;  %v4187_v41 = vmul.f32 %v12917_v19, %v12917_v19  ;;  %v4140_v44 = vsel %vm171_vm1, %v12917_v19, 0.0 }
 0x31b   : > { %v4138_v28 = vsel %vm171_vm1, %v12919_v40, 0.0  ;;  %v4186_v50 = vmul.f32 %v12919_v40, %v12919_v40 }
 0x31c   : > { %v4139_v12 = vadd.f32 %v4138_v28, %v4137_v15  ;;  %v4238_v35 = vadd.f32 %v4237_v39, %v4236_v11  ;;  %v4241_v24 = vsel %vm171_vm1, %v4187_v41, 0.0 }
 0x31d   : > { %v4239_v42 = vsel %vm171_vm1, %v4186_v50, 0.0  ;;  %v12935_v53 = vpop.f32.mrb[24].mxu0 }
 0x31e   : > { %v4240_v1 = vadd.f32 %v4239_v42, %v4238_v35  ;;  %v12946_v29 = vpop.f32.mrb[25].mxu0  ;;  %v4141_v25 = vadd.f32 %v4140_v44, %v4139_v12  ;;  %v4189_v60 = vmul.f32 %v12935_v53, %v12935_v53  ;;  %v4144_v6 = vsel %vm171_vm1, %v12935_v53, 0.0 }
 0x31f   : > { %v4142_v63 = vsel %vm171_vm1, %v12946_v29, 0.0  ;;  %v4188_v20 = vmul.f32 %v12946_v29, %v12946_v29 }
 0x320   : > { %v4143_v27 = vadd.f32 %v4142_v63, %v4141_v25  ;;  %v4242_v3 = vadd.f32 %v4241_v24, %v4240_v1  ;;  %v4245_v32 = vsel %vm171_vm1, %v4189_v60, 0.0 }
 0x321   : > { %v4243_v17 = vsel %vm171_vm1, %v4188_v20, 0.0  ;;  %v12960_v38 = vpop.f32.mrb[26].mxu0 }
 0x322   : > { %v4244_v34 = vadd.f32 %v4243_v17, %v4242_v3  ;;  %v12962_v33 = vpop.f32.mrb[27].mxu0  ;;  %v4145_v54 = vadd.f32 %v4144_v6, %v4143_v27  ;;  %v4191_v45 = vmul.f32 %v12960_v38, %v12960_v38  ;;  %v4148_v4 = vsel %vm171_vm1, %v12960_v38, 0.0 }
 0x323   : > { %v4146_v5 = vsel %vm171_vm1, %v12962_v33, 0.0  ;;  %v4190_v62 = vmul.f32 %v12962_v33, %v12962_v33 }
 0x324   : > { %v4147_v43 = vadd.f32 %v4146_v5, %v4145_v54  ;;  %v4246_v37 = vadd.f32 %v4245_v32, %v4244_v34  ;;  %v4249_v50 = vsel %vm171_vm1, %v4191_v45, 0.0 }
 0x325   : > { %v4247_v11 = vsel %vm171_vm1, %v4190_v62, 0.0  ;;  %v12974_v15 = vpop.f32.mrb[28].mxu0 }
 0x326   : > { %v4248_v39 = vadd.f32 %v4247_v11, %v4246_v37  ;;  %v12976_v41 = vpop.f32.mrb[29].mxu0  ;;  %v4149_v28 = vadd.f32 %v4148_v4, %v4147_v43  ;;  %v4193_v12 = vmul.f32 %v12974_v15, %v12974_v15  ;;  %v4152_v25 = vsel %vm171_vm1, %v12974_v15, 0.0 }
 0x327   : > { %v4150_v35 = vsel %vm171_vm1, %v12976_v41, 0.0  ;;  %v4192_v44 = vmul.f32 %v12976_v41, %v12976_v41 }
 0x328   : > { %v4151_v42 = vadd.f32 %v4150_v35, %v4149_v28  ;;  %v4250_v1 = vadd.f32 %v4249_v50, %v4248_v39  ;;  %v4253_v3 = vsel %vm171_vm1, %v4193_v12, 0.0 }
 0x329   : > { %v4251_v24 = vsel %vm171_vm1, %v4192_v44, 0.0  ;;  %v12988_v60 = vpop.f32.mrb[30].mxu0 }
 0x32a   : > { %v4252_v63 = vadd.f32 %v4251_v24, %v4250_v1  ;;  %v12990_v20 = vpop.f32.mrb[31].mxu0  ;;  %v4153_v27 = vadd.f32 %v4152_v25, %v4151_v42  ;;  %v4195_v6 = vmul.f32 %v12988_v60, %v12988_v60  ;;  %v4156_v45 = vsel %vm171_vm1, %v12988_v60, 0.0 }
 0x32b   : > { %v4154_v17 = vsel %vm171_vm1, %v12990_v20, 0.0  ;;  %v4194_v34 = vmul.f32 %v12990_v20, %v12990_v20 }
 0x32c   : > { %v4155_v54 = vadd.f32 %v4154_v17, %v4153_v27  ;;  %v4254_v32 = vadd.f32 %v4253_v3, %v4252_v63  ;;  %v4257_v37 = vsel %vm171_vm1, %v4195_v6, 0.0 }
 0x32d   : > { %v4255_v5 = vsel %vm171_vm1, %v4194_v34, 0.0 }
 0x32e   : > { %v4157_v62 = vadd.f32 %v4156_v45, %v4155_v54  ;;  %v4256_v43 = vadd.f32 %v4255_v5, %v4254_v32 }
 0x330   : > { %v4158_v4 = vrot.slane %v4157_v62, 4  ;;  %v4258_v11 = vadd.f32 %v4257_v37, %v4256_v43 }
 0x332   : > { %v4159_v39 = vadd.f32 %v4158_v4, %v4157_v62  ;;  %v4259_v28 = vrot.slane %v4258_v11, 4 }
 0x334   : > { %v4160_v50 = vrot.slane %v4159_v39, 2  ;;  %v4260_v12 = vadd.f32 %v4259_v28, %v4258_v11  ;;  %v4529_v11 = vrot.slane %v12747_v22, 1 }
 0x336   : > { %v4161_v35 = vadd.f32 %v4160_v50, %v4159_v39  ;;  %v4261_v44 = vrot.slane %v4260_v12, 2 }
 0x338   : > { %v4162_v42 = vrot.slane %v4161_v35, 1  ;;  %v4262_v1 = vadd.f32 %v4261_v44, %v4260_v12 }
 0x33a   : > { %v4163_v25 = vadd.f32 %v4162_v42, %v4161_v35  ;;  %v4263_v24 = vrot.slane %v4262_v1, 1 }
 0x33c   : > { %v4264_v63 = vadd.f32 %v4263_v24, %v4262_v1  ;;  %v13003_v27 = vmul.f32 0.00390625, %v4163_v25 }
 0x33e   : > { %v4266_v3 = vmul.f32 0.00390625, %v4264_v63  ;;  %v4267_v17 = vmul.f32 %v13003_v27, %v13003_v27  ;;  %v4300_v6 = vsub.f32 %v12990_v20, %v13003_v27  ;;  %v4270_v34 = vsub.f32 %v12768_v2, %v13003_v27 }
 0x33f   : > { %v4271_v54 = vsub.f32 %v12762_v47, %v13003_v27  ;;  %v4272_v32 = vsub.f32 %v12778_v16, %v13003_v27  ;;  %v4273_v45 = vsub.f32 %v12776_v14, %v13003_v27  ;;  %v4274_v5 = vsub.f32 %v12791_v55, %v13003_v27 }
 0x340   : > { %v4268_v62 = vsub.f32 %v4266_v3, %v4267_v17  ;;  %v4275_v43 = vsub.f32 %v12789_v26, %v13003_v27  ;;  %v4276_v20 = vsub.f32 %v12805_v21, %v13003_v27  ;;  %v4277_v2 = vsub.f32 %v12803_v8, %v13003_v27 }
 0x341   : > { %v4278_v47 = vsub.f32 %v12819_v49, %v13003_v27  ;;  %v4279_v16 = vsub.f32 %v12817_v9, %v13003_v27  ;;  %v4280_v14 = vsub.f32 %v12833_v59, %v13003_v27  ;;  %v4281_v55 = vsub.f32 %v12831_v57, %v13003_v27 }
 0x342   : > { %v4269_v37 = vmax.f32 %v4268_v62, 0.0  ;;  %v4282_v26 = vsub.f32 %v12847_v23, %v13003_v27  ;;  %v4283_v21 = vsub.f32 %v12845_v48, %v13003_v27  ;;  %v4284_v8 = vsub.f32 %v12861_v18, %v13003_v27 }
 0x343   : > { %v4285_v49 = vsub.f32 %v12859_v61, %v13003_v27  ;;  %v4286_v9 = vsub.f32 %v12875_v31, %v13003_v27  ;;  %v4287_v59 = vsub.f32 %v12873_v46, %v13003_v27  ;;  %v4288_v57 = vsub.f32 %v12889_v58, %v13003_v27 }
 0x344   : > { %v4302_v4 = vadd.f32 1e-05, %v4269_v37  ;;  %v4289_v23 = vsub.f32 %v12887_v0, %v13003_v27  ;;  %v4290_v48 = vsub.f32 %v12903_v36, %v13003_v27  ;;  %v4291_v18 = vsub.f32 %v12901_v30, %v13003_v27 }
 0x345   : > { %v4292_v61 = vsub.f32 %v12919_v40, %v13003_v27  ;;  %v4293_v31 = vsub.f32 %v12917_v19, %v13003_v27  ;;  %v4294_v46 = vsub.f32 %v12946_v29, %v13003_v27  ;;  %v4295_v58 = vsub.f32 %v12935_v53, %v13003_v27 }
 0x346   : > { %11261 = vrsqrt.f32 %v4302_v4  ;;  %v4296_v0 = vsub.f32 %v12962_v33, %v13003_v27  ;;  %v4297_v36 = vsub.f32 %v12960_v38, %v13003_v27  ;;  %v4298_v30 = vsub.f32 %v12976_v41, %v13003_v27 }
 0x347   : > { %v4299_v40 = vsub.f32 %v12974_v15, %v13003_v27  ;;  %v4301_v19 = vsub.f32 %v12988_v60, %v13003_v27  ;;  %v4545_v53 = vrot.slane %v12755_v13, 1 }
 0x350   : > { %v11262_v29 = vpop.eup %11261 }
 0x351   : > { %v4334_v39 = vmul.f32 %v11262_v29, %v4300_v6  ;;  %v4304_v28 = vmul.f32 %v11262_v29, %v4270_v34  ;;  %v4305_v33 = vmul.f32 %v11262_v29, %v4271_v54  ;;  %v4306_v50 = vmul.f32 %v11262_v29, %v4272_v32 }
 0x352   : > { %v4307_v12 = vmul.f32 %v11262_v29, %v4273_v45  ;;  %v4308_v38 = vmul.f32 %v11262_v29, %v4274_v5  ;;  %v4309_v35 = vmul.f32 %v11262_v29, %v4275_v43  ;;  %v4310_v44 = vmul.f32 %v11262_v29, %v4276_v20 }
 0x353   : > { %v4366_v41 = vmax.f32 %v4334_v39, 0.0  ;;  %v4311_v42 = vmul.f32 %v11262_v29, %v4277_v2  ;;  %v4312_v1 = vmul.f32 %v11262_v29, %v4278_v47  ;;  %v4313_v15 = vmul.f32 %v11262_v29, %v4279_v16 }
 0x354   : > { %v4314_v25 = vmul.f32 %v11262_v29, %v4280_v14  ;;  %v4315_v24 = vmul.f32 %v11262_v29, %v4281_v55  ;;  %v4316_v60 = vmul.f32 %v11262_v29, %v4282_v26  ;;  %v4317_v63 = vmul.f32 %v11262_v29, %v4283_v21 }
 0x355   : > { %4399 = vst.msk [vmem:[#allocation3 + $0x100] sm:$0xff] %vm171_vm1, %v4366_v41  ;;  %v4318_v27 = vmul.f32 %v11262_v29, %v4284_v8  ;;  %v4319_v3 = vmul.f32 %v11262_v29, %v4285_v49  ;;  %v4320_v17 = vmul.f32 %v11262_v29, %v4286_v9  ;;  %v4321_v6 = vmul.f32 %v11262_v29, %v4287_v59 }
 0x356   : > { %v4322_v34 = vmul.f32 %v11262_v29, %v4288_v57  ;;  %v13074_v54 = vmul.f32 %v11262_v29, %v4289_v23  ;;  %v13076_v32 = vmul.f32 %v11262_v29, %v4290_v48  ;;  %v13078_v45 = vmul.f32 %v11262_v29, %v4291_v18 }
 0x357   : > { %v13080_v5 = vmul.f32 %v11262_v29, %v4292_v61  ;;  %v13082_v62 = vmul.f32 %v11262_v29, %v4293_v31  ;;  %v13084_v43 = vmul.f32 %v11262_v29, %v4294_v46  ;;  %v13086_v20 = vmul.f32 %v11262_v29, %v4295_v58 }
 0x358   : > { %v13088_v2 = vmul.f32 %v11262_v29, %v4296_v0  ;;  %v13090_v47 = vmul.f32 %v11262_v29, %v4297_v36  ;;  %v13092_v16 = vmul.f32 %v11262_v29, %v4298_v30  ;;  %v13094_v14 = vmul.f32 %v11262_v29, %v4299_v40 }
 0x359   : > { %v13096_v55 = vmul.f32 %v11262_v29, %v4301_v19  ;;  %v4336_v37 = vmax.f32 %v4304_v28, 0.0  ;;  %v4337_v26 = vmax.f32 %v4305_v33, 0.0  ;;  %v4338_v21 = vmax.f32 %v4306_v50, 0.0 }
 0x35a   : > { %v4339_v8 = vmax.f32 %v4307_v12, 0.0  ;;  %v4340_v49 = vmax.f32 %v4308_v38, 0.0  ;;  %v4341_v9 = vmax.f32 %v4309_v35, 0.0  ;;  %v4342_v59 = vmax.f32 %v4310_v44, 0.0 }
 0x35b   : > { %v4343_v57 = vmax.f32 %v4311_v42, 0.0  ;;  %v4344_v4 = vmax.f32 %v4312_v1, 0.0  ;;  %v4345_v23 = vmax.f32 %v4313_v15, 0.0  ;;  %v4346_v48 = vmax.f32 %v4314_v25, 0.0  ;;  %4369 = vst.msk [vmem:[#allocation3 + $0x10] sm:$0xff] %vm171_vm1, %v4336_v37  ;;  %4370 = vst.msk [vmem:[#allocation3 + $0x18] sm:$0xff] %vm171_vm1, %v4337_v26 }
 0x35c   : > { %4371 = vst.msk [vmem:[#allocation3 + $0x20] sm:$0xff] %vm171_vm1, %v4338_v21  ;;  %v4347_v18 = vmax.f32 %v4315_v24, 0.0  ;;  %v4348_v61 = vmax.f32 %v4316_v60, 0.0  ;;  %v4349_v31 = vmax.f32 %v4317_v63, 0.0  ;;  %v4350_v46 = vmax.f32 %v4318_v27, 0.0  ;;  %4372 = vst.msk [vmem:[#allocation3 + $0x28] sm:$0xff] %vm171_vm1, %v4339_v8 }
 0x35d   : > { %4373 = vst.msk [vmem:[#allocation3 + $0x30] sm:$0xff] %vm171_vm1, %v4340_v49  ;;  %4374 = vst.msk [vmem:[#allocation3 + $0x38] sm:$0xff] %vm171_vm1, %v4341_v9  ;;  %v4351_v58 = vmax.f32 %v4319_v3, 0.0  ;;  %v4352_v0 = vmax.f32 %v4320_v17, 0.0  ;;  %v4353_v36 = vmax.f32 %v4321_v6, 0.0  ;;  %v4354_v30 = vmax.f32 %v4322_v34, 0.0 }
 0x35e   : > { %4375 = vst.msk [vmem:[#allocation3 + $0x40] sm:$0xff] %vm171_vm1, %v4342_v59  ;;  %4376 = vst.msk [vmem:[#allocation3 + $0x48] sm:$0xff] %vm171_vm1, %v4343_v57  ;;  %v4355_v40 = vmax.f32 %v13074_v54, 0.0  ;;  %v4356_v19 = vmax.f32 %v13076_v32, 0.0  ;;  %v4357_v29 = vmax.f32 %v13078_v45, 0.0  ;;  %v4358_v39 = vmax.f32 %v13080_v5, 0.0 }
 0x35f   : > { %4377 = vst.msk [vmem:[#allocation3 + $0x50] sm:$0xff] %vm171_vm1, %v4344_v4  ;;  %4378 = vst.msk [vmem:[#allocation3 + $0x58] sm:$0xff] %vm171_vm1, %v4345_v23  ;;  %v4359_v28 = vmax.f32 %v13082_v62, 0.0  ;;  %v4360_v33 = vmax.f32 %v13084_v43, 0.0  ;;  %v4361_v50 = vmax.f32 %v13086_v20, 0.0  ;;  %v4362_v12 = vmax.f32 %v13088_v2, 0.0 }
 0x360   : > { %4379 = vst.msk [vmem:[#allocation3 + $0x60] sm:$0xff] %vm171_vm1, %v4346_v48  ;;  %4380 = vst.msk [vmem:[#allocation3 + $0x68] sm:$0xff] %vm171_vm1, %v4347_v18  ;;  %v4363_v38 = vmax.f32 %v13090_v47, 0.0  ;;  %v4364_v35 = vmax.f32 %v13092_v16, 0.0  ;;  %v4365_v44 = vmax.f32 %v13094_v14, 0.0  ;;  %v4367_v41 = vmax.f32 %v13096_v55, 0.0 }
 0x361   : > { %4381 = vst.msk [vmem:[#allocation3 + $0x70] sm:$0xff] %vm171_vm1, %v4348_v61  ;;  %4382 = vst.msk [vmem:[#allocation3 + $0x78] sm:$0xff] %vm171_vm1, %v4349_v31  ;;  %v13143_v42 = vsel %vm419_vm2, %v4529_v11, %v4545_v53  ;;  %v13151_v1 = vsel %vm419_vm2, %v4545_v53, %v4529_v11  ;;  %v4497_v9 = vsel %vm250_vm4, %v12930_v51, 0.0  ;;  %v13290_v48 = vld [vmem:[%s14925_s2 + $0xc] sm:$0xf] }
 0x362   : > { %4383 = vst.msk [vmem:[#allocation3 + $0x80] sm:$0xff] %vm171_vm1, %v4350_v46  ;;  %4384 = vst.msk [vmem:[#allocation3 + $0x88] sm:$0xff] %vm171_vm1, %v4351_v58  ;;  %v13157_v15 = vld [vmem:[#allocation3 + $0x10] sm:$0xff]  ;;  %v13159_v25 = vld [vmem:[#allocation3 + $0x18] sm:$0xff] }
 0x363   : > { %4385 = vst.msk [vmem:[#allocation3 + $0x90] sm:$0xff] %vm171_vm1, %v4352_v0  ;;  %4386 = vst.msk [vmem:[#allocation3 + $0x98] sm:$0xff] %vm171_vm1, %v4353_v36  ;;  %10295 = vmatprep.mubr.msk.f32.mxu1 %vm171_vm1, %v13157_v15  ;;  %v13165_v22 = vld [vmem:[#allocation3 + $0x20] sm:$0xff]  ;;  %v13169_v13 = vld [vmem:[#allocation3 + $0x28] sm:$0xff]  ;;  %v4434_v8 = vrot.slane %v13157_v15, 7  ;;  %v4450_v49 = vrot.slane %v13159_v25, 7 }
 0x364   : > { %4387 = vst.msk [vmem:[#allocation3 + $0xa0] sm:$0xff] %vm171_vm1, %v4354_v30  ;;  %4388 = vst.msk [vmem:[#allocation3 + $0xa8] sm:$0xff] %vm171_vm1, %v4355_v40  ;;  %10296 = vmatmul.mubr.msk.f32.gmra.mrb[2].mxu1 %vm171_vm1, %v13159_v25  ;;  %v13173_v11 = vld [vmem:[#allocation3 + $0x30] sm:$0xff]  ;;  %v13177_v53 = vld [vmem:[#allocation3 + $0x38] sm:$0xff]  ;;  %v4435_v57 = vrot.slane %v13165_v22, 7  ;;  %v4451_v4 = vrot.slane %v13169_v13, 7 }
 0x365   : > { %4389 = vst.msk [vmem:[#allocation3 + $0xb0] sm:$0xff] %vm171_vm1, %v4356_v19  ;;  %4390 = vst.msk [vmem:[#allocation3 + $0xb8] sm:$0xff] %vm171_vm1, %v4357_v29  ;;  %10298 = vmatprep.mubr.msk.f32.mxu1 %vm171_vm1, %v13165_v22  ;;  %v13181_v24 = vld [vmem:[#allocation3 + $0x40] sm:$0xff]  ;;  %v13185_v60 = vld [vmem:[#allocation3 + $0x48] sm:$0xff]  ;;  %v4482_v23 = vsel %vm318_vm3, %v4450_v49, %v4434_v8  ;;  %v4436_v18 = vrot.slane %v13173_v11, 7  ;;  %v4452_v61 = vrot.slane %v13177_v53, 7 }
 0x366   : > { %4391 = vst.msk [vmem:[#allocation3 + $0xc0] sm:$0xff] %vm171_vm1, %v4358_v39  ;;  %4392 = vst.msk [vmem:[#allocation3 + $0xc8] sm:$0xff] %vm171_vm1, %v4359_v28  ;;  %v13189_v63 = vld [vmem:[#allocation3 + $0x50] sm:$0xff]  ;;  %v13193_v27 = vld [vmem:[#allocation3 + $0x58] sm:$0xff]  ;;  %v13296_v51 = vsel %vm250_vm4, %v4482_v23, 0.0  ;;  %v4483_v31 = vsel %vm318_vm3, %v4451_v4, %v4435_v57  ;;  %v4453_v58 = vrot.slane %v13185_v60, 7  ;;  %v13326_v36 = vsel %vm318_vm3, %v4435_v57, %v4451_v4 }
 0x367   : > { %4393 = vst.msk [vmem:[#allocation3 + $0xd0] sm:$0xff] %vm171_vm1, %v4360_v33  ;;  %4394 = vst.msk [vmem:[#allocation3 + $0xd8] sm:$0xff] %vm171_vm1, %v4361_v50  ;;  %v13197_v3 = vld [vmem:[#allocation3 + $0x60] sm:$0xff]  ;;  %v13201_v17 = vld [vmem:[#allocation3 + $0x68] sm:$0xff]  ;;  %v13316_v46 = vsel %vm250_vm4, %v4483_v31, 0.0  ;;  %v4484_v0 = vsel %vm318_vm3, %v4452_v61, %v4436_v18  ;;  %v4438_v40 = vrot.slane %v13189_v63, 7  ;;  %v13342_v39 = vsel %vm318_vm3, %v4436_v18, %v4452_v61 }
 0x368   : > { %4395 = vst.msk [vmem:[#allocation3 + $0xe0] sm:$0xff] %vm171_vm1, %v4362_v12  ;;  %4396 = vst.msk [vmem:[#allocation3 + $0xe8] sm:$0xff] %vm171_vm1, %v4363_v38  ;;  %10299 = vmatmul.mubr.msk.f32.gmra.mrb[4].mxu1 %vm171_vm1, %v13169_v13  ;;  %v13205_v6 = vld [vmem:[#allocation3 + $0x70] sm:$0xff]  ;;  %v13209_v34 = vld [vmem:[#allocation3 + $0x78] sm:$0xff]  ;;  %v13332_v30 = vsel %vm250_vm4, %v4484_v0, 0.0  ;;  %v4454_v19 = vrot.slane %v13193_v27, 7 }
 0x369   : > { %4397 = vst.msk [vmem:[#allocation3 + $0xf0] sm:$0xff] %vm171_vm1, %v4364_v35  ;;  %4398 = vst.msk [vmem:[#allocation3 + $0xf8] sm:$0xff] %vm171_vm1, %v4365_v44  ;;  %10301 = vmatprep.mubr.msk.f32.mxu1 %vm171_vm1, %v13173_v11  ;;  %v13213_v54 = vld [vmem:[#allocation3 + $0x80] sm:$0xff]  ;;  %v13217_v32 = vld [vmem:[#allocation3 + $0x88] sm:$0xff]  ;;  %v4439_v33 = vrot.slane %v13197_v3, 7  ;;  %v4455_v50 = vrot.slane %v13201_v17, 7 }
 0x36a   : > { %4400 = vst.msk [vmem:[#allocation3 + $0x108] sm:$0xff] %vm171_vm1, %v4367_v41  ;;  %15063 = vst [vmem:[#allocation7_spill] sm:$0xff] %v13169_v13  ;;  %v13221_v45 = vld [vmem:[#allocation3 + $0x90] sm:$0xff]  ;;  %v13225_v5 = vld [vmem:[#allocation3 + $0x98] sm:$0xff]  ;;  %v4486_v12 = vsel %vm318_vm3, %v4454_v19, %v4438_v40  ;;  %v4440_v44 = vrot.slane %v13205_v6, 7  ;;  %v4456_v41 = vrot.slane %v13209_v34, 7 }
 0x36b   : > { %v13229_v62 = vld [vmem:[#allocation3 + $0xa0] sm:$0xff]  ;;  %v13233_v43 = vld [vmem:[#allocation3 + $0xa8] sm:$0xff]  ;;  %v13364_v35 = vsel %vm250_vm4, %v4486_v12, 0.0  ;;  %v4441_v57 = vrot.slane %v13213_v54, 7  ;;  %v4457_v4 = vrot.slane %v13217_v32, 7  ;;  %v13390_v18 = vsel %vm318_vm3, %v4439_v33, %v4455_v50 }
 0x36c   : > { %10302 = vmatmul.mubr.msk.f32.gmra.mrb[6].mxu1 %vm171_vm1, %v13177_v53  ;;  %v13237_v20 = vld [vmem:[#allocation3 + $0xb0] sm:$0xff]  ;;  %v13241_v2 = vld [vmem:[#allocation3 + $0xb8] sm:$0xff]  ;;  %v4488_v23 = vsel %vm318_vm3, %v4456_v41, %v4440_v44  ;;  %v4442_v31 = vrot.slane %v13221_v45, 7  ;;  %v13406_v0 = vsel %vm318_vm3, %v4440_v44, %v4456_v41 }
 0x36d   : > { %10304 = vmatprep.mubr.msk.f32.mxu1 %vm171_vm1, %v13181_v24  ;;  %v13245_v47 = vld [vmem:[#allocation3 + $0xc0] sm:$0xff]  ;;  %v13249_v16 = vld [vmem:[#allocation3 + $0xc8] sm:$0xff]  ;;  %v13396_v61 = vsel %vm250_vm4, %v4488_v23, 0.0  ;;  %v4444_v44 = vrot.slane %v13237_v20, 7  ;;  %v4460_v41 = vrot.slane %v13241_v2, 7 }
 0x36e   : > { %v13253_v14 = vld [vmem:[#allocation3 + $0xd0] sm:$0xff]  ;;  %v13257_v55 = vld [vmem:[#allocation3 + $0xd8] sm:$0xff]  ;;  %v4445_v23 = vrot.slane %v13245_v47, 7 }
 0x36f   : > { %v13261_v37 = vld [vmem:[#allocation3 + $0xe0] sm:$0xff]  ;;  %v13265_v26 = vld [vmem:[#allocation3 + $0xe8] sm:$0xff] }
 0x370   : > { %10305 = vmatmul.mubr.msk.f32.gmra.mrb[8].mxu1 %vm171_vm1, %v13185_v60  ;;  %v13269_v21 = vld [vmem:[#allocation3 + $0xf0] sm:$0xff]  ;;  %v13278_v59 = vld [vmem:[#allocation3 + $0xf8] sm:$0xff] }
 0x371   : > { %10307 = vmatprep.mubr.msk.f32.mxu1 %vm171_vm1, %v13189_v63 }
 0x374   : > { %10308 = vmatmul.mubr.msk.f32.gmra.mrb[10].mxu1 %vm171_vm1, %v13193_v27 }
 0x375   : > { %10310 = vmatprep.mubr.msk.f32.mxu1 %vm171_vm1, %v13197_v3 }
 0x378   : > { %10311 = vmatmul.mubr.msk.f32.gmra.mrb[12].mxu1 %vm171_vm1, %v13201_v17 }
 0x379   : > { %10313 = vmatprep.mubr.msk.f32.mxu1 %vm171_vm1, %v13205_v6 }
 0x37c   : > { %10314 = vmatmul.mubr.msk.f32.gmra.mrb[14].mxu1 %vm171_vm1, %v13209_v34 }
 0x37d   : > { %10316 = vmatprep.mubr.msk.f32.mxu1 %vm171_vm1, %v13213_v54 }
 0x380   : > { %10317 = vmatmul.mubr.msk.f32.gmra.mrb[16].mxu1 %vm171_vm1, %v13217_v32 }
 0x381   : > { %10319 = vmatprep.mubr.msk.f32.mxu1 %vm171_vm1, %v13221_v45 }
 0x384   : > { %10320 = vmatmul.mubr.msk.f32.gmra.mrb[18].mxu1 %vm171_vm1, %v13225_v5 }
 0x385   : > { %10322 = vmatprep.mubr.msk.f32.mxu1 %vm171_vm1, %v13229_v62 }
 0x388   : > { %10323 = vmatmul.mubr.msk.f32.gmra.mrb[20].mxu1 %vm171_vm1, %v13233_v43 }
 0x389   : > { %10325 = vmatprep.mubr.msk.f32.mxu1 %vm171_vm1, %v13237_v20 }
 0x38c   : > { %10326 = vmatmul.mubr.msk.f32.gmra.mrb[22].mxu1 %vm171_vm1, %v13241_v2 }
 0x38d   : > { %10328 = vmatprep.mubr.msk.f32.mxu1 %vm171_vm1, %v13245_v47 }
 0x390   : > { %10329 = vmatmul.mubr.msk.f32.gmra.mrb[24].mxu1 %vm171_vm1, %v13249_v16 }
 0x391   : > { %10331 = vmatprep.mubr.msk.f32.mxu1 %vm171_vm1, %v13253_v14 }
 0x394   : > { %10332 = vmatmul.mubr.msk.f32.gmra.mrb[26].mxu1 %vm171_vm1, %v13257_v55 }
 0x395   : > { %10334 = vmatprep.mubr.msk.f32.mxu1 %vm171_vm1, %v13261_v37 }
 0x398   : > { %10335 = vmatmul.mubr.msk.f32.gmra.mrb[28].mxu1 %vm171_vm1, %v13265_v26 }
 0x399   : > { %10337 = vmatprep.mubr.msk.f32.mxu1 %vm171_vm1, %v13269_v21 }
 0x39c   : > { %10338 = vmatmul.mubr.msk.f32.gmra.mrb[30].mxu1 %vm171_vm1, %v13278_v59 }
 0x39d   : > { %10342 = vmatprep.mubr.msk.f32.mxu1 %vm171_vm1, %v4497_v9 }
 0x3a0   : > { %10343 = vmatmul.mubr.msk.f32.vlgmr.msra.gmra.mrb[0].mxu1 %vm171_vm1, %v12944_v52  ;;  %v13310_v52 = vsel %vm318_vm3, %v4434_v8, %v4450_v49  ;;  %v4487_v8 = vsel %vm318_vm3, %v4455_v50, %v4439_v33  ;;  %v13374_v49 = vsel %vm318_vm3, %v4438_v40, %v4454_v19  ;;  %v4443_v19 = vrot.slane %v13229_v62, 7 }
 0x3a1   : > { %10391 = vmatpush3.msk.msra.mxu1 %vm587_vm0, %v12940_v56  ;;  %10345 = vmatprep.mubr.msk.f32.mxu1 %vm171_vm1, %v13296_v51  ;;  %v4437_v56 = vrot.slane %v13181_v24, 7  ;;  %v13380_v9 = vsel %vm250_vm4, %v4487_v8, 0.0  ;;  %v13422_v50 = vsel %vm318_vm3, %v4441_v57, %v4457_v4 }
 0x3a2   : > { %10440 = vmatprep.subr.msk.mxu1 %vm587_vm0, %v13290_v48 }
 0x3a3   : > { %v4485_v29 = vsel %vm318_vm3, %v4453_v58, %v4437_v56  ;;  %v13358_v38 = vsel %vm318_vm3, %v4437_v56, %v4453_v58  ;;  %v4458_v56 = vrot.slane %v13225_v5, 7  ;;  %v4489_v58 = vsel %vm318_vm3, %v4457_v4, %v4441_v57 }
 0x3a4   : > { %10346 = vmatmul.mubr.msk.f32.gmra.mrb[2].mxu1 %vm171_vm1, %v13310_v52  ;;  %v13348_v28 = vsel %vm250_vm4, %v4485_v29, 0.0  ;;  %v13412_v40 = vsel %vm250_vm4, %v4489_v58, 0.0  ;;  %v4459_v29 = vrot.slane %v13233_v43, 7  ;;  %v4461_v58 = vrot.slane %v13249_v16, 7 }
 0x3a5   : > { %10348 = vmatprep.mubr.msk.f32.mxu1 %vm171_vm1, %v13316_v46  ;;  %v4490_v33 = vsel %vm318_vm3, %v4458_v56, %v4442_v31  ;;  %v13438_v57 = vsel %vm318_vm3, %v4442_v31, %v4458_v56 }
 0x3a6   : > { %v13428_v12 = vsel %vm250_vm4, %v4490_v33, 0.0  ;;  %v4491_v8 = vsel %vm318_vm3, %v4459_v29, %v4443_v19  ;;  %15064 = vst [vmem:[#allocation8_spill] sm:$0xff] %v13438_v57  ;;  %v4492_v33 = vsel %vm318_vm3, %v4460_v41, %v4444_v44  ;;  %v13454_v31 = vsel %vm318_vm3, %v4443_v19, %v4459_v29 }
 0x3a7   : > { %v13444_v4 = vsel %vm250_vm4, %v4491_v8, 0.0  ;;  %15066 = vst [vmem:[#allocation10_spill] sm:$0xff] %v13454_v31  ;;  %v13460_v56 = vsel %vm250_vm4, %v4492_v33, 0.0  ;;  %v4446_v8 = vrot.slane %v13253_v14, 7  ;;  %v13470_v19 = vsel %vm318_vm3, %v4444_v44, %v4460_v41 }
 0x3a8   : > { %10349 = vmatmul.mubr.msk.f32.gmra.mrb[4].mxu1 %vm171_vm1, %v13326_v36  ;;  %15065 = vst [vmem:[#allocation9_spill] sm:$0xff] %v13444_v4  ;;  %15067 = vst [vmem:[#allocation11_spill] sm:$0xff] %v13460_v56  ;;  %v4447_v33 = vrot.slane %v13261_v37, 7  ;;  %v13486_v44 = vsel %vm318_vm3, %v4445_v23, %v4461_v58 }
 0x3a9   : > { %10351 = vmatprep.mubr.msk.f32.mxu1 %vm171_vm1, %v13332_v30  ;;  %15068 = vst [vmem:[#allocation12_spill] sm:$0xff] %v13470_v19 }
 0x3ac   : > { %10352 = vmatmul.mubr.msk.f32.gmra.mrb[6].mxu1 %vm171_vm1, %v13342_v39 }
 0x3ad   : > { %10354 = vmatprep.mubr.msk.f32.mxu1 %vm171_vm1, %v13348_v28 }
 0x3b0   : > { %10355 = vmatmul.mubr.msk.f32.gmra.mrb[8].mxu1 %vm171_vm1, %v13358_v38 }
 0x3b1   : > { %10357 = vmatprep.mubr.msk.f32.mxu1 %vm171_vm1, %v13364_v35 }
 0x3b4   : > { %10358 = vmatmul.mubr.msk.f32.gmra.mrb[10].mxu1 %vm171_vm1, %v13374_v49 }
 0x3b5   : > { %10360 = vmatprep.mubr.msk.f32.mxu1 %vm171_vm1, %v13380_v9 }
 0x3b8   : > { %10361 = vmatmul.mubr.msk.f32.gmra.mrb[12].mxu1 %vm171_vm1, %v13390_v18 }
 0x3b9   : > { %10363 = vmatprep.mubr.msk.f32.mxu1 %vm171_vm1, %v13396_v61 }
 0x3bc   : > { %10364 = vmatmul.mubr.msk.f32.gmra.mrb[14].mxu1 %vm171_vm1, %v13406_v0 }
 0x3bd   : > { %10366 = vmatprep.mubr.msk.f32.mxu1 %vm171_vm1, %v13412_v40 }
 0x3c0   : > { %10367 = vmatmul.mubr.msk.f32.gmra.mrb[16].mxu1 %vm171_vm1, %v13422_v50 }
 0x3c1   : > { %10369 = vmatprep.mubr.msk.f32.mxu1 %vm171_vm1, %v13428_v12 }
 0x3c4   : > { %10370 = vmatmul.mubr.msk.f32.gmra.mrb[18].mxu1 %vm171_vm1, %v13438_v57  ;;  %v4462_v57 = vrot.slane %v13257_v55, 7 }
 0x3c5   : > { %10372 = vmatprep.mubr.msk.f32.mxu1 %vm171_vm1, %v13444_v4  ;;  %v4493_v4 = vsel %vm318_vm3, %v4461_v58, %v4445_v23 }
 0x3c6   : > { %v13476_v29 = vsel %vm250_vm4, %v4493_v4, 0.0  ;;  %v4448_v4 = vrot.slane %v13269_v21, 7  ;;  %v13502_v23 = vsel %vm318_vm3, %v4446_v8, %v4462_v57 }
 0x3c7   : > { %15069 = vst [vmem:[#allocation13_spill] sm:$0xff] %v13476_v29 }
 0x3c8   : > { %10373 = vmatmul.mubr.msk.f32.gmra.mrb[20].mxu1 %vm171_vm1, %v13454_v31  ;;  %v4463_v31 = vrot.slane %v13265_v26, 7 }
 0x3c9   : > { %10375 = vmatprep.mubr.msk.f32.mxu1 %vm171_vm1, %v13460_v56  ;;  %v4494_v56 = vsel %vm318_vm3, %v4462_v57, %v4446_v8 }
 0x3ca   : > { %v13492_v41 = vsel %vm250_vm4, %v4494_v56, 0.0 }
 0x3cb   : > { %15070 = vst [vmem:[#allocation4_spill] sm:$0xff] %v13492_v41 }
 0x3cc   : > { %10376 = vmatmul.mubr.msk.f32.gmra.mrb[22].mxu1 %vm171_vm1, %v13470_v19  ;;  %v4464_v19 = vrot.slane %v13278_v59, 7 }
 0x3cd   : > { %10378 = vmatprep.mubr.msk.f32.mxu1 %vm171_vm1, %v13476_v29  ;;  %v4495_v29 = vsel %vm318_vm3, %v4463_v31, %v4447_v33 }
 0x3ce   : > { %v13508_v58 = vsel %vm250_vm4, %v4495_v29, 0.0  ;;  %v4496_v56 = vsel %vm318_vm3, %v4464_v19, %v4448_v4  ;;  %v13528_v8 = vsel %vm318_vm3, %v4448_v4, %v4464_v19  ;;  %v4530_v29 = vrot.slane %v13157_v15, 1 }
 0x3cf   : > { %15071 = vst [vmem:[#allocation5_spill] sm:$0xff] %v13508_v58  ;;  %v13522_v57 = vsel %vm250_vm4, %v4496_v56, 0.0  ;;  %v4531_v19 = vrot.slane %v13165_v22, 1  ;;  %v4547_v4 = vrot.slane %v13169_v13, 1  ;;  %v4548_v13 = vrot.slane %v13177_v53, 1 }
 0x3d0   : > { %10379 = vmatmul.mubr.msk.f32.gmra.mrb[24].mxu1 %vm171_vm1, %v13486_v44 }
 0x3d1   : > { %10381 = vmatprep.mubr.msk.f32.mxu1 %vm171_vm1, %v13492_v41  ;;  %v13516_v41 = vsel %vm318_vm3, %v4447_v33, %v4463_v31  ;;  %v4594_v31 = vsel %vm253_vm5, %v13151_v1, 0.0  ;;  %v13542_v33 = vld [vmem:[%s14925_s2 + $0x10] sm:$0xf] }
 0x3d4   : > { %10382 = vmatmul.mubr.msk.f32.gmra.mrb[26].mxu1 %vm171_vm1, %v13502_v23 }
 0x3d5   : > { %10384 = vmatprep.mubr.msk.f32.mxu1 %vm171_vm1, %v13508_v58  ;;  %v4546_v58 = vrot.slane %v13159_v25, 1 }
 0x3d7   : > { %v13549_v56 = vsel %vm419_vm2, %v4530_v29, %v4546_v58 }
 0x3d8   : > { %10385 = vmatmul.mubr.msk.f32.gmra.mrb[28].mxu1 %vm171_vm1, %v13516_v41  ;;  %15072 = vst [vmem:[#allocation6_spill] sm:$0xff] %v13549_v56 }
 0x3d9   : > { %10387 = vmatprep.mubr.msk.f32.mxu1 %vm171_vm1, %v13522_v57 }
 0x3dc   : > { %10388 = vmatmul.mubr.msk.f32.gmra.mrb[30].mxu1 %vm171_vm1, %v13528_v8 }
 0x3dd   : > { %10392 = vmatprep.mubr.msk.f32.mxu1 %vm171_vm1, %v13143_v42  ;;  %v4578_v42 = vsel %vm419_vm2, %v4546_v58, %v4530_v29  ;;  %v4579_v58 = vsel %vm419_vm2, %v4547_v4, %v4531_v19 }
 0x3de   : > { %v13561_v1 = vsel %vm253_vm5, %v4578_v42, 0.0  ;;  %v13577_v29 = vsel %vm253_vm5, %v4579_v58, 0.0  ;;  %v4533_v42 = vrot.slane %v13181_v24, 1  ;;  %v4534_v58 = vrot.slane %v13189_v63, 1 }
 0x3df   : > { %15073 = vst [vmem:[#allocation14_spill] sm:$0xff] %v13561_v1  ;;  %15075 = vst [vmem:[#allocation16_spill] sm:$0xff] %v13577_v29 }
 0x3e0   : > { %10393 = vmatmul.mubr.msk.f32.vlgmr.msra.gmra.mrb[0].mxu1 %vm171_vm1, %v4594_v31  ;;  %v4532_v31 = vrot.slane %v13173_v11, 1 }
 0x3e1   : > { %10441 = vmatpush3.msk.msra.mxu1 %vm587_vm0, %v13290_v48  ;;  %10395 = vmatprep.mubr.msk.f32.mxu1 %vm171_vm1, %v13549_v56  ;;  %v13569_v48 = vsel %vm419_vm2, %v4531_v19, %v4547_v4  ;;  %v4549_v56 = vrot.slane %v13185_v60, 1 }
 0x3e2   : > { %10490 = vmatprep.subr.msk.mxu1 %vm587_vm0, %v13542_v33  ;;  %15074 = vst [vmem:[#allocation15_spill] sm:$0xff] %v13569_v48  ;;  %v4580_v19 = vsel %vm419_vm2, %v4548_v13, %v4532_v31 }
 0x3e3   : > { %v13593_v4 = vsel %vm253_vm5, %v4580_v19, 0.0  ;;  %v4535_v19 = vrot.slane %v13197_v3, 1 }
 0x3e4   : > { %10396 = vmatmul.mubr.msk.f32.gmra.mrb[2].mxu1 %vm171_vm1, %v13561_v1  ;;  %v13585_v1 = vsel %vm419_vm2, %v4532_v31, %v4548_v13  ;;  %15077 = vst [vmem:[#allocation18_spill] sm:$0xff] %v13593_v4  ;;  %v4581_v13 = vsel %vm419_vm2, %v4549_v56, %v4533_v42 }
 0x3e5   : > { %10398 = vmatprep.mubr.msk.f32.mxu1 %vm171_vm1, %v13569_v48  ;;  %15076 = vst [vmem:[#allocation17_spill] sm:$0xff] %v13585_v1  ;;  %v4550_v48 = vrot.slane %v13193_v27, 1  ;;  %v13609_v31 = vsel %vm253_vm5, %v4581_v13, 0.0  ;;  %v4536_v13 = vrot.slane %v13205_v6, 1 }
 0x3e6   : > { %15079 = vst [vmem:[#allocation20_spill] sm:$0xff] %v13609_v31 }
 0x3e8   : > { %10399 = vmatmul.mubr.msk.f32.gmra.mrb[4].mxu1 %vm171_vm1, %v13577_v29  ;;  %v13601_v29 = vsel %vm419_vm2, %v4533_v42, %v4549_v56  ;;  %v4582_v56 = vsel %vm419_vm2, %v4550_v48, %v4534_v58 }
 0x3e9   : > { %10401 = vmatprep.mubr.msk.f32.mxu1 %vm171_vm1, %v13585_v1  ;;  %15078 = vst [vmem:[#allocation19_spill] sm:$0xff] %v13601_v29  ;;  %v4551_v1 = vrot.slane %v13201_v17, 1  ;;  %v13625_v42 = vsel %vm253_vm5, %v4582_v56, 0.0  ;;  %v4537_v56 = vrot.slane %v13213_v54, 1 }
 0x3ea   : > { %15081 = vst [vmem:[#allocation22_spill] sm:$0xff] %v13625_v42 }
 0x3ec   : > { %10402 = vmatmul.mubr.msk.f32.gmra.mrb[6].mxu1 %vm171_vm1, %v13593_v4  ;;  %v13617_v4 = vsel %vm419_vm2, %v4534_v58, %v4550_v48  ;;  %v4583_v48 = vsel %vm419_vm2, %v4551_v1, %v4535_v19 }
 0x3ed   : > { %10404 = vmatprep.mubr.msk.f32.mxu1 %vm171_vm1, %v13601_v29  ;;  %15080 = vst [vmem:[#allocation21_spill] sm:$0xff] %v13617_v4  ;;  %v4552_v29 = vrot.slane %v13209_v34, 1  ;;  %v13641_v58 = vsel %vm253_vm5, %v4583_v48, 0.0  ;;  %v4538_v48 = vrot.slane %v13221_v45, 1 }
 0x3ee   : > { %15083 = vst [vmem:[#allocation24_spill] sm:$0xff] %v13641_v58 }
 0x3f0   : > { %10405 = vmatmul.mubr.msk.f32.gmra.mrb[8].mxu1 %vm171_vm1, %v13609_v31  ;;  %v13633_v31 = vsel %vm419_vm2, %v4535_v19, %v4551_v1  ;;  %v4584_v1 = vsel %vm419_vm2, %v4552_v29, %v4536_v13 }
 0x3f1   : > { %10407 = vmatprep.mubr.msk.f32.mxu1 %vm171_vm1, %v13617_v4  ;;  %15082 = vst [vmem:[#allocation23_spill] sm:$0xff] %v13633_v31  ;;  %v4553_v4 = vrot.slane %v13217_v32, 1  ;;  %v13657_v19 = vsel %vm253_vm5, %v4584_v1, 0.0  ;;  %v4539_v1 = vrot.slane %v13229_v62, 1 }
 0x3f2   : > { %15085 = vst [vmem:[#allocation26_spill] sm:$0xff] %v13657_v19 }
 0x3f4   : > { %10408 = vmatmul.mubr.msk.f32.gmra.mrb[10].mxu1 %vm171_vm1, %v13625_v42  ;;  %v13649_v42 = vsel %vm419_vm2, %v4536_v13, %v4552_v29  ;;  %v4585_v29 = vsel %vm419_vm2, %v4553_v4, %v4537_v56 }
 0x3f5   : > { %10410 = vmatprep.mubr.msk.f32.mxu1 %vm171_vm1, %v13633_v31  ;;  %15084 = vst [vmem:[#allocation25_spill] sm:$0xff] %v13649_v42  ;;  %v4554_v31 = vrot.slane %v13225_v5, 1  ;;  %v13673_v13 = vsel %vm253_vm5, %v4585_v29, 0.0  ;;  %v4540_v29 = vrot.slane %v13237_v20, 1 }
 0x3f6   : > { %15087 = vst [vmem:[#allocation28_spill] sm:$0xff] %v13673_v13 }
 0x3f8   : > { %10411 = vmatmul.mubr.msk.f32.gmra.mrb[12].mxu1 %vm171_vm1, %v13641_v58  ;;  %v13665_v58 = vsel %vm419_vm2, %v4537_v56, %v4553_v4  ;;  %v4586_v4 = vsel %vm419_vm2, %v4554_v31, %v4538_v48 }
 0x3f9   : > { %10413 = vmatprep.mubr.msk.f32.mxu1 %vm171_vm1, %v13649_v42  ;;  %15086 = vst [vmem:[#allocation27_spill] sm:$0xff] %v13665_v58  ;;  %v4555_v42 = vrot.slane %v13233_v43, 1  ;;  %v13689_v56 = vsel %vm253_vm5, %v4586_v4, 0.0  ;;  %v4541_v4 = vrot.slane %v13245_v47, 1 }
 0x3fa   : > { %15089 = vst [vmem:[#allocation30_spill] sm:$0xff] %v13689_v56 }
 0x3fc   : > { %10414 = vmatmul.mubr.msk.f32.gmra.mrb[14].mxu1 %vm171_vm1, %v13657_v19  ;;  %v13681_v19 = vsel %vm419_vm2, %v4538_v48, %v4554_v31  ;;  %v4587_v31 = vsel %vm419_vm2, %v4555_v42, %v4539_v1 }
 0x3fd   : > { %10416 = vmatprep.mubr.msk.f32.mxu1 %vm171_vm1, %v13665_v58  ;;  %15088 = vst [vmem:[#allocation29_spill] sm:$0xff] %v13681_v19  ;;  %v4556_v58 = vrot.slane %v13241_v2, 1  ;;  %v13705_v48 = vsel %vm253_vm5, %v4587_v31, 0.0  ;;  %v4542_v31 = vrot.slane %v13253_v14, 1 }
 0x3fe   : > { %15091 = vst [vmem:[#allocation32_spill] sm:$0xff] %v13705_v48 }
 0x400   : > { %10417 = vmatmul.mubr.msk.f32.gmra.mrb[16].mxu1 %vm171_vm1, %v13673_v13  ;;  %v13697_v13 = vsel %vm419_vm2, %v4539_v1, %v4555_v42  ;;  %v4588_v42 = vsel %vm419_vm2, %v4556_v58, %v4540_v29 }
 0x401   : > { %10419 = vmatprep.mubr.msk.f32.mxu1 %vm171_vm1, %v13681_v19  ;;  %15090 = vst [vmem:[#allocation31_spill] sm:$0xff] %v13697_v13  ;;  %v4557_v19 = vrot.slane %v13249_v16, 1  ;;  %v13721_v1 = vsel %vm253_vm5, %v4588_v42, 0.0  ;;  %v4543_v42 = vrot.slane %v13261_v37, 1 }
 0x402   : > { %15093 = vst [vmem:[#allocation34_spill] sm:$0xff] %v13721_v1 }
 0x404   : > { %10420 = vmatmul.mubr.msk.f32.gmra.mrb[18].mxu1 %vm171_vm1, %v13689_v56  ;;  %v13713_v56 = vsel %vm419_vm2, %v4540_v29, %v4556_v58  ;;  %v4589_v58 = vsel %vm419_vm2, %v4557_v19, %v4541_v4 }
 0x405   : > { %10422 = vmatprep.mubr.msk.f32.mxu1 %vm171_vm1, %v13697_v13  ;;  %15092 = vst [vmem:[#allocation33_spill] sm:$0xff] %v13713_v56  ;;  %v4558_v13 = vrot.slane %v13257_v55, 1  ;;  %v13737_v29 = vsel %vm253_vm5, %v4589_v58, 0.0  ;;  %v4544_v58 = vrot.slane %v13269_v21, 1 }
 0x406   : > { %15095 = vst [vmem:[#allocation36_spill] sm:$0xff] %v13737_v29 }
 0x408   : > { %10423 = vmatmul.mubr.msk.f32.gmra.mrb[20].mxu1 %vm171_vm1, %v13705_v48  ;;  %v13729_v48 = vsel %vm419_vm2, %v4541_v4, %v4557_v19  ;;  %v4590_v19 = vsel %vm419_vm2, %v4558_v13, %v4542_v31 }
 0x409   : > { %10425 = vmatprep.mubr.msk.f32.mxu1 %vm171_vm1, %v13713_v56  ;;  %15094 = vst [vmem:[#allocation35_spill] sm:$0xff] %v13729_v48  ;;  %v4559_v56 = vrot.slane %v13265_v26, 1  ;;  %v13753_v4 = vsel %vm253_vm5, %v4590_v19, 0.0 }
 0x40a   : > { %15096 = vst [vmem:[#allocation37_spill] sm:$0xff] %v13753_v4 }
 0x40c   : > { %10426 = vmatmul.mubr.msk.f32.gmra.mrb[22].mxu1 %vm171_vm1, %v13721_v1  ;;  %v13745_v1 = vsel %vm419_vm2, %v4542_v31, %v4558_v13  ;;  %v4591_v13 = vsel %vm419_vm2, %v4559_v56, %v4543_v42 }
 0x40d   : > { %10428 = vmatprep.mubr.msk.f32.mxu1 %vm171_vm1, %v13729_v48  ;;  %v4560_v48 = vrot.slane %v13278_v59, 1  ;;  %v13769_v31 = vsel %vm253_vm5, %v4591_v13, 0.0  ;;  %v14033_v13 = vld [vmem:[#allocation3 + $0x48] sm:$0xff] }
 0x40f   : > { %v13775_v19 = vsel %vm419_vm2, %v4544_v58, %v4560_v48 }
 0x410   : > { %10429 = vmatmul.mubr.msk.f32.gmra.mrb[24].mxu1 %vm171_vm1, %v13737_v29  ;;  %v13761_v29 = vsel %vm419_vm2, %v4543_v42, %v4559_v56  ;;  %v9106_v42 = vld [vmem:[%s14925_s2 + $0x14] sm:$0xf] }
 0x411   : > { %10431 = vmatprep.mubr.msk.f32.mxu1 %vm171_vm1, %v13745_v1 }
 0x414   : > { %10432 = vmatmul.mubr.msk.f32.gmra.mrb[26].mxu1 %vm171_vm1, %v13753_v4  ;;  %v4592_v4 = vsel %vm419_vm2, %v4560_v48, %v4544_v58  ;;  %v14031_v58 = vld [vmem:[#allocation3 + $0x40] sm:$0xff] }
 0x415   : > { %10434 = vmatprep.mubr.msk.f32.mxu1 %vm171_vm1, %v13761_v29  ;;  %v13783_v56 = vsel %vm253_vm5, %v4592_v4, 0.0 }
 0x418   : > { %10435 = vmatmul.mubr.msk.f32.gmra.mrb[28].mxu1 %vm171_vm1, %v13769_v31 }
 0x419   : > { %10437 = vmatprep.mubr.msk.f32.mxu1 %vm171_vm1, %v13775_v19 }
 0x41c   : > { %10438 = vmatmul.mubr.msk.f32.gmra.mrb[30].mxu1 %vm171_vm1, %v13783_v56 }
 0x41d   : > { %10442 = vmatprep.mubr.msk.f32.mxu1 %vm171_vm1, %v13296_v51  ;;  %v15097_v51 = vld [vmem:[#allocation8_spill] sm:$0xff] }
 0x420   : > { %10443 = vmatmul.mubr.msk.f32.vlgmr.msra.gmra.mrb[0].mxu1 %vm171_vm1, %v13310_v52  ;;  %v15098_v52 = vld [vmem:[#allocation9_spill] sm:$0xff] }
 0x421   : > { %10491 = vmatpush3.msk.msra.mxu1 %vm587_vm0, %v13542_v33  ;;  %10445 = vmatprep.mubr.msk.f32.mxu1 %vm171_vm1, %v13316_v46  ;;  %v15099_v46 = vld [vmem:[#allocation10_spill] sm:$0xff] }
 0x422   : > { %10540 = vmatprep.subr.msk.mxu1 %vm587_vm0, %v9106_v42 }
 0x424   : > { %10446 = vmatmul.mubr.msk.f32.gmra.mrb[2].mxu1 %vm171_vm1, %v13326_v36  ;;  %v15100_v36 = vld [vmem:[#allocation11_spill] sm:$0xff] }
 0x425   : > { %10448 = vmatprep.mubr.msk.f32.mxu1 %vm171_vm1, %v13332_v30  ;;  %v15101_v30 = vld [vmem:[#allocation12_spill] sm:$0xff] }
 0x428   : > { %10449 = vmatmul.mubr.msk.f32.gmra.mrb[4].mxu1 %vm171_vm1, %v13342_v39  ;;  %v15102_v39 = vld [vmem:[#allocation13_spill] sm:$0xff] }
 0x429   : > { %10451 = vmatprep.mubr.msk.f32.mxu1 %vm171_vm1, %v13348_v28  ;;  %v15103_v28 = vld [vmem:[#allocation4_spill] sm:$0xff] }
 0x42c   : > { %10452 = vmatmul.mubr.msk.f32.gmra.mrb[6].mxu1 %vm171_vm1, %v13358_v38  ;;  %v13843_v38 = vld [vmem:[#allocation3 + $0x100] sm:$0xff] }
 0x42d   : > { %10454 = vmatprep.mubr.msk.f32.mxu1 %vm171_vm1, %v13364_v35  ;;  %v13845_v35 = vld [vmem:[#allocation3 + $0x108] sm:$0xff] }
 0x430   : > { %10455 = vmatmul.mubr.msk.f32.gmra.mrb[8].mxu1 %vm171_vm1, %v13374_v49  ;;  %v15104_v49 = vld [vmem:[#allocation5_spill] sm:$0xff] }
 0x431   : > { %10457 = vmatprep.mubr.msk.f32.mxu1 %vm171_vm1, %v13380_v9  ;;  %v5681_v9 = vrot.slane %v13843_v38, 7 }
 0x434   : > { %10458 = vmatmul.mubr.msk.f32.gmra.mrb[10].mxu1 %vm171_vm1, %v13390_v18  ;;  %v5697_v18 = vrot.slane %v13845_v35, 7 }
 0x435   : > { %10460 = vmatprep.mubr.msk.f32.mxu1 %vm171_vm1, %v13396_v61 }
 0x436   : > { %v5729_v61 = vsel %vm318_vm3, %v5697_v18, %v5681_v9 }
 0x438   : > { %10461 = vmatmul.mubr.msk.f32.gmra.mrb[12].mxu1 %vm171_vm1, %v13406_v0  ;;  %v13863_v0 = vsel %vm250_vm4, %v5729_v61, 0.0  ;;  %v14070_v61 = vld [vmem:[#allocation3 + $0x68] sm:$0xff] }
 0x439   : > { %10463 = vmatprep.mubr.msk.f32.mxu1 %vm171_vm1, %v13412_v40  ;;  %v13869_v40 = vsel %vm318_vm3, %v5681_v9, %v5697_v18  ;;  %v14068_v18 = vld [vmem:[#allocation3 + $0x60] sm:$0xff] }
 0x43c   : > { %10464 = vmatmul.mubr.msk.f32.gmra.mrb[14].mxu1 %vm171_vm1, %v13422_v50  ;;  %v9140_v50 = vld [vmem:[%s14925_s2 + $0x18] sm:$0xf] }
 0x43d   : > { %10466 = vmatprep.mubr.msk.f32.mxu1 %vm171_vm1, %v13428_v12  ;;  %v15105_v12 = vld [vmem:[#allocation7_spill] sm:$0xff] }
 0x440   : > { %10467 = vmatmul.mubr.msk.f32.gmra.mrb[16].mxu1 %vm171_vm1, %v15097_v51  ;;  %v6983_v51 = vrot.slane %v14033_v13, 7 }
 0x441   : > { %10469 = vmatprep.mubr.msk.f32.mxu1 %vm171_vm1, %v15098_v52  ;;  %v14048_v52 = vld [vmem:[#allocation3 + $0x50] sm:$0xff] }
 0x444   : > { %10470 = vmatmul.mubr.msk.f32.gmra.mrb[18].mxu1 %vm171_vm1, %v15099_v46  ;;  %v14050_v46 = vld [vmem:[#allocation3 + $0x58] sm:$0xff] }
 0x445   : > { %10472 = vmatprep.mubr.msk.f32.mxu1 %vm171_vm1, %v15100_v36  ;;  %v6984_v9 = vrot.slane %v14050_v46, 7 }
 0x448   : > { %10473 = vmatmul.mubr.msk.f32.gmra.mrb[20].mxu1 %vm171_vm1, %v15101_v30  ;;  %v14057_v30 = vld [vmem:[%s14925_s2 + $0x20] sm:$0xf] }
 0x449   : > { %10475 = vmatprep.mubr.msk.f32.mxu1 %vm171_vm1, %v15102_v39 }
 0x44c   : > { %10476 = vmatmul.mubr.msk.f32.gmra.mrb[22].mxu1 %vm171_vm1, %v13486_v44  ;;  %v5793_v44 = vrot.slane %v13845_v35, 1 }
 0x44d   : > { %10478 = vmatprep.mubr.msk.f32.mxu1 %vm171_vm1, %v15103_v28 }
 0x450   : > { %10479 = vmatmul.mubr.msk.f32.gmra.mrb[24].mxu1 %vm171_vm1, %v13502_v23 }
 0x451   : > { %10481 = vmatprep.mubr.msk.f32.mxu1 %vm171_vm1, %v15104_v49  ;;  %v6968_v49 = vrot.slane %v14048_v52, 7 }
 0x454   : > { %10482 = vmatmul.mubr.msk.f32.gmra.mrb[26].mxu1 %vm171_vm1, %v13516_v41 }
 0x455   : > { %10484 = vmatprep.mubr.msk.f32.mxu1 %vm171_vm1, %v13522_v57  ;;  %v14013_v57 = vld [vmem:[#allocation3 + $0x30] sm:$0xff] }
 0x458   : > { %10485 = vmatmul.mubr.msk.f32.gmra.mrb[28].mxu1 %vm171_vm1, %v13528_v8  ;;  %v14015_v8 = vld [vmem:[#allocation3 + $0x38] sm:$0xff] }
 0x459   : > { %10487 = vmatprep.mubr.msk.f32.mxu1 %vm171_vm1, %v13863_v0  ;;  %v6982_v4 = vrot.slane %v14015_v8, 7 }
 0x45c   : > { %10488 = vmatmul.mubr.msk.f32.gmra.mrb[30].mxu1 %vm171_vm1, %v13869_v40 }
 0x45d   : > { %10492 = vmatprep.mubr.msk.f32.mxu1 %vm171_vm1, %v13157_v15  ;;  %v15106_v15 = vld [vmem:[#allocation6_spill] sm:$0xff] }
 0x460   : > { %10493 = vmatmul.mubr.msk.f32.vlgmr.msra.gmra.mrb[0].mxu1 %vm171_vm1, %v13159_v25  ;;  %v9174_v25 = vld [vmem:[%s14925_s2 + $0x1c] sm:$0xf] }
 0x461   : > { %10541 = vmatpush3.msk.msra.mxu1 %vm587_vm0, %v9106_v42  ;;  %10495 = vmatprep.mubr.msk.f32.mxu1 %vm171_vm1, %v13165_v22  ;;  %v15107_v22 = vld [vmem:[#allocation14_spill] sm:$0xff]  ;;  %v6967_v42 = vrot.slane %v14031_v58, 7 }
 0x462   : > { %10590 = vmatprep.subr.msk.mxu1 %vm587_vm0, %v9140_v50 }
 0x463   : > { %v7015_v28 = vsel %vm318_vm3, %v6983_v51, %v6967_v42 }
 0x464   : > { %10496 = vmatmul.mubr.msk.f32.gmra.mrb[2].mxu1 %vm171_vm1, %v15105_v12  ;;  %v7033_v12 = vsel %vm250_vm4, %v7015_v28, 0.0 }
 0x465   : > { %10498 = vmatprep.mubr.msk.f32.mxu1 %vm171_vm1, %v13173_v11  ;;  %v15108_v11 = vld [vmem:[#allocation15_spill] sm:$0xff] }
 0x468   : > { %10499 = vmatmul.mubr.msk.f32.gmra.mrb[4].mxu1 %vm171_vm1, %v13177_v53  ;;  %v15109_v53 = vld [vmem:[#allocation16_spill] sm:$0xff] }
 0x469   : > { %10501 = vmatprep.mubr.msk.f32.mxu1 %vm171_vm1, %v13181_v24  ;;  %v15110_v24 = vld [vmem:[#allocation17_spill] sm:$0xff] }
 0x46c   : > { %10502 = vmatmul.mubr.msk.f32.gmra.mrb[6].mxu1 %vm171_vm1, %v13185_v60  ;;  %v15111_v60 = vld [vmem:[#allocation18_spill] sm:$0xff] }
 0x46d   : > { %10504 = vmatprep.mubr.msk.f32.mxu1 %vm171_vm1, %v13189_v63  ;;  %v15112_v63 = vld [vmem:[#allocation19_spill] sm:$0xff] }
 0x470   : > { %10505 = vmatmul.mubr.msk.f32.gmra.mrb[8].mxu1 %vm171_vm1, %v13193_v27  ;;  %v15113_v27 = vld [vmem:[#allocation20_spill] sm:$0xff] }
 0x471   : > { %10507 = vmatprep.mubr.msk.f32.mxu1 %vm171_vm1, %v13197_v3  ;;  %v15114_v3 = vld [vmem:[#allocation21_spill] sm:$0xff] }
 0x474   : > { %10508 = vmatmul.mubr.msk.f32.gmra.mrb[10].mxu1 %vm171_vm1, %v13201_v17  ;;  %v15115_v17 = vld [vmem:[#allocation22_spill] sm:$0xff] }
 0x475   : > { %10510 = vmatprep.mubr.msk.f32.mxu1 %vm171_vm1, %v13205_v6  ;;  %v15116_v6 = vld [vmem:[#allocation23_spill] sm:$0xff] }
 0x478   : > { %10511 = vmatmul.mubr.msk.f32.gmra.mrb[12].mxu1 %vm171_vm1, %v13209_v34  ;;  %v15117_v34 = vld [vmem:[#allocation24_spill] sm:$0xff] }
 0x479   : > { %10513 = vmatprep.mubr.msk.f32.mxu1 %vm171_vm1, %v13213_v54  ;;  %v15118_v54 = vld [vmem:[#allocation25_spill] sm:$0xff] }
 0x47c   : > { %10514 = vmatmul.mubr.msk.f32.gmra.mrb[14].mxu1 %vm171_vm1, %v13217_v32  ;;  %v15119_v32 = vld [vmem:[#allocation26_spill] sm:$0xff] }
 0x47d   : > { %10516 = vmatprep.mubr.msk.f32.mxu1 %vm171_vm1, %v13221_v45  ;;  %v15120_v45 = vld [vmem:[#allocation27_spill] sm:$0xff] }
 0x480   : > { %10517 = vmatmul.mubr.msk.f32.gmra.mrb[16].mxu1 %vm171_vm1, %v13225_v5  ;;  %v15121_v5 = vld [vmem:[#allocation28_spill] sm:$0xff] }
 0x481   : > { %10519 = vmatprep.mubr.msk.f32.mxu1 %vm171_vm1, %v13229_v62  ;;  %v15122_v62 = vld [vmem:[#allocation29_spill] sm:$0xff] }
 0x484   : > { %10520 = vmatmul.mubr.msk.f32.gmra.mrb[18].mxu1 %vm171_vm1, %v13233_v43  ;;  %v15123_v43 = vld [vmem:[#allocation30_spill] sm:$0xff] }
 0x485   : > { %10522 = vmatprep.mubr.msk.f32.mxu1 %vm171_vm1, %v13237_v20  ;;  %v15124_v20 = vld [vmem:[#allocation31_spill] sm:$0xff] }
 0x488   : > { %10523 = vmatmul.mubr.msk.f32.gmra.mrb[20].mxu1 %vm171_vm1, %v13241_v2  ;;  %v15125_v2 = vld [vmem:[#allocation32_spill] sm:$0xff] }
 0x489   : > { %10525 = vmatprep.mubr.msk.f32.mxu1 %vm171_vm1, %v13245_v47  ;;  %v15126_v47 = vld [vmem:[#allocation33_spill] sm:$0xff] }
 0x48c   : > { %10526 = vmatmul.mubr.msk.f32.gmra.mrb[22].mxu1 %vm171_vm1, %v13249_v16  ;;  %v15127_v16 = vld [vmem:[#allocation34_spill] sm:$0xff] }
 0x48d   : > { %10528 = vmatprep.mubr.msk.f32.mxu1 %vm171_vm1, %v13253_v14  ;;  %v15128_v14 = vld [vmem:[#allocation35_spill] sm:$0xff] }
 0x490   : > { %10529 = vmatmul.mubr.msk.f32.gmra.mrb[24].mxu1 %vm171_vm1, %v13257_v55  ;;  %v15129_v55 = vld [vmem:[#allocation36_spill] sm:$0xff] }
 0x491   : > { %10531 = vmatprep.mubr.msk.f32.mxu1 %vm171_vm1, %v13261_v37  ;;  %v15130_v37 = vld [vmem:[#allocation37_spill] sm:$0xff] }
 0x494   : > { %10532 = vmatmul.mubr.msk.f32.gmra.mrb[26].mxu1 %vm171_vm1, %v13265_v26  ;;  %v14001_v26 = vld [vmem:[#allocation3 + $0x20] sm:$0xff] }
 0x495   : > { %10534 = vmatprep.mubr.msk.f32.mxu1 %vm171_vm1, %v13269_v21  ;;  %v14003_v21 = vld [vmem:[#allocation3 + $0x28] sm:$0xff]  ;;  %v6965_v41 = vrot.slane %v14001_v26, 7 }
 0x496   : > { %v6981_v23 = vrot.slane %v14003_v21, 7 }
 0x498   : > { %10535 = vmatmul.mubr.msk.f32.gmra.mrb[28].mxu1 %vm171_vm1, %v13278_v59  ;;  %v5777_v59 = vrot.slane %v13843_v38, 1  ;;  %v6997_v36 = vsel %vm318_vm3, %v6965_v41, %v6981_v23 }
 0x499   : > { %10537 = vmatprep.mubr.msk.f32.mxu1 %vm171_vm1, %v13843_v38 }
 0x49a   : > { %v14021_v33 = vsel %vm419_vm2, %v5777_v59, %v5793_v44  ;;  %v5825_v48 = vsel %vm419_vm2, %v5793_v44, %v5777_v59 }
 0x49c   : > { %10538 = vmatmul.mubr.msk.f32.gmra.mrb[30].mxu1 %vm171_vm1, %v13845_v35 }
 0x49d   : > { %10542 = vmatprep.mubr.msk.f32.mxu1 %vm171_vm1, %v15106_v15  ;;  %v7016_v15 = vsel %vm318_vm3, %v6984_v9, %v6968_v49 }
 0x4a0   : > { %10543 = vmatmul.mubr.msk.f32.vlgmr.msra.gmra.mrb[0].mxu1 %vm171_vm1, %v15107_v22  ;;  %v6985_v22 = vrot.slane %v14070_v61, 7 }
 0x4a1   : > { %10591 = vmatpush3.msk.msra.mxu1 %vm587_vm0, %v9140_v50  ;;  %10545 = vmatprep.mubr.msk.f32.mxu1 %vm171_vm1, %v15108_v11  ;;  %v14084_v11 = vld [vmem:[#allocation3 + $0x70] sm:$0xff] }
 0x4a2   : > { %10640 = vmatprep.subr.msk.mxu1 %vm587_vm0, %v9174_v25 }
 0x4a4   : > { %10546 = vmatmul.mubr.msk.f32.gmra.mrb[2].mxu1 %vm171_vm1, %v15109_v53  ;;  %v14086_v53 = vld [vmem:[#allocation3 + $0x78] sm:$0xff] }
 0x4a5   : > { %10548 = vmatprep.mubr.msk.f32.mxu1 %vm171_vm1, %v15110_v24  ;;  %v6999_v24 = vsel %vm318_vm3, %v6967_v42, %v6983_v51 }
 0x4a8   : > { %10549 = vmatmul.mubr.msk.f32.gmra.mrb[4].mxu1 %vm171_vm1, %v15111_v60  ;;  %v7035_v60 = vsel %vm250_vm4, %v7016_v15, 0.0  ;;  %v14168_v15 = vld [vmem:[#allocation3 + $0xd0] sm:$0xff] }
 0x4a9   : > { %10551 = vmatprep.mubr.msk.f32.mxu1 %vm171_vm1, %v15112_v63 }
 0x4ac   : > { %10552 = vmatmul.mubr.msk.f32.gmra.mrb[6].mxu1 %vm171_vm1, %v15113_v27  ;;  %v6970_v27 = vrot.slane %v14084_v11, 7 }
 0x4ad   : > { %10554 = vmatprep.mubr.msk.f32.mxu1 %vm171_vm1, %v15114_v3  ;;  %v6986_v3 = vrot.slane %v14086_v53, 7 }
 0x4af   : > { %v7002_v59 = vsel %vm318_vm3, %v6970_v27, %v6986_v3 }
 0x4b0   : > { %10555 = vmatmul.mubr.msk.f32.gmra.mrb[8].mxu1 %vm171_vm1, %v15115_v17  ;;  %v14098_v17 = vld [vmem:[#allocation3 + $0x80] sm:$0xff] }
 0x4b1   : > { %10557 = vmatprep.mubr.msk.f32.mxu1 %vm171_vm1, %v15116_v6  ;;  %v14100_v6 = vld [vmem:[#allocation3 + $0x88] sm:$0xff] }
 0x4b4   : > { %10558 = vmatmul.mubr.msk.f32.gmra.mrb[10].mxu1 %vm171_vm1, %v15117_v34  ;;  %v7000_v34 = vsel %vm318_vm3, %v6968_v49, %v6984_v9 }
 0x4b5   : > { %10560 = vmatprep.mubr.msk.f32.mxu1 %vm171_vm1, %v15118_v54 }
 0x4b8   : > { %10561 = vmatmul.mubr.msk.f32.gmra.mrb[12].mxu1 %vm171_vm1, %v15119_v32  ;;  %v7018_v32 = vsel %vm318_vm3, %v6986_v3, %v6970_v27  ;;  %v14182_v3 = vld [vmem:[#allocation3 + $0xe0] sm:$0xff] }
 0x4b9   : > { %10563 = vmatprep.mubr.msk.f32.mxu1 %vm171_vm1, %v15120_v45  ;;  %v6971_v45 = vrot.slane %v14098_v17, 7 }
 0x4bc   : > { %10564 = vmatmul.mubr.msk.f32.gmra.mrb[14].mxu1 %vm171_vm1, %v15121_v5  ;;  %v6987_v5 = vrot.slane %v14100_v6, 7 }
 0x4bd   : > { %10566 = vmatprep.mubr.msk.f32.mxu1 %vm171_vm1, %v15122_v62  ;;  %v14112_v62 = vld [vmem:[#allocation3 + $0x90] sm:$0xff] }
 0x4c0   : > { %10567 = vmatmul.mubr.msk.f32.gmra.mrb[16].mxu1 %vm171_vm1, %v15123_v43  ;;  %v14114_v43 = vld [vmem:[#allocation3 + $0x98] sm:$0xff] }
 0x4c1   : > { %10569 = vmatprep.mubr.msk.f32.mxu1 %vm171_vm1, %v15124_v20 }
 0x4c4   : > { %10570 = vmatmul.mubr.msk.f32.gmra.mrb[18].mxu1 %vm171_vm1, %v15125_v2  ;;  %v7039_v2 = vsel %vm250_vm4, %v7018_v32, 0.0 }
 0x4c5   : > { %10572 = vmatprep.mubr.msk.f32.mxu1 %vm171_vm1, %v15126_v47  ;;  %v7019_v47 = vsel %vm318_vm3, %v6987_v5, %v6971_v45 }
 0x4c6   : > { %v7041_v44 = vsel %vm250_vm4, %v7019_v47, 0.0  ;;  %v14198_v47 = vld [vmem:[#allocation3 + $0xf8] sm:$0xff] }
 0x4c8   : > { %10573 = vmatmul.mubr.msk.f32.gmra.mrb[20].mxu1 %vm171_vm1, %v15127_v16  ;;  %v6972_v16 = vrot.slane %v14112_v62, 7 }
 0x4c9   : > { %10575 = vmatprep.mubr.msk.f32.mxu1 %vm171_vm1, %v15128_v14  ;;  %v6988_v14 = vrot.slane %v14114_v43, 7 }
 0x4cb   : > { %v7004_v28 = vsel %vm318_vm3, %v6972_v16, %v6988_v14 }
 0x4cc   : > { %10576 = vmatmul.mubr.msk.f32.gmra.mrb[22].mxu1 %vm171_vm1, %v15129_v55  ;;  %v14126_v55 = vld [vmem:[#allocation3 + $0xa0] sm:$0xff] }
 0x4cd   : > { %10578 = vmatprep.mubr.msk.f32.mxu1 %vm171_vm1, %v13745_v1  ;;  %v7013_v1 = vsel %vm318_vm3, %v6981_v23, %v6965_v41  ;;  %v7020_v41 = vsel %vm318_vm3, %v6988_v14, %v6972_v16  ;;  %v6973_v23 = vrot.slane %v14126_v55, 7 }
 0x4d0   : > { %10579 = vmatmul.mubr.msk.f32.gmra.mrb[24].mxu1 %vm171_vm1, %v15130_v37  ;;  %v14128_v37 = vld [vmem:[#allocation3 + $0xa8] sm:$0xff] }
 0x4d1   : > { %10581 = vmatprep.mubr.msk.f32.mxu1 %vm171_vm1, %v13761_v29  ;;  %v6966_v29 = vrot.slane %v14013_v57, 7 }
 0x4d3   : > { %v6998_v50 = vsel %vm318_vm3, %v6966_v29, %v6982_v4 }
 0x4d4   : > { %10582 = vmatmul.mubr.msk.f32.gmra.mrb[26].mxu1 %vm171_vm1, %v13769_v31  ;;  %v14037_v31 = vsel %vm253_vm5, %v5825_v48, 0.0  ;;  %v6989_v48 = vrot.slane %v14128_v37, 7 }
 0x4d5   : > { %10584 = vmatprep.mubr.msk.f32.mxu1 %vm171_vm1, %v13775_v19  ;;  %v7029_v19 = vsel %vm250_vm4, %v7013_v1, 0.0  ;;  %v14140_v1 = vld [vmem:[#allocation3 + $0xb0] sm:$0xff] }
 0x4d6   : > { %v6974_v42 = vrot.slane %v14140_v1, 7 }
 0x4d8   : > { %10585 = vmatmul.mubr.msk.f32.gmra.mrb[28].mxu1 %vm171_vm1, %v13783_v56  ;;  %v7014_v56 = vsel %vm318_vm3, %v6982_v4, %v6966_v29  ;;  %v14142_v29 = vld [vmem:[#allocation3 + $0xb8] sm:$0xff]  ;;  %v7003_v4 = vsel %vm318_vm3, %v6971_v45, %v6987_v5  ;;  %v6977_v5 = vrot.slane %v14182_v3, 7 }
 0x4d9   : > { %10587 = vmatprep.mubr.msk.f32.mxu1 %vm171_vm1, %v14021_v33  ;;  %v7031_v39 = vsel %vm250_vm4, %v7014_v56, 0.0  ;;  %v7021_v56 = vsel %vm318_vm3, %v6989_v48, %v6973_v23  ;;  %v6990_v51 = vrot.slane %v14142_v29, 7 }
 0x4da   : > { %v7045_v49 = vsel %vm250_vm4, %v7021_v56, 0.0 }
 0x4db   : > { %v7022_v9 = vsel %vm318_vm3, %v6990_v51, %v6974_v42 }
 0x4dc   : > { %10588 = vmatmul.mubr.msk.f32.gmra.mrb[30].mxu1 %vm171_vm1, %v14037_v31 }
 0x4dd   : > { %10592 = vmatprep.mubr.msk.f32.mxu1 %vm171_vm1, %v7029_v19  ;;  %v7043_v19 = vsel %vm250_vm4, %v7020_v41, 0.0  ;;  %v6994_v41 = vrot.slane %v14198_v47, 7 }
 0x4e0   : > { %10593 = vmatmul.mubr.msk.f32.vlgmr.msra.gmra.mrb[0].mxu1 %vm171_vm1, %v6997_v36  ;;  %v14154_v36 = vld [vmem:[#allocation3 + $0xc0] sm:$0xff] }
 0x4e1   : > { %10641 = vmatpush3.msk.msra.mxu1 %vm587_vm0, %v9174_v25  ;;  %10595 = vmatprep.mubr.msk.f32.mxu1 %vm171_vm1, %v7031_v39  ;;  %v6969_v25 = vrot.slane %v14068_v18, 7  ;;  %v14156_v39 = vld [vmem:[#allocation3 + $0xc8] sm:$0xff] }
 0x4e2   : > { %10690 = vmatprep.subr.msk.mxu1 %vm587_vm0, %v14057_v30 }
 0x4e3   : > { %v7017_v63 = vsel %vm318_vm3, %v6985_v22, %v6969_v25  ;;  %v7001_v20 = vsel %vm318_vm3, %v6969_v25, %v6985_v22  ;;  %v14170_v25 = vld [vmem:[#allocation3 + $0xd8] sm:$0xff]  ;;  %v7005_v22 = vsel %vm318_vm3, %v6973_v23, %v6989_v48 }
 0x4e4   : > { %10596 = vmatmul.mubr.msk.f32.gmra.mrb[2].mxu1 %vm171_vm1, %v6998_v50  ;;  %v7037_v54 = vsel %vm250_vm4, %v7017_v63, 0.0  ;;  %v6975_v50 = vrot.slane %v14154_v36, 7  ;;  %v6976_v63 = vrot.slane %v14168_v15, 7  ;;  %v6992_v27 = vrot.slane %v14170_v25, 7 }
 0x4e5   : > { %10598 = vmatprep.mubr.msk.f32.mxu1 %vm171_vm1, %v7033_v12  ;;  %v6991_v12 = vrot.slane %v14156_v39, 7 }
 0x4e6   : > { %v7024_v45 = vsel %vm318_vm3, %v6992_v27, %v6976_v63  ;;  %v7008_v23 = vsel %vm318_vm3, %v6976_v63, %v6992_v27  ;;  %v7063_v63 = vrot.slane %v14031_v58, 1  ;;  %v7079_v27 = vrot.slane %v14033_v13, 1 }
 0x4e7   : > { %v7007_v16 = vsel %vm318_vm3, %v6975_v50, %v6991_v12  ;;  %v7051_v14 = vsel %vm250_vm4, %v7024_v45, 0.0  ;;  %v7080_v45 = vrot.slane %v14050_v46, 1 }
 0x4e8   : > { %10599 = vmatmul.mubr.msk.f32.gmra.mrb[4].mxu1 %vm171_vm1, %v6999_v24  ;;  %v7047_v24 = vsel %vm250_vm4, %v7022_v9, 0.0 }
 0x4e9   : > { %10601 = vmatprep.mubr.msk.f32.mxu1 %vm171_vm1, %v7035_v60  ;;  %v7023_v60 = vsel %vm318_vm3, %v6991_v12, %v6975_v50 }
 0x4ea   : > { %v7049_v32 = vsel %vm250_vm4, %v7023_v60, 0.0 }
 0x4ec   : > { %10602 = vmatmul.mubr.msk.f32.gmra.mrb[6].mxu1 %vm171_vm1, %v7000_v34  ;;  %v14184_v34 = vld [vmem:[#allocation3 + $0xe8] sm:$0xff] }
 0x4ed   : > { %10604 = vmatprep.mubr.msk.f32.mxu1 %vm171_vm1, %v7037_v54  ;;  %v7006_v54 = vsel %vm318_vm3, %v6974_v42, %v6990_v51 }
 0x4f0   : > { %10605 = vmatmul.mubr.msk.f32.gmra.mrb[8].mxu1 %vm171_vm1, %v7001_v20  ;;  %v6993_v20 = vrot.slane %v14184_v34, 7 }
 0x4f1   : > { %10607 = vmatprep.mubr.msk.f32.mxu1 %vm171_vm1, %v7039_v2  ;;  %v14196_v2 = vld [vmem:[#allocation3 + $0xf0] sm:$0xff] }
 0x4f2   : > { %v7009_v42 = vsel %vm318_vm3, %v6977_v5, %v6993_v20 }
 0x4f4   : > { %10608 = vmatmul.mubr.msk.f32.gmra.mrb[10].mxu1 %vm171_vm1, %v7002_v59  ;;  %v7025_v59 = vsel %vm318_vm3, %v6993_v20, %v6977_v5  ;;  %v7065_v20 = vrot.slane %v14068_v18, 1 }
 0x4f5   : > { %10610 = vmatprep.mubr.msk.f32.mxu1 %vm171_vm1, %v7041_v44  ;;  %v6978_v44 = vrot.slane %v14196_v2, 7  ;;  %v7053_v48 = vsel %vm250_vm4, %v7025_v59, 0.0  ;;  %v7066_v59 = vrot.slane %v14084_v11, 1 }
 0x4f7   : > { %v7026_v56 = vsel %vm318_vm3, %v6994_v41, %v6978_v44  ;;  %v7010_v9 = vsel %vm318_vm3, %v6978_v44, %v6994_v41  ;;  %v7082_v44 = vrot.slane %v14086_v53, 1 }
 0x4f8   : > { %10611 = vmatmul.mubr.msk.f32.gmra.mrb[12].mxu1 %vm171_vm1, %v7003_v4  ;;  %v14215_v4 = vld [vmem:[#allocation3 + $0x110] sm:$0xff] }
 0x4f9   : > { %10613 = vmatprep.mubr.msk.f32.mxu1 %vm171_vm1, %v7043_v19  ;;  %v14217_v19 = vld [vmem:[#allocation3 + $0x118] sm:$0xff]  ;;  %v6980_v51 = vrot.slane %v14215_v4, 7  ;;  %v7114_v41 = vsel %vm419_vm2, %v7082_v44, %v7066_v59 }
 0x4fc   : > { %10614 = vmatmul.mubr.msk.f32.gmra.mrb[14].mxu1 %vm171_vm1, %v7004_v28  ;;  %v6996_v28 = vrot.slane %v14217_v19, 7 }
 0x4fd   : > { %10616 = vmatprep.mubr.msk.f32.mxu1 %vm171_vm1, %v7045_v49  ;;  %v7055_v49 = vsel %vm250_vm4, %v7026_v56, 0.0 }
 0x4fe   : > { %v7028_v50 = vsel %vm318_vm3, %v6996_v28, %v6980_v51 }
 0x4ff   : > { %v7059_v12 = vsel %vm250_vm4, %v7028_v50, 0.0 }
 0x500   : > { %10617 = vmatmul.mubr.msk.f32.gmra.mrb[16].mxu1 %vm171_vm1, %v7005_v22  ;;  %v7012_v22 = vsel %vm318_vm3, %v6980_v51, %v6996_v28  ;;  %v7084_v51 = vrot.slane %v14114_v43, 1 }
 0x501   : > { %10619 = vmatprep.mubr.msk.f32.mxu1 %vm171_vm1, %v7047_v24 }
 0x504   : > { %10620 = vmatmul.mubr.msk.f32.gmra.mrb[18].mxu1 %vm171_vm1, %v7006_v54  ;;  %v7111_v54 = vsel %vm419_vm2, %v7079_v27, %v7063_v63 }
 0x505   : > { %10622 = vmatprep.mubr.msk.f32.mxu1 %vm171_vm1, %v7049_v32  ;;  %v7064_v32 = vrot.slane %v14048_v52, 1 }
 0x507   : > { %v7112_v5 = vsel %vm419_vm2, %v7080_v45, %v7064_v32 }
 0x508   : > { %10623 = vmatmul.mubr.msk.f32.gmra.mrb[20].mxu1 %vm171_vm1, %v7007_v16  ;;  %v7081_v16 = vrot.slane %v14070_v61, 1 }
 0x509   : > { %10625 = vmatprep.mubr.msk.f32.mxu1 %vm171_vm1, %v7051_v14 }
 0x50a   : > { %v7113_v14 = vsel %vm419_vm2, %v7081_v16, %v7065_v20 }
 0x50c   : > { %10626 = vmatmul.mubr.msk.f32.gmra.mrb[22].mxu1 %vm171_vm1, %v7008_v23  ;;  %v7067_v23 = vrot.slane %v14098_v17, 1 }
 0x50d   : > { %10628 = vmatprep.mubr.msk.f32.mxu1 %vm171_vm1, %v7053_v48  ;;  %v7083_v48 = vrot.slane %v14100_v6, 1 }
 0x50f   : > { %v7115_v56 = vsel %vm419_vm2, %v7083_v48, %v7067_v23 }
 0x510   : > { %10629 = vmatmul.mubr.msk.f32.gmra.mrb[24].mxu1 %vm171_vm1, %v7009_v42  ;;  %v7068_v42 = vrot.slane %v14112_v62, 1 }
 0x511   : > { %10631 = vmatprep.mubr.msk.f32.mxu1 %vm171_vm1, %v7055_v49  ;;  %v7069_v49 = vrot.slane %v14126_v55, 1 }
 0x512   : > { %v7116_v28 = vsel %vm419_vm2, %v7084_v51, %v7068_v42 }
 0x514   : > { %10632 = vmatmul.mubr.msk.f32.gmra.mrb[26].mxu1 %vm171_vm1, %v7010_v9  ;;  %v7085_v9 = vrot.slane %v14128_v37, 1 }
 0x515   : > { %10634 = vmatprep.mubr.msk.f32.mxu1 %vm171_vm1, %v13863_v0  ;;  %v7061_v0 = vrot.slane %v14001_v26, 1 }
 0x516   : > { %v7117_v50 = vsel %vm419_vm2, %v7085_v9, %v7069_v49 }
 0x518   : > { %10635 = vmatmul.mubr.msk.f32.gmra.mrb[28].mxu1 %vm171_vm1, %v13869_v40  ;;  %v7077_v40 = vrot.slane %v14003_v21, 1 }
 0x519   : > { %10637 = vmatprep.mubr.msk.f32.mxu1 %vm171_vm1, %v7059_v12  ;;  %v7070_v12 = vrot.slane %v14140_v1, 1 }
 0x51a   : > { %v7109_v24 = vsel %vm419_vm2, %v7077_v40, %v7061_v0 }
 0x51c   : > { %10638 = vmatmul.mubr.msk.f32.gmra.mrb[30].mxu1 %vm171_vm1, %v7012_v22  ;;  %v7086_v22 = vrot.slane %v14142_v29, 1 }
 0x51d   : > { %10642 = vmatprep.mubr.msk.f32.mxu1 %vm171_vm1, %v14001_v26  ;;  %v7126_v26 = vsel %vm253_vm5, %v7109_v24, 0.0 }
 0x520   : > { %10643 = vmatmul.mubr.msk.f32.vlgmr.msra.gmra.mrb[0].mxu1 %vm171_vm1, %v14003_v21 }
 0x521   : > { %10691 = vmatpush3.msk.msra.mxu1 %vm587_vm0, %v14057_v30  ;;  %10645 = vmatprep.mubr.msk.f32.mxu1 %vm171_vm1, %v14013_v57  ;;  %v7093_v30 = vsel %vm419_vm2, %v7061_v0, %v7077_v40  ;;  %v7118_v0 = vsel %vm419_vm2, %v7086_v22, %v7070_v12  ;;  %v7071_v40 = vrot.slane %v14154_v36, 1 }
 0x524   : > { %10646 = vmatmul.mubr.msk.f32.gmra.mrb[2].mxu1 %vm171_vm1, %v14015_v8 }
 0x525   : > { %10648 = vmatprep.mubr.msk.f32.mxu1 %vm171_vm1, %v14031_v58  ;;  %v7130_v58 = vsel %vm253_vm5, %v7111_v54, 0.0  ;;  %v7076_v54 = vrot.slane %v14215_v4, 1 }
 0x528   : > { %10649 = vmatmul.mubr.msk.f32.gmra.mrb[4].mxu1 %vm171_vm1, %v14033_v13  ;;  %v7096_v13 = vsel %vm419_vm2, %v7064_v32, %v7080_v45 }
 0x529   : > { %10651 = vmatprep.mubr.msk.f32.mxu1 %vm171_vm1, %v14048_v52  ;;  %v7132_v52 = vsel %vm253_vm5, %v7112_v5, 0.0 }
 0x52c   : > { %10652 = vmatmul.mubr.msk.f32.gmra.mrb[6].mxu1 %vm171_vm1, %v14050_v46  ;;  %v7097_v46 = vsel %vm419_vm2, %v7065_v20, %v7081_v16 }
 0x52d   : > { %10654 = vmatprep.mubr.msk.f32.mxu1 %vm171_vm1, %v14068_v18  ;;  %v7134_v18 = vsel %vm253_vm5, %v7113_v14, 0.0 }
 0x530   : > { %10655 = vmatmul.mubr.msk.f32.gmra.mrb[8].mxu1 %vm171_vm1, %v14070_v61  ;;  %v7098_v61 = vsel %vm419_vm2, %v7066_v59, %v7082_v44 }
 0x531   : > { %10657 = vmatprep.mubr.msk.f32.mxu1 %vm171_vm1, %v14084_v11  ;;  %v7136_v11 = vsel %vm253_vm5, %v7114_v41, 0.0 }
 0x534   : > { %10658 = vmatmul.mubr.msk.f32.gmra.mrb[10].mxu1 %vm171_vm1, %v14086_v53  ;;  %v7099_v53 = vsel %vm419_vm2, %v7067_v23, %v7083_v48 }
 0x535   : > { %10660 = vmatprep.mubr.msk.f32.mxu1 %vm171_vm1, %v14098_v17  ;;  %v7138_v17 = vsel %vm253_vm5, %v7115_v56, 0.0 }
 0x538   : > { %10661 = vmatmul.mubr.msk.f32.gmra.mrb[12].mxu1 %vm171_vm1, %v14100_v6  ;;  %v7100_v6 = vsel %vm419_vm2, %v7068_v42, %v7084_v51 }
 0x539   : > { %10663 = vmatprep.mubr.msk.f32.mxu1 %vm171_vm1, %v14112_v62  ;;  %v7140_v62 = vsel %vm253_vm5, %v7116_v28, 0.0 }
 0x53c   : > { %10664 = vmatmul.mubr.msk.f32.gmra.mrb[14].mxu1 %vm171_vm1, %v14114_v43  ;;  %v7101_v43 = vsel %vm419_vm2, %v7069_v49, %v7085_v9 }
 0x53d   : > { %10666 = vmatprep.mubr.msk.f32.mxu1 %vm171_vm1, %v14126_v55  ;;  %v7142_v55 = vsel %vm253_vm5, %v7117_v50, 0.0 }
 0x540   : > { %10667 = vmatmul.mubr.msk.f32.gmra.mrb[16].mxu1 %vm171_vm1, %v14128_v37  ;;  %v7102_v37 = vsel %vm419_vm2, %v7070_v12, %v7086_v22 }
 0x541   : > { %10669 = vmatprep.mubr.msk.f32.mxu1 %vm171_vm1, %v14140_v1  ;;  %v7144_v1 = vsel %vm253_vm5, %v7118_v0, 0.0 }
 0x544   : > { %10670 = vmatmul.mubr.msk.f32.gmra.mrb[18].mxu1 %vm171_vm1, %v14142_v29 }
 0x545   : > { %10672 = vmatprep.mubr.msk.f32.mxu1 %vm171_vm1, %v14154_v36 }
 0x548   : > { %10673 = vmatmul.mubr.msk.f32.gmra.mrb[20].mxu1 %vm171_vm1, %v14156_v39 }
 0x549   : > { %10675 = vmatprep.mubr.msk.f32.mxu1 %vm171_vm1, %v14168_v15 }
 0x54c   : > { %10676 = vmatmul.mubr.msk.f32.gmra.mrb[22].mxu1 %vm171_vm1, %v14170_v25 }
 0x54d   : > { %10678 = vmatprep.mubr.msk.f32.mxu1 %vm171_vm1, %v14182_v3 }
 0x550   : > { %10679 = vmatmul.mubr.msk.f32.gmra.mrb[24].mxu1 %vm171_vm1, %v14184_v34 }
 0x551   : > { %10681 = vmatprep.mubr.msk.f32.mxu1 %vm171_vm1, %v14196_v2 }
 0x554   : > { %10682 = vmatmul.mubr.msk.f32.gmra.mrb[26].mxu1 %vm171_vm1, %v14198_v47 }
 0x555   : > { %10684 = vmatprep.mubr.msk.f32.mxu1 %vm171_vm1, %v13843_v38  ;;  %v7062_v38 = vrot.slane %v14013_v57, 1 }
 0x558   : > { %10685 = vmatmul.mubr.msk.f32.gmra.mrb[28].mxu1 %vm171_vm1, %v13845_v35  ;;  %v7078_v35 = vrot.slane %v14015_v8, 1  ;;  %v7095_v8 = vsel %vm419_vm2, %v7063_v63, %v7079_v27  ;;  %v7074_v27 = vrot.slane %v14196_v2, 1  ;;  %v7092_v2 = vrot.slane %v14217_v19, 1 }
 0x559   : > { %10687 = vmatprep.mubr.msk.f32.mxu1 %vm171_vm1, %v14215_v4 }
 0x55a   : > { %v7094_v21 = vsel %vm419_vm2, %v7062_v38, %v7078_v35  ;;  %v7110_v60 = vsel %vm419_vm2, %v7078_v35, %v7062_v38  ;;  %v7072_v38 = vrot.slane %v14168_v15, 1  ;;  %v7088_v35 = vrot.slane %v14170_v25, 1 }
 0x55b   : > { %v7128_v57 = vsel %vm253_vm5, %v7110_v60, 0.0  ;;  %v7089_v60 = vrot.slane %v14184_v34, 1  ;;  %v7108_v32 = vsel %vm419_vm2, %v7076_v54, %v7092_v2  ;;  %v7124_v45 = vsel %vm419_vm2, %v7092_v2, %v7076_v54 }
 0x55c   : > { %10688 = vmatmul.mubr.msk.f32.gmra.mrb[30].mxu1 %vm171_vm1, %v14217_v19  ;;  %v7156_v4 = vsel %vm253_vm5, %v7124_v45, 0.0 }
 0x55d   : > { %10692 = vmatprep.mubr.msk.f32.mxu1 %vm171_vm1, %v7093_v30  ;;  %v7087_v30 = vrot.slane %v14156_v39, 1  ;;  %v7104_v39 = vsel %vm419_vm2, %v7072_v38, %v7088_v35 }
 0x55f   : > { %v7103_v29 = vsel %vm419_vm2, %v7071_v40, %v7087_v30  ;;  %v7119_v24 = vsel %vm419_vm2, %v7087_v30, %v7071_v40 }
 0x560   : > { %10693 = vmatmul.mubr.msk.f32.vlgmr.msra.gmra.mrb[0].mxu1 %vm171_vm1, %v7126_v26  ;;  %v7146_v36 = vsel %vm253_vm5, %v7119_v24, 0.0  ;;  %v7120_v26 = vsel %vm419_vm2, %v7088_v35, %v7072_v38 }
 0x561   : > { %10695 = vmatprep.mubr.msk.f32.mxu1 %vm171_vm1, %v7094_v21  ;;  %v7073_v21 = vrot.slane %v14182_v3, 1  ;;  %v7148_v15 = vsel %vm253_vm5, %v7120_v26, 0.0 }
 0x563   : > { %v7105_v25 = vsel %vm419_vm2, %v7073_v21, %v7089_v60  ;;  %v7121_v63 = vsel %vm419_vm2, %v7089_v60, %v7073_v21 }
 0x564   : > { %10696 = vmatmul.mubr.msk.f32.gmra.mrb[2].mxu1 %vm171_vm1, %v7128_v57  ;;  %v7090_v57 = vrot.slane %v14198_v47, 1  ;;  %v7150_v3 = vsel %vm253_vm5, %v7121_v63, 0.0 }
 0x565   : > { %10698 = vmatprep.mubr.msk.f32.mxu1 %vm171_vm1, %v7095_v8 }
 0x566   : > { %v7106_v34 = vsel %vm419_vm2, %v7074_v27, %v7090_v57  ;;  %v7122_v8 = vsel %vm419_vm2, %v7090_v57, %v7074_v27 }
 0x567   : > { %v7152_v47 = vsel %vm253_vm5, %v7122_v8, 0.0 }
 0x568   : > { %10699 = vmatmul.mubr.msk.f32.gmra.mrb[4].mxu1 %vm171_vm1, %v7130_v58 }
 0x569   : > { %10701 = vmatprep.mubr.msk.f32.mxu1 %vm171_vm1, %v7096_v13 }
 0x56c   : > { %10702 = vmatmul.mubr.msk.f32.gmra.mrb[6].mxu1 %vm171_vm1, %v7132_v52 }
 0x56d   : > { %10704 = vmatprep.mubr.msk.f32.mxu1 %vm171_vm1, %v7097_v46 }
 0x570   : > { %10705 = vmatmul.mubr.msk.f32.gmra.mrb[8].mxu1 %vm171_vm1, %v7134_v18 }
 0x571   : > { %10707 = vmatprep.mubr.msk.f32.mxu1 %vm171_vm1, %v7098_v61 }
 0x574   : > { %10708 = vmatmul.mubr.msk.f32.gmra.mrb[10].mxu1 %vm171_vm1, %v7136_v11 }
 0x575   : > { %10710 = vmatprep.mubr.msk.f32.mxu1 %vm171_vm1, %v7099_v53 }
 0x578   : > { %10711 = vmatmul.mubr.msk.f32.gmra.mrb[12].mxu1 %vm171_vm1, %v7138_v17 }
 0x579   : > { %10713 = vmatprep.mubr.msk.f32.mxu1 %vm171_vm1, %v7100_v6 }
 0x57c   : > { %10714 = vmatmul.mubr.msk.f32.gmra.mrb[14].mxu1 %vm171_vm1, %v7140_v62 }
 0x57d   : > { %10716 = vmatprep.mubr.msk.f32.mxu1 %vm171_vm1, %v7101_v43 }
 0x580   : > { %10717 = vmatmul.mubr.msk.f32.gmra.mrb[16].mxu1 %vm171_vm1, %v7142_v55 }
 0x581   : > { %10719 = vmatprep.mubr.msk.f32.mxu1 %vm171_vm1, %v7102_v37 }
 0x584   : > { %10720 = vmatmul.mubr.msk.f32.gmra.mrb[18].mxu1 %vm171_vm1, %v7144_v1 }
 0x585   : > { %10722 = vmatprep.mubr.msk.f32.mxu1 %vm171_vm1, %v7103_v29 }
 0x588   : > { %10723 = vmatmul.mubr.msk.f32.gmra.mrb[20].mxu1 %vm171_vm1, %v7146_v36 }
 0x589   : > { %10725 = vmatprep.mubr.msk.f32.mxu1 %vm171_vm1, %v7104_v39 }
 0x58c   : > { %10726 = vmatmul.mubr.msk.f32.gmra.mrb[22].mxu1 %vm171_vm1, %v7148_v15 }
 0x58d   : > { %10728 = vmatprep.mubr.msk.f32.mxu1 %vm171_vm1, %v7105_v25 }
 0x590   : > { %10729 = vmatmul.mubr.msk.f32.gmra.mrb[24].mxu1 %vm171_vm1, %v7150_v3 }
 0x591   : > { %10731 = vmatprep.mubr.msk.f32.mxu1 %vm171_vm1, %v7106_v34 }
 0x594   : > { %10732 = vmatmul.mubr.msk.f32.gmra.mrb[26].mxu1 %vm171_vm1, %v7152_v47 }
 0x595   : > { %10734 = vmatprep.mubr.msk.f32.mxu1 %vm171_vm1, %v14021_v33 }
 0x598   : > { %10735 = vmatmul.mubr.msk.f32.gmra.mrb[28].mxu1 %vm171_vm1, %v14037_v31 }
 0x599   : > { %10737 = vmatprep.mubr.msk.f32.mxu1 %vm171_vm1, %v7108_v32 }
 0x59c   : > { %10738 = vmatmul.mubr.msk.f32.gmra.mrb[30].mxu1 %vm171_vm1, %v7156_v4 }
 0x633   : > { %v14465_v19 = vpop.f32.mrb[0].mxu1 }
 0x634   : > { %v8232_v33 = vsel %vm171_vm1, %v14465_v19, 0.0  ;;  %v8301_v58 = vmul.f32 %v14465_v19, %v14465_v19  ;;  %v14471_v7 = vpop.f32.mrb[1].mxu1 }
 0x635   : > { %v8231_v31 = vsel %vm171_vm1, %v14471_v7, 0.0  ;;  %v8300_v13 = vmul.f32 %v14471_v7, %v14471_v7 }
 0x636   : > { %v8333_v10 = vsel %vm171_vm1, %v8301_v58, 0.0  ;;  %v8233_v5 = vadd.f32 %v8232_v33, %v8231_v31 }
 0x637   : > { %v8332_v20 = vsel %vm171_vm1, %v8300_v13, 0.0  ;;  %v14479_v16 = vpop.f32.mrb[2].mxu1 }
 0x638   : > { %v8334_v52 = vadd.f32 %v8333_v10, %v8332_v20  ;;  %v14481_v46 = vpop.f32.mrb[3].mxu1  ;;  %v8303_v14 = vmul.f32 %v14479_v16, %v14479_v16  ;;  %v8236_v61 = vsel %vm171_vm1, %v14479_v16, 0.0 }
 0x639   : > { %v8234_v59 = vsel %vm171_vm1, %v14481_v46, 0.0  ;;  %v8302_v44 = vmul.f32 %v14481_v46, %v14481_v46 }
 0x63a   : > { %v8235_v18 = vadd.f32 %v8234_v59, %v8233_v5  ;;  %v8337_v56 = vsel %vm171_vm1, %v8303_v14, 0.0 }
 0x63b   : > { %v8335_v41 = vsel %vm171_vm1, %v8302_v44, 0.0  ;;  %v14492_v23 = vpop.f32.mrb[4].mxu1 }
 0x63c   : > { %v8336_v48 = vadd.f32 %v8335_v41, %v8334_v52  ;;  %v14494_v11 = vpop.f32.mrb[5].mxu1  ;;  %v8237_v53 = vadd.f32 %v8236_v61, %v8235_v18  ;;  %v8305_v42 = vmul.f32 %v14492_v23, %v14492_v23  ;;  %v8240_v49 = vsel %vm171_vm1, %v14492_v23, 0.0 }
 0x63d   : > { %v8238_v51 = vsel %vm171_vm1, %v14494_v11, 0.0  ;;  %v8304_v17 = vmul.f32 %v14494_v11, %v14494_v11 }
 0x63e   : > { %v8239_v6 = vadd.f32 %v8238_v51, %v8237_v53  ;;  %v8338_v28 = vadd.f32 %v8337_v56, %v8336_v48  ;;  %v8341_v22 = vsel %vm171_vm1, %v8305_v42, 0.0 }
 0x63f   : > { %v8339_v9 = vsel %vm171_vm1, %v8304_v17, 0.0  ;;  %v14506_v62 = vpop.f32.mrb[6].mxu1 }
 0x640   : > { %v8340_v43 = vadd.f32 %v8339_v9, %v8338_v28  ;;  %v14508_v50 = vpop.f32.mrb[7].mxu1  ;;  %v8241_v12 = vadd.f32 %v8240_v49, %v8239_v6  ;;  %v8307_v55 = vmul.f32 %v14506_v62, %v14506_v62  ;;  %v8244_v1 = vsel %vm171_vm1, %v14506_v62, 0.0 }
 0x641   : > { %v8242_v37 = vsel %vm171_vm1, %v14508_v50, 0.0  ;;  %v8306_v0 = vmul.f32 %v14508_v50, %v14508_v50 }
 0x642   : > { %v8243_v40 = vadd.f32 %v8242_v37, %v8241_v12  ;;  %v8342_v30 = vadd.f32 %v8341_v22, %v8340_v43  ;;  %v8345_v39 = vsel %vm171_vm1, %v8307_v55, 0.0 }
 0x643   : > { %v8343_v29 = vsel %vm171_vm1, %v8306_v0, 0.0  ;;  %v14520_v24 = vpop.f32.mrb[8].mxu1 }
 0x644   : > { %v8344_v38 = vadd.f32 %v8343_v29, %v8342_v30  ;;  %v14522_v35 = vpop.f32.mrb[9].mxu1  ;;  %v8245_v36 = vadd.f32 %v8244_v1, %v8243_v40  ;;  %v8309_v26 = vmul.f32 %v14520_v24, %v14520_v24  ;;  %v8248_v63 = vsel %vm171_vm1, %v14520_v24, 0.0 }
 0x645   : > { %v8246_v21 = vsel %vm171_vm1, %v14522_v35, 0.0  ;;  %v8308_v60 = vmul.f32 %v14522_v35, %v14522_v35 }
 0x646   : > { %v8247_v15 = vadd.f32 %v8246_v21, %v8245_v36  ;;  %v8346_v25 = vadd.f32 %v8345_v39, %v8344_v38  ;;  %v8349_v54 = vsel %vm171_vm1, %v8309_v26, 0.0 }
 0x647   : > { %v8347_v27 = vsel %vm171_vm1, %v8308_v60, 0.0  ;;  %v14534_v57 = vpop.f32.mrb[10].mxu1 }
 0x648   : > { %v8348_v3 = vadd.f32 %v8347_v27, %v8346_v25  ;;  %v14536_v34 = vpop.f32.mrb[11].mxu1  ;;  %v8249_v8 = vadd.f32 %v8248_v63, %v8247_v15  ;;  %v8311_v2 = vmul.f32 %v14534_v57, %v14534_v57  ;;  %v8252_v33 = vsel %vm171_vm1, %v14534_v57, 0.0 }
 0x649   : > { %v8250_v47 = vsel %vm171_vm1, %v14536_v34, 0.0  ;;  %v8310_v32 = vmul.f32 %v14536_v34, %v14536_v34 }
 0x64a   : > { %v8251_v45 = vadd.f32 %v8250_v47, %v8249_v8  ;;  %v8350_v4 = vadd.f32 %v8349_v54, %v8348_v3  ;;  %v8353_v20 = vsel %vm171_vm1, %v8311_v2, 0.0 }
 0x64b   : > { %v8351_v58 = vsel %vm171_vm1, %v8310_v32, 0.0  ;;  %v14548_v31 = vpop.f32.mrb[12].mxu1 }
 0x64c   : > { %v8352_v13 = vadd.f32 %v8351_v58, %v8350_v4  ;;  %v14550_v10 = vpop.f32.mrb[13].mxu1  ;;  %v8253_v5 = vadd.f32 %v8252_v33, %v8251_v45  ;;  %v8313_v52 = vmul.f32 %v14548_v31, %v14548_v31  ;;  %v8256_v61 = vsel %vm171_vm1, %v14548_v31, 0.0 }
 0x64d   : > { %v8254_v14 = vsel %vm171_vm1, %v14550_v10, 0.0  ;;  %v8312_v59 = vmul.f32 %v14550_v10, %v14550_v10 }
 0x64e   : > { %v8255_v44 = vadd.f32 %v8254_v14, %v8253_v5  ;;  %v8354_v18 = vadd.f32 %v8353_v20, %v8352_v13  ;;  %v8357_v51 = vsel %vm171_vm1, %v8313_v52, 0.0 }
 0x64f   : > { %v8355_v41 = vsel %vm171_vm1, %v8312_v59, 0.0  ;;  %v14562_v48 = vpop.f32.mrb[14].mxu1 }
 0x650   : > { %v8356_v53 = vadd.f32 %v8355_v41, %v8354_v18  ;;  %v14564_v56 = vpop.f32.mrb[15].mxu1  ;;  %v8257_v42 = vadd.f32 %v8256_v61, %v8255_v44  ;;  %v8315_v17 = vmul.f32 %v14562_v48, %v14562_v48  ;;  %v8260_v43 = vsel %vm171_vm1, %v14562_v48, 0.0 }
 0x651   : > { %v8258_v6 = vsel %vm171_vm1, %v14564_v56, 0.0  ;;  %v8314_v28 = vmul.f32 %v14564_v56, %v14564_v56 }
 0x652   : > { %v8259_v49 = vadd.f32 %v8258_v6, %v8257_v42  ;;  %v8358_v9 = vadd.f32 %v8357_v51, %v8356_v53  ;;  %v8361_v40 = vsel %vm171_vm1, %v8315_v17, 0.0 }
 0x653   : > { %v8359_v12 = vsel %vm171_vm1, %v8314_v28, 0.0  ;;  %v14576_v22 = vpop.f32.mrb[16].mxu1 }
 0x654   : > { %v8360_v55 = vadd.f32 %v8359_v12, %v8358_v9  ;;  %v14578_v37 = vpop.f32.mrb[17].mxu1  ;;  %v8261_v0 = vadd.f32 %v8260_v43, %v8259_v49  ;;  %v8317_v30 = vmul.f32 %v14576_v22, %v14576_v22  ;;  %v8264_v39 = vsel %vm171_vm1, %v14576_v22, 0.0 }
 0x655   : > { %v8262_v1 = vsel %vm171_vm1, %v14578_v37, 0.0  ;;  %v8316_v29 = vmul.f32 %v14578_v37, %v14578_v37 }
 0x656   : > { %v8263_v38 = vadd.f32 %v8262_v1, %v8261_v0  ;;  %v8362_v36 = vadd.f32 %v8361_v40, %v8360_v55  ;;  %v8365_v63 = vsel %vm171_vm1, %v8317_v30, 0.0 }
 0x657   : > { %v8363_v26 = vsel %vm171_vm1, %v8316_v29, 0.0  ;;  %v14590_v21 = vpop.f32.mrb[18].mxu1 }
 0x658   : > { %v8364_v60 = vadd.f32 %v8363_v26, %v8362_v36  ;;  %v14592_v15 = vpop.f32.mrb[19].mxu1  ;;  %v8265_v25 = vadd.f32 %v8264_v39, %v8263_v38  ;;  %v8319_v27 = vmul.f32 %v14590_v21, %v14590_v21  ;;  %v8268_v47 = vsel %vm171_vm1, %v14590_v21, 0.0 }
 0x659   : > { %v8266_v3 = vsel %vm171_vm1, %v14592_v15, 0.0  ;;  %v8318_v8 = vmul.f32 %v14592_v15, %v14592_v15 }
 0x65a   : > { %v8267_v54 = vadd.f32 %v8266_v3, %v8265_v25  ;;  %v8366_v2 = vadd.f32 %v8365_v63, %v8364_v60  ;;  %v8369_v13 = vsel %vm171_vm1, %v8319_v27, 0.0 }
 0x65b   : > { %v8367_v32 = vsel %vm171_vm1, %v8318_v8, 0.0  ;;  %v14604_v45 = vpop.f32.mrb[20].mxu1 }
 0x65c   : > { %v8368_v4 = vadd.f32 %v8367_v32, %v8366_v2  ;;  %v14606_v33 = vpop.f32.mrb[21].mxu1  ;;  %v8269_v58 = vadd.f32 %v8268_v47, %v8267_v54  ;;  %v8321_v5 = vmul.f32 %v14604_v45, %v14604_v45  ;;  %v8272_v44 = vsel %vm171_vm1, %v14604_v45, 0.0 }
 0x65d   : > { %v8270_v20 = vsel %vm171_vm1, %v14606_v33, 0.0  ;;  %v8320_v52 = vmul.f32 %v14606_v33, %v14606_v33 }
 0x65e   : > { %v8271_v14 = vadd.f32 %v8270_v20, %v8269_v58  ;;  %v8370_v59 = vadd.f32 %v8369_v13, %v8368_v4  ;;  %v8373_v51 = vsel %vm171_vm1, %v8321_v5, 0.0 }
 0x65f   : > { %v8371_v18 = vsel %vm171_vm1, %v8320_v52, 0.0  ;;  %v14618_v61 = vpop.f32.mrb[22].mxu1 }
 0x660   : > { %v8372_v41 = vadd.f32 %v8371_v18, %v8370_v59  ;;  %v14620_v53 = vpop.f32.mrb[23].mxu1  ;;  %v8273_v42 = vadd.f32 %v8272_v44, %v8271_v14  ;;  %v8323_v17 = vmul.f32 %v14618_v61, %v14618_v61  ;;  %v8276_v43 = vsel %vm171_vm1, %v14618_v61, 0.0 }
 0x661   : > { %v8274_v6 = vsel %vm171_vm1, %v14620_v53, 0.0  ;;  %v8322_v28 = vmul.f32 %v14620_v53, %v14620_v53 }
 0x662   : > { %v8275_v49 = vadd.f32 %v8274_v6, %v8273_v42  ;;  %v8374_v9 = vadd.f32 %v8373_v51, %v8372_v41  ;;  %v8377_v1 = vsel %vm171_vm1, %v8323_v17, 0.0 }
 0x663   : > { %v8375_v12 = vsel %vm171_vm1, %v8322_v28, 0.0  ;;  %v14632_v55 = vpop.f32.mrb[24].mxu1 }
 0x664   : > { %v8376_v0 = vadd.f32 %v8375_v12, %v8374_v9  ;;  %v14634_v40 = vpop.f32.mrb[25].mxu1  ;;  %v8277_v30 = vadd.f32 %v8276_v43, %v8275_v49  ;;  %v8325_v29 = vmul.f32 %v14632_v55, %v14632_v55  ;;  %v8280_v60 = vsel %vm171_vm1, %v14632_v55, 0.0 }
 0x665   : > { %v8278_v38 = vsel %vm171_vm1, %v14634_v40, 0.0  ;;  %v8324_v36 = vmul.f32 %v14634_v40, %v14634_v40 }
 0x666   : > { %v8279_v39 = vadd.f32 %v8278_v38, %v8277_v30  ;;  %v8378_v26 = vadd.f32 %v8377_v1, %v8376_v0  ;;  %v8381_v54 = vsel %vm171_vm1, %v8325_v29, 0.0 }
 0x667   : > { %v8379_v25 = vsel %vm171_vm1, %v8324_v36, 0.0  ;;  %v14646_v63 = vpop.f32.mrb[26].mxu1 }
 0x668   : > { %v8380_v27 = vadd.f32 %v8379_v25, %v8378_v26  ;;  %v14648_v3 = vpop.f32.mrb[27].mxu1  ;;  %v8281_v8 = vadd.f32 %v8280_v60, %v8279_v39  ;;  %v8327_v2 = vmul.f32 %v14646_v63, %v14646_v63  ;;  %v8284_v13 = vsel %vm171_vm1, %v14646_v63, 0.0 }
 0x669   : > { %v8282_v47 = vsel %vm171_vm1, %v14648_v3, 0.0  ;;  %v8326_v32 = vmul.f32 %v14648_v3, %v14648_v3 }
 0x66a   : > { %v8283_v4 = vadd.f32 %v8282_v47, %v8281_v8  ;;  %v8382_v58 = vadd.f32 %v8381_v54, %v8380_v27  ;;  %v8385_v44 = vsel %vm171_vm1, %v8327_v2, 0.0 }
 0x66b   : > { %v8383_v5 = vsel %vm171_vm1, %v8326_v32, 0.0  ;;  %v14660_v20 = vpop.f32.mrb[28].mxu1 }
 0x66c   : > { %v8384_v52 = vadd.f32 %v8383_v5, %v8382_v58  ;;  %v14662_v14 = vpop.f32.mrb[29].mxu1  ;;  %v8285_v59 = vadd.f32 %v8284_v13, %v8283_v4  ;;  %v8329_v18 = vmul.f32 %v14660_v20, %v14660_v20  ;;  %v8288_v6 = vsel %vm171_vm1, %v14660_v20, 0.0 }
 0x66d   : > { %v8286_v41 = vsel %vm171_vm1, %v14662_v14, 0.0  ;;  %v8328_v42 = vmul.f32 %v14662_v14, %v14662_v14 }
 0x66e   : > { %v8287_v51 = vadd.f32 %v8286_v41, %v8285_v59  ;;  %v8386_v17 = vadd.f32 %v8385_v44, %v8384_v52  ;;  %v8389_v0 = vsel %vm171_vm1, %v8329_v18, 0.0 }
 0x66f   : > { %v8387_v28 = vsel %vm171_vm1, %v8328_v42, 0.0  ;;  %v14674_v49 = vpop.f32.mrb[30].mxu1 }
 0x670   : > { %v8388_v9 = vadd.f32 %v8387_v28, %v8386_v17  ;;  %v14676_v43 = vpop.f32.mrb[31].mxu1  ;;  %v8289_v12 = vadd.f32 %v8288_v6, %v8287_v51  ;;  %v8331_v30 = vmul.f32 %v14674_v49, %v14674_v49  ;;  %v8292_v39 = vsel %vm171_vm1, %v14674_v49, 0.0 }
 0x671   : > { %v8290_v1 = vsel %vm171_vm1, %v14676_v43, 0.0  ;;  %v8330_v29 = vmul.f32 %v14676_v43, %v14676_v43 }
 0x672   : > { %v8291_v38 = vadd.f32 %v8290_v1, %v8289_v12  ;;  %v8390_v36 = vadd.f32 %v8389_v0, %v8388_v9  ;;  %v8393_v27 = vsel %vm171_vm1, %v8331_v30, 0.0 }
 0x673   : > { %v8391_v26 = vsel %vm171_vm1, %v8330_v29, 0.0 }
 0x674   : > { %v8293_v60 = vadd.f32 %v8292_v39, %v8291_v38  ;;  %v8392_v25 = vadd.f32 %v8391_v26, %v8390_v36 }
 0x676   : > { %v8294_v8 = vrot.slane %v8293_v60, 4  ;;  %v8394_v54 = vadd.f32 %v8393_v27, %v8392_v25 }
 0x678   : > { %v8295_v2 = vadd.f32 %v8294_v8, %v8293_v60  ;;  %v8395_v47 = vrot.slane %v8394_v54, 4 }
 0x67a   : > { %v8296_v32 = vrot.slane %v8295_v2, 2  ;;  %v8396_v4 = vadd.f32 %v8395_v47, %v8394_v54 }
 0x67c   : > { %v8297_v58 = vadd.f32 %v8296_v32, %v8295_v2  ;;  %v8397_v13 = vrot.slane %v8396_v4, 2  ;;  %v8472_v32 = vld [vmem:[%s11327_s21] sm:$0xff] }
 0x67e   : > { %v8298_v5 = vrot.slane %v8297_v58, 1  ;;  %v8398_v52 = vadd.f32 %v8397_v13, %v8396_v4  ;;  %v8473_v4 = vld [vmem:[%s11327_s21 + $0x8] sm:$0xff]  ;;  %v8475_v13 = vld [vmem:[%s11327_s21 + $0x18] sm:$0xff] }
 0x680   : > { %v8299_v59 = vadd.f32 %v8298_v5, %v8297_v58  ;;  %v8399_v44 = vrot.slane %v8398_v52, 1  ;;  %v8474_v58 = vld [vmem:[%s11327_s21 + $0x10] sm:$0xff] }
 0x682   : > { %v8400_v18 = vadd.f32 %v8399_v44, %v8398_v52  ;;  %v14689_v41 = vmul.f32 0.00390625, %v8299_v59 }
 0x684   : > { %v8402_v42 = vmul.f32 0.00390625, %v8400_v18  ;;  %v8403_v51 = vmul.f32 %v14689_v41, %v14689_v41  ;;  %v8406_v17 = vsub.f32 %v14471_v7, %v14689_v41  ;;  %v8407_v6 = vsub.f32 %v14465_v19, %v14689_v41  ;;  %v8476_v18 = vld [vmem:[%s11327_s21 + $0x20] sm:$0xff] }
 0x685   : > { %v8408_v28 = vsub.f32 %v14481_v46, %v14689_v41  ;;  %v8409_v9 = vsub.f32 %v14479_v16, %v14689_v41  ;;  %v8410_v12 = vsub.f32 %v14494_v11, %v14689_v41  ;;  %v8411_v0 = vsub.f32 %v14492_v23, %v14689_v41 }
 0x686   : > { %v8404_v30 = vsub.f32 %v8402_v42, %v8403_v51  ;;  %v8412_v1 = vsub.f32 %v14508_v50, %v14689_v41  ;;  %v8413_v7 = vsub.f32 %v14506_v62, %v14689_v41  ;;  %v8414_v19 = vsub.f32 %v14522_v35, %v14689_v41  ;;  %v8478_v42 = vld [vmem:[%s11327_s21 + $0x30] sm:$0xff]  ;;  %v8479_v51 = vld [vmem:[%s11327_s21 + $0x38] sm:$0xff] }
 0x687   : > { %v8415_v46 = vsub.f32 %v14520_v24, %v14689_v41  ;;  %v8416_v16 = vsub.f32 %v14536_v34, %v14689_v41  ;;  %v8417_v11 = vsub.f32 %v14534_v57, %v14689_v41  ;;  %v8418_v23 = vsub.f32 %v14550_v10, %v14689_v41 }
 0x688   : > { %v8405_v29 = vmax.f32 %v8404_v30, 0.0  ;;  %v8419_v50 = vsub.f32 %v14548_v31, %v14689_v41  ;;  %v8420_v62 = vsub.f32 %v14564_v56, %v14689_v41  ;;  %v8421_v35 = vsub.f32 %v14562_v48, %v14689_v41  ;;  %v8482_v30 = vld [vmem:[%s11327_s21 + $0x50] sm:$0xff] }
 0x689   : > { %v8422_v24 = vsub.f32 %v14578_v37, %v14689_v41  ;;  %v8423_v34 = vsub.f32 %v14576_v22, %v14689_v41  ;;  %v8424_v57 = vsub.f32 %v14592_v15, %v14689_v41  ;;  %v8425_v10 = vsub.f32 %v14590_v21, %v14689_v41 }
 0x68a   : > { %v8426_v31 = vsub.f32 %v14606_v33, %v14689_v41  ;;  %v8427_v56 = vsub.f32 %v14604_v45, %v14689_v41  ;;  %v8428_v48 = vsub.f32 %v14620_v53, %v14689_v41  ;;  %v8429_v37 = vsub.f32 %v14618_v61, %v14689_v41 }
 0x68b   : > { %v8430_v22 = vsub.f32 %v14634_v40, %v14689_v41  ;;  %v8431_v15 = vsub.f32 %v14632_v55, %v14689_v41  ;;  %v8432_v21 = vsub.f32 %v14648_v3, %v14689_v41  ;;  %v8433_v33 = vsub.f32 %v14646_v63, %v14689_v41 }
 0x68c   : > { %v8434_v45 = vsub.f32 %v14662_v14, %v14689_v41  ;;  %v8435_v53 = vsub.f32 %v14660_v20, %v14689_v41  ;;  %v8436_v61 = vsub.f32 %v14676_v43, %v14689_v41  ;;  %v8437_v40 = vsub.f32 %v14674_v49, %v14689_v41  ;;  %v8477_v41 = vld [vmem:[%s11327_s21 + $0x28] sm:$0xff] }
 0x68d   : > { %v8438_v38 = vadd.f32 1e-05, %v8405_v29 }
 0x68f   : > { %11263 = vrsqrt.f32 %v8438_v38 }
 0x699   : > { %v11264_v55 = vpop.eup %11263 }
 0x69a   : > { %v8440_v36 = vmul.f32 %v11264_v55, %v8406_v17  ;;  %v8441_v3 = vmul.f32 %v11264_v55, %v8407_v6  ;;  %v8442_v63 = vmul.f32 %v11264_v55, %v8408_v28  ;;  %v8443_v39 = vmul.f32 %v11264_v55, %v8409_v9 }
 0x69b   : > { %v8444_v14 = vmul.f32 %v11264_v55, %v8410_v12  ;;  %v8445_v26 = vmul.f32 %v11264_v55, %v8411_v0  ;;  %v8446_v20 = vmul.f32 %v11264_v55, %v8412_v1  ;;  %v8447_v60 = vmul.f32 %v11264_v55, %v8413_v7  ;;  %v8480_v12 = vld [vmem:[%s11327_s21 + $0x40] sm:$0xff]  ;;  %v8481_v0 = vld [vmem:[%s11327_s21 + $0x48] sm:$0xff] }
 0x69c   : > { %v8448_v25 = vmul.f32 %v11264_v55, %v8414_v19  ;;  %v8449_v43 = vmul.f32 %v11264_v55, %v8415_v46  ;;  %v8450_v49 = vmul.f32 %v11264_v55, %v8416_v16  ;;  %v8451_v27 = vmul.f32 %v11264_v55, %v8417_v11  ;;  %v8483_v16 = vld [vmem:[%s11327_s21 + $0x58] sm:$0xff]  ;;  %v8484_v11 = vld [vmem:[%s11327_s21 + $0x60] sm:$0xff] }
 0x69d   : > { %v14757_v8 = vmul.f32 %v11264_v55, %v8418_v23  ;;  %v14759_v54 = vmul.f32 %v11264_v55, %v8419_v50  ;;  %v14761_v2 = vmul.f32 %v11264_v55, %v8420_v62  ;;  %v14763_v47 = vmul.f32 %v11264_v55, %v8421_v35  ;;  %v8485_v23 = vld [vmem:[%s11327_s21 + $0x68] sm:$0xff] }
 0x69e   : > { %v14769_v5 = vmul.f32 %v11264_v55, %v8422_v24  ;;  %v14771_v52 = vmul.f32 %v11264_v55, %v8423_v34  ;;  %v14773_v59 = vmul.f32 %v11264_v55, %v8424_v57  ;;  %v14775_v44 = vmul.f32 %v11264_v55, %v8425_v10  ;;  %v8486_v24 = vld [vmem:[%s11327_s21 + $0x70] sm:$0xff]  ;;  %v8487_v34 = vld [vmem:[%s11327_s21 + $0x78] sm:$0xff]  ;;  %v8488_v57 = vld [vmem:[%s11327_s21 + $0x80] sm:$0xff] }
 0x69f   : > { %v14781_v17 = vmul.f32 %v11264_v55, %v8426_v31  ;;  %v14783_v6 = vmul.f32 %v11264_v55, %v8427_v56  ;;  %v14785_v28 = vmul.f32 %v11264_v55, %v8428_v48  ;;  %v14787_v9 = vmul.f32 %v11264_v55, %v8429_v37  ;;  %v8489_v10 = vld [vmem:[%s11327_s21 + $0x88] sm:$0xff]  ;;  %v8490_v31 = vld [vmem:[%s11327_s21 + $0x90] sm:$0xff]  ;;  %v8491_v56 = vld [vmem:[%s11327_s21 + $0x98] sm:$0xff] }
 0x6a0   : > { %v14792_v1 = vmul.f32 %v11264_v55, %v8430_v22  ;;  %v14794_v7 = vmul.f32 %v11264_v55, %v8431_v15  ;;  %v14796_v19 = vmul.f32 %v11264_v55, %v8432_v21  ;;  %v14798_v46 = vmul.f32 %v11264_v55, %v8433_v33  ;;  %v8492_v21 = vld [vmem:[%s11327_s21 + $0xa0] sm:$0xff]  ;;  %v8493_v33 = vld [vmem:[%s11327_s21 + $0xa8] sm:$0xff] }
 0x6a1   : > { %v14810_v29 = vmul.f32 %v11264_v55, %v8434_v45  ;;  %v14812_v50 = vmul.f32 %v11264_v55, %v8435_v53  ;;  %v14814_v62 = vmul.f32 %v11264_v55, %v8436_v61  ;;  %v14816_v35 = vmul.f32 %v11264_v55, %v8437_v40  ;;  %v8494_v45 = vld [vmem:[%s11327_s21 + $0xb0] sm:$0xff]  ;;  %v8495_v55 = vld [vmem:[%s11327_s21 + $0xb8] sm:$0xff] }
 0x6a2   : > { %v8504_v48 = vadd.f32 %v8472_v32, %v8440_v36  ;;  %v8505_v37 = vadd.f32 %v8473_v4, %v8441_v3  ;;  %v8506_v22 = vadd.f32 %v8474_v58, %v8442_v63  ;;  %v8507_v15 = vadd.f32 %v8475_v13, %v8443_v39  ;;  %v8497_v36 = vld [vmem:[%s11327_s21 + $0xc8] sm:$0xff] }
 0x6a3   : > { %15131 = vst [vmem:[#allocation8_spill] sm:$0xff] %v14816_v35  ;;  %v8508_v53 = vadd.f32 %v8476_v18, %v8444_v14  ;;  %v8509_v61 = vadd.f32 %v8477_v41, %v8445_v26  ;;  %v8510_v40 = vadd.f32 %v8478_v42, %v8446_v20  ;;  %v8511_v38 = vadd.f32 %v8479_v51, %v8447_v60  ;;  %v8496_v35 = vld [vmem:[%s11327_s21 + $0xc0] sm:$0xff]  ;;  %v8498_v14 = vld [vmem:[%s11327_s21 + $0xd0] sm:$0xff]  ;;  %v8499_v26 = vld [vmem:[%s11327_s21 + $0xd8] sm:$0xff] }
 0x6a4   : > { %v8512_v3 = vadd.f32 %v8480_v12, %v8448_v25  ;;  %v8513_v63 = vadd.f32 %v8481_v0, %v8449_v43  ;;  %v8514_v39 = vadd.f32 %v8482_v30, %v8450_v49  ;;  %v8515_v32 = vadd.f32 %v8483_v16, %v8451_v27  ;;  %8536 = vst.msk [vmem:[%s14808_s6] sm:$0xff] %vm171_vm1, %v8504_v48  ;;  %v8500_v20 = vld [vmem:[%s11327_s21 + $0xe0] sm:$0xff]  ;;  %v8501_v27 = vld [vmem:[%s11327_s21 + $0xe8] sm:$0xff] }
 0x6a5   : > { %8537 = vst.msk [vmem:[%s14808_s6 + $0x8] sm:$0xff] %vm171_vm1, %v8505_v37  ;;  %8538 = vst.msk [vmem:[%s14808_s6 + $0x10] sm:$0xff] %vm171_vm1, %v8506_v22  ;;  %v8516_v60 = vadd.f32 %v8484_v11, %v14757_v8  ;;  %v8517_v25 = vadd.f32 %v8485_v23, %v14759_v54  ;;  %v8518_v43 = vadd.f32 %v8486_v24, %v14761_v2  ;;  %v8502_v8 = vld [vmem:[%s11327_s21 + $0xf0] sm:$0xff]  ;;  %v8503_v54 = vld [vmem:[%s11327_s21 + $0xf8] sm:$0xff] }
 0x6a6   : > { %8539 = vst.msk [vmem:[%s14808_s6 + $0x18] sm:$0xff] %vm171_vm1, %v8507_v15  ;;  %v8519_v49 = vadd.f32 %v8487_v34, %v14763_v47  ;;  %8540 = vst.msk [vmem:[%s14808_s6 + $0x20] sm:$0xff] %vm171_vm1, %v8508_v53  ;;  %v8520_v2 = vadd.f32 %v8488_v57, %v14769_v5  ;;  %v8521_v4 = vadd.f32 %v8489_v10, %v14771_v52 }
 0x6a7   : > { %8541 = vst.msk [vmem:[%s14808_s6 + $0x28] sm:$0xff] %vm171_vm1, %v8509_v61  ;;  %8542 = vst.msk [vmem:[%s14808_s6 + $0x30] sm:$0xff] %vm171_vm1, %v8510_v40  ;;  %v8522_v47 = vadd.f32 %v8490_v31, %v14773_v59  ;;  %v8523_v58 = vadd.f32 %v8491_v56, %v14775_v44  ;;  %v8524_v13 = vadd.f32 %v8492_v21, %v14781_v17 }
 0x6a8   : > { %8543 = vst.msk [vmem:[%s14808_s6 + $0x38] sm:$0xff] %vm171_vm1, %v8511_v38  ;;  %8544 = vst.msk [vmem:[%s14808_s6 + $0x40] sm:$0xff] %vm171_vm1, %v8512_v3  ;;  %v8525_v5 = vadd.f32 %v8493_v33, %v14783_v6  ;;  %v8526_v52 = vadd.f32 %v8494_v45, %v14785_v28  ;;  %v8527_v59 = vadd.f32 %v8495_v55, %v14787_v9 }
 0x6a9   : > { %8545 = vst.msk [vmem:[%s14808_s6 + $0x48] sm:$0xff] %vm171_vm1, %v8513_v63  ;;  %8546 = vst.msk [vmem:[%s14808_s6 + $0x50] sm:$0xff] %vm171_vm1, %v8514_v39  ;;  %v8528_v44 = vadd.f32 %v8496_v35, %v14792_v1  ;;  %v8529_v18 = vadd.f32 %v8497_v36, %v14794_v7  ;;  %v8530_v41 = vadd.f32 %v8498_v14, %v14796_v19 }
 0x6aa   : > { %8547 = vst.msk [vmem:[%s14808_s6 + $0x58] sm:$0xff] %vm171_vm1, %v8515_v32  ;;  %8548 = vst.msk [vmem:[%s14808_s6 + $0x60] sm:$0xff] %vm171_vm1, %v8516_v60  ;;  %v8531_v42 = vadd.f32 %v8499_v26, %v14798_v46  ;;  %v8532_v51 = vadd.f32 %v8500_v20, %v14810_v29  ;;  %v8533_v17 = vadd.f32 %v8501_v27, %v14812_v50  ;;  %v15132_v28 = vld [vmem:[#allocation8_spill] sm:$0xff] }
 0x6ab   : > { %8549 = vst.msk [vmem:[%s14808_s6 + $0x68] sm:$0xff] %vm171_vm1, %v8517_v25  ;;  %8550 = vst.msk [vmem:[%s14808_s6 + $0x70] sm:$0xff] %vm171_vm1, %v8518_v43  ;;  %v8534_v6 = vadd.f32 %v8502_v8, %v14814_v62  ;;  %v8535_v9 = vadd.f32 %v8503_v54, %v15132_v28 }
 0x6ac   : > { %8551 = vst.msk [vmem:[%s14808_s6 + $0x78] sm:$0xff] %vm171_vm1, %v8519_v49  ;;  %8552 = vst.msk [vmem:[%s14808_s6 + $0x80] sm:$0xff] %vm171_vm1, %v8520_v2 }
 0x6ad   : > { %8553 = vst.msk [vmem:[%s14808_s6 + $0x88] sm:$0xff] %vm171_vm1, %v8521_v4  ;;  %8554 = vst.msk [vmem:[%s14808_s6 + $0x90] sm:$0xff] %vm171_vm1, %v8522_v47 }
 0x6ae   : > { %8555 = vst.msk [vmem:[%s14808_s6 + $0x98] sm:$0xff] %vm171_vm1, %v8523_v58  ;;  %8556 = vst.msk [vmem:[%s14808_s6 + $0xa0] sm:$0xff] %vm171_vm1, %v8524_v13 }
 0x6af   : > { %8557 = vst.msk [vmem:[%s14808_s6 + $0xa8] sm:$0xff] %vm171_vm1, %v8525_v5  ;;  %8558 = vst.msk [vmem:[%s14808_s6 + $0xb0] sm:$0xff] %vm171_vm1, %v8526_v52 }
 0x6b0   : > { %8559 = vst.msk [vmem:[%s14808_s6 + $0xb8] sm:$0xff] %vm171_vm1, %v8527_v59  ;;  %8560 = vst.msk [vmem:[%s14808_s6 + $0xc0] sm:$0xff] %vm171_vm1, %v8528_v44 }
 0x6b1   : > { %8561 = vst.msk [vmem:[%s14808_s6 + $0xc8] sm:$0xff] %vm171_vm1, %v8529_v18  ;;  %8562 = vst.msk [vmem:[%s14808_s6 + $0xd0] sm:$0xff] %vm171_vm1, %v8530_v41 }
 0x6b2   : > { %8563 = vst.msk [vmem:[%s14808_s6 + $0xd8] sm:$0xff] %vm171_vm1, %v8531_v42  ;;  %8564 = vst.msk [vmem:[%s14808_s6 + $0xe0] sm:$0xff] %vm171_vm1, %v8532_v51 }
 0x6b3   : > { %8565 = vst.msk [vmem:[%s14808_s6 + $0xe8] sm:$0xff] %vm171_vm1, %v8533_v17  ;;  %8566 = vst.msk [vmem:[%s14808_s6 + $0xf0] sm:$0xff] %vm171_vm1, %v8534_v6 }
 0x6b4   : > { %8567 = vst.msk [vmem:[%s14808_s6 + $0xf8] sm:$0xff] %vm171_vm1, %v8535_v9 }
 0x6b5 PF: > { %s13_s12 = sadd.s32 1, %s11271_s12  }
 0x6b6   : > { %p10_p4 = scmp.ge.s32.totalorder %s13_s12, 4  }
 0x6b8   :  { %12 = sbr.rel (!%p10_p4) target bundleno = 1 (0x1), region = 84 }

</bundles_post_ra>
